<compile_context>
chip_gen: v7x
topology: tpu7x:2x2x1
jax: 0.10.0
libtpu: 0.0.40
codegen_flags: <defaults>
</compile_context>

<pallas_src>
import functools

import numpy as np
import jax
import jax.numpy as jnp
from jax.experimental import pallas as pl
from jax.experimental.pallas import tpu as pltpu


# ----------------------------------------------------------------------------- helpers

def _round_up(v, m):
    return (v + m - 1) // m * m


@functools.lru_cache(maxsize=None)
def _compiler_params():
    # Generation-dependent VMEM budget: ~48 MiB on v7x (64 MiB physical VMEM),
    # ~96 MiB on v5e / v6e (128 MiB physical).  Fallback is the v7x-safe value.
    vmem = 48 * 1024 * 1024
    try:
        cap = int(pltpu.get_tpu_info().vmem_capacity_bytes)
        vmem = min((cap * 3) // 4, 96 * 1024 * 1024)
    except Exception:
        pass
    return pltpu.CompilerParams(
        dimension_semantics=("parallel",),
        vmem_limit_bytes=vmem,
    )


def _epilogue(y, b, g, act):
    # f32 epilogue on the VPU/EUP (free slots under the MXU-bound matmul).
    if b is not None:
        y = y + b
    if act == "relu":
        y = jnp.maximum(y, 0.0)
    elif act == "hardswish":
        y = y * jnp.clip(y + 3.0, 0.0, 6.0) * (1.0 / 6.0)
    elif act == "sigmoid":
        y = jax.nn.sigmoid(y)
    if g is not None:
        y = y * g.astype(jnp.float32)
    return y


# ----------------------------------------------------------------------------- fused matmul family (1x1 convs / classifier)

def _mm_bias_kernel(x_ref, w_ref, b_ref, o_ref, *, act):
    y = jnp.dot(x_ref[...], w_ref[...], preferred_element_type=jnp.float32)
    o_ref[...] = _epilogue(y, b_ref[...], None, act).astype(o_ref.dtype)


def _mm_bias_gate_kernel(x_ref, w_ref, b_ref, g_ref, o_ref, *, act):
    # fused: act(x @ w + b) * gate   (gate multiply is free in the epilogue)
    y = jnp.dot(x_ref[...], w_ref[...], preferred_element_type=jnp.float32)
    o_ref[...] = _epilogue(y, b_ref[...], g_ref[...], act).astype(o_ref.dtype)


def _dual_mm_bias_kernel(x1_ref, w1_ref, x2_ref, w2_ref, b_ref, o_ref, *, act):
    # fused classifier: x1 @ w1 + x2 @ w2 + b  -> one HBM write of the logits
    y = (jnp.dot(x1_ref[...], w1_ref[...], preferred_element_type=jnp.float32)
         + jnp.dot(x2_ref[...], w2_ref[...], preferred_element_type=jnp.float32))
    o_ref[...] = _epilogue(y, b_ref[...], None, act).astype(o_ref.dtype)


def fused_matmul(x, w, bias, act="none", gate=None, x2=None, w2=None,
                 out_dtype=jnp.bfloat16, n_pad_to=128, target_tile_bytes=4 << 20):
    """o = act(x @ w [+ x2 @ w2] + bias) [* gate]; returns (M, round_up(N, n_pad_to)).

    MXU operands bf16 (cast BEFORE padding), K padded to 16, N lane-padded; the f32
    epilogue casts to `out_dtype`.  Rows stream on a 1-D parallel grid with row-tile
    size scaled to a multi-MiB footprint so block DMA overlaps compute.
    """
    M = x.shape[0]
    N = w.shape[1]
    np_ = _round_up(N, n_pad_to)
    dual = x2 is not None

    def prep(a, b):
        a = a.astype(jnp.bfloat16)
        b = b.astype(jnp.bfloat16)
        kp = _round_up(a.shape[1], 16)            # bf16 packs 16 rows / sublane tile
        if kp != a.shape[1]:
            a = jnp.pad(a, ((0, 0), (0, kp - a.shape[1])))
            b = jnp.pad(b, ((0, kp - b.shape[0]), (0, 0)))
        if np_ != b.shape[1]:
            b = jnp.pad(b, ((0, 0), (0, np_ - b.shape[1])))
        return a, b

    x, w = prep(x, w)
    if dual:
        x2, w2 = prep(x2, w2)
    b2 = bias.astype(jnp.float32)
    if np_ != N:
        b2 = jnp.pad(b2, (0, np_ - N))
    b2 = b2.reshape(1, np_)
    if gate is not None:
        gate = gate.astype(jnp.bfloat16)
        if gate.shape[1] != np_:
            gate = jnp.pad(gate, ((0, 0), (0, np_ - gate.shape[1])))

    # Row-tile size scaled with the per-row VMEM footprint (amortizes per-step overhead
    # while staying well inside the per-generation VMEM budget).
    row_bytes = 2 * x.shape[1] + 4 * np_
    if dual:
        row_bytes += 2 * x2.shape[1]
    if gate is not None:
        row_bytes += 2 * np_
    m8 = _round_up(M, 8)
    tm = max(128, min(4096, target_tile_bytes // max(row_bytes, 1)))
    tm = min(_round_up(tm, 8), m8)
    nblk = -(-m8 // tm)
    tm = _round_up(-(-m8 // nblk), 8)
    m_pad = tm * nblk

    def pad_m(a):
        return a if a.shape[0] == m_pad else jnp.pad(a, ((0, m_pad - a.shape[0]), (0, 0)))

    def row_spec(arr):      # streamed (tm, .) row tiles
        return pl.BlockSpec((tm, arr.shape[1]), lambda i: (i, 0))

    def full_spec(arr):     # small resident operands (weights / bias)
        return pl.BlockSpec(arr.shape, lambda i: (0, 0))

    x = pad_m(x)
    operands = [x, w]
    in_specs = [row_spec(x), full_spec(w)]
    if dual:
        x2 = pad_m(x2)
        operands += [x2, w2]
        in_specs += [row_spec(x2), full_spec(w2)]
    operands.append(b2)
    in_specs.append(full_spec(b2))
    if gate is not None:
        gate = pad_m(gate)
        operands.append(gate)
        in_specs.append(row_spec(gate))

    if dual:
        kern = functools.partial(_dual_mm_bias_kernel, act=act)
    elif gate is not None:
        kern = functools.partial(_mm_bias_gate_kernel, act=act)
    else:
        kern = functools.partial(_mm_bias_kernel, act=act)

    out = pl.pallas_call(
        kern,
        out_shape=jax.ShapeDtypeStruct((m_pad, np_), out_dtype),
        grid=(nblk,),
        in_specs=in_specs,
        out_specs=pl.BlockSpec((tm, np_), lambda i: (i, 0)),
        compiler_params=_compiler_params(),
    )(*operands)
    return out if m_pad == M else out[:M]


def conv1x1(x, w_ic_oc, b, act, gate=None, out_dtype=jnp.bfloat16):
    B, H, W, C = x.shape
    g2 = gate.reshape(B * H * W, -1) if gate is not None else None
    y = fused_matmul(x.reshape(B * H * W, C), w_ic_oc, b, act=act, gate=g2,
                     out_dtype=out_dtype, n_pad_to=128)
    return y.reshape(B, H, W, -1)


def fused_classifier(up2, low, w_high, b_high, w_low, b_low):
    # high-res classifier + low-res classifier + add, in one dual-matmul kernel.
    B, H, W, _ = up2.shape
    y = fused_matmul(up2.reshape(B * H * W, -1), w_high, b_high + b_low, act="none",
                     x2=low.reshape(B * H * W, -1), w2=w_low,
                     out_dtype=jnp.float32, n_pad_to=128)
    return y.reshape(B, H, W, -1)          # channels lane-padded; tail slices them


# ----------------------------------------------------------------------------- 3x3 / stride-2 conv (no HBM im2col)

def _conv3x3s2_kernel(x_ref, w_ref, b_ref, o_ref, *, act):
    # x_ref: (1, Ho+1, Wo+1, C4) bf16 -- one image, spatially padded + space-to-depth
    # w_ref: (4, C4, N) bf16          -- the four remaining unit-stride 2x2 taps
    # b_ref: (1, N) f32 ; o_ref: (1, Ho, Wo, N)
    ho, wo = o_ref.shape[1], o_ref.shape[2]
    w_taps = [w_ref[t] for t in range(4)]
    bvec = b_ref[...]

    @pl.loop(0, ho)
    def _(p):
        acc = jnp.zeros((wo, o_ref.shape[3]), jnp.float32)
        for di in range(2):
            xrow = x_ref[0, p + di]                           # (Wo+1, C4) bf16
            for dj in range(2):
                acc = acc + jnp.dot(xrow[dj:dj + wo, :], w_taps[2 * di + dj],
                                    preferred_element_type=jnp.float32)
        o_ref[0, p] = _epilogue(acc, bvec, None, act).astype(o_ref.dtype)


def _pack_w_s2d(w_oihw, c4p):
    # (Cout, Cin, 3, 3) stride-2 kernel -> 4 unit-stride taps over the 4*Cin
    # space-to-depth channels: w4[2*di+dj, (r2,c2,cin), co] = W[2*di+r2, 2*dj+c2, cin, co]
    cout, cin, kh, kw = w_oihw.shape
    w = jnp.transpose(w_oihw, (2, 3, 1, 0))                    # (kh, kw, cin, cout)
    taps = []
    for di in range(2):
        for dj in range(2):
            blk = jnp.zeros((2, 2, cin, cout), w.dtype)
            for r2 in range(2):
                for c2 in range(2):
                    i, j = 2 * di + r2, 2 * dj + c2
                    if i < kh and j < kw:
                        blk = blk.at[r2, c2].set(w[i, j])
            blk = blk.reshape(4 * cin, cout)
            if c4p != 4 * cin:
                blk = jnp.pad(blk, ((0, c4p - 4 * cin), (0, 0)))
            taps.append(blk)
    return jnp.stack(taps, axis=0).astype(jnp.bfloat16)        # (4, c4p, cout)


def conv3x3_s2(x, w_oihw, b, act, out_dtype=jnp.bfloat16):
    """3x3 / stride-2 / pad-1 conv + bias + act (NHWC -> NHWC), no HBM im2col.

    One bf16 space-to-depth pass in the wrapper folds the stride into channels; the
    kernel runs the four remaining unit-stride taps as shifted in-VMEM matmuls.
    """
    B, H, W, cin = x.shape
    assert H % 2 == 0 and W % 2 == 0, "spatial dims must be even"
    ho, wo = H // 2, W // 2
    cout = w_oihw.shape[0]
    c4 = 4 * cin
    c4p = _round_up(c4, 16)

    x = x.astype(jnp.bfloat16)                                  # cast-then-pad
    xp = jnp.pad(x, ((0, 0), (1, 1), (1, 1), (0, 0)))
    xs = xp.reshape(B, ho + 1, 2, wo + 1, 2, cin)
    xs = jnp.transpose(xs, (0, 1, 3, 2, 4, 5)).reshape(B, ho + 1, wo + 1, c4)
    if c4p != c4:
        xs = jnp.pad(xs, ((0, 0), (0, 0), (0, 0), (0, c4p - c4)))

    w4 = _pack_w_s2d(w_oihw, c4p)
    b2 = b.astype(jnp.float32).reshape(1, cout)

    # NOTE: Cout is intentionally NOT lane-padded to 128 -- the stored activation is
    # HBM-bound and the true channel count keeps inter-layer HBM bytes minimal.
    return pl.pallas_call(
        functools.partial(_conv3x3s2_kernel, act=act),
        out_shape=jax.ShapeDtypeStruct((B, ho, wo, cout), out_dtype),
        grid=(B,),
        in_specs=[
            pl.BlockSpec((1, ho + 1, wo + 1, c4p), lambda bi: (bi, 0, 0, 0)),
            pl.BlockSpec((4, c4p, cout), lambda bi: (0, 0, 0)),
            pl.BlockSpec((1, cout), lambda bi: (0, 0)),
        ],
        out_specs=pl.BlockSpec((1, ho, wo, cout), lambda bi: (bi, 0, 0, 0)),
        compiler_params=_compiler_params(),
    )(xs, w4, b2)


# ----------------------------------------------------------------------------- separable spatial ops (resize / avg-pool), channels on lanes

def _separable_kernel(x_ref, mw_ref, o_ref, *, h_taps):
    # x_ref: (1, h, w, C) ; mw_ref: (wo, w) f32 ; o_ref: (1, Ho, wo, C)
    # W direction: one small MXU matmul per input row (C stays on the lane axis).
    # H direction: static <=k-tap weighted sum (2-tap lerp for bilinear) -- no
    # transposes, no dense H matrix, no HBM relayouts.
    mw = mw_ref[...]
    for ho, taps in enumerate(h_taps):
        acc = None
        for src, wgt in taps:
            row = jnp.dot(mw, x_ref[0, src].astype(jnp.float32),
                          preferred_element_type=jnp.float32)        # (wo, C)
            term = row * wgt
            acc = term if acc is None else acc + term
        o_ref[0, ho] = acc.astype(o_ref.dtype)


def _separable_spatial(x, mw_np, h_taps, out_h, out_dtype):
    B, h, w, C = x.shape
    wo = mw_np.shape[0]
    mw = jnp.asarray(mw_np, jnp.float32)
    return pl.pallas_call(
        functools.partial(_separable_kernel, h_taps=h_taps),
        out_shape=jax.ShapeDtypeStruct((B, out_h, wo, C), out_dtype),
        grid=(B,),
        in_specs=[pl.BlockSpec((1, h, w, C), lambda bi: (bi, 0, 0, 0)),
                  pl.BlockSpec((wo, w), lambda bi: (0, 0))],
        out_specs=pl.BlockSpec((1, out_h, wo, C), lambda bi: (bi, 0, 0, 0)),
        compiler_params=_compiler_params(),
    )(x, mw)


def _bilinear_matrix_np(out_size, in_size):
    # align_corners=True interpolation matrix (out_size, in_size)
    m = np.zeros((out_size, in_size), np.float32)
    if in_size == 1:
        m[:, 0] = 1.0
        return m
    for o in range(out_size):
        pos = 0.0 if out_size == 1 else o * (in_size - 1) / (out_size - 1)
        lo = int(np.floor(pos))
        hi = min(lo + 1, in_size - 1)
        fr = pos - lo
        m[o, lo] += 1.0 - fr
        m[o, hi] += fr
    return m


def _bilinear_h_taps(out_size, in_size):
    taps = []
    for o in range(out_size):
        if in_size == 1:
            taps.append(((0, 1.0),))
            continue
        pos = 0.0 if out_size == 1 else o * (in_size - 1) / (out_size - 1)
        lo = int(np.floor(pos))
        hi = min(lo + 1, in_size - 1)
        fr = float(pos - lo)
        if hi == lo or fr == 0.0:
            taps.append(((lo, 1.0),))
        else:
            taps.append(((lo, 1.0 - fr), (hi, fr)))
    return tuple(taps)


def _pool_matrix_np(in_size, k, s):
    out = (in_size - k) // s + 1
    m = np.zeros((out, in_size), np.float32)
    for o in range(out):
        m[o, o * s:o * s + k] = 1.0 / k
    return m


def _pool_h_taps(in_size, k, s):
    out = (in_size - k) // s + 1
    return tuple(tuple((o * s + t, 1.0 / k) for t in range(k)) for o in range(out))


def bilinear_resize(x, out_h, out_w, out_dtype=None):
    # bilinear, align_corners=True (matches nn.Upsample(..., align_corners=True))
    B, H, W, C = x.shape
    out_dtype = out_dtype or x.dtype
    if H == out_h and W == out_w:
        return x.astype(out_dtype)
    if H == 1 and W == 1:
        return jnp.broadcast_to(x.astype(out_dtype), (B, out_h, out_w, C))
    return _separable_spatial(x, _bilinear_matrix_np(out_w, W),
                              _bilinear_h_taps(out_h, H), out_h, out_dtype)


def avg_pool(x, kh, kw, sh, sw, out_dtype=None):
    # AvgPool2d (floor mode, no padding) as one separable kernel, channels on lanes.
    B, H, W, C = x.shape
    out_dtype = out_dtype or x.dtype
    out_h = (H - kh) // sh + 1
    return _separable_spatial(x, _pool_matrix_np(W, kw, sw),
                              _pool_h_taps(H, kh, sh), out_h, out_dtype)


# ----------------------------------------------------------------------------- x8 upsample + center crop tail (emits NCHW directly)

def _upsample_tail_kernel(y_ref, mh_ref, mwt_ref, o_ref):
    # one (image, class) plane per grid step: crop-folded  Mh @ y @ Mw^T  in VMEM
    t = jnp.dot(mh_ref[...], y_ref[0], preferred_element_type=jnp.float32)    # (H, w)
    o_ref[0] = jnp.dot(t, mwt_ref[...], preferred_element_type=jnp.float32)   # (H, W)


def upsample8_crop_nchw(y_nhwc, num_classes, out_h, out_w):
    """x8 bilinear upsample (align_corners=True) + center crop, output in NCHW.

    The 1/8-res logits are tiny, so one cheap transpose makes them channels-first;
    each plane then upsamples with two chained 2-D matmuls whose spatial axes sit on
    the sublane/lane axes -- no HBM relayout of the full-resolution output and no
    final NHWC->NCHW transpose.
    """
    B, h, w, _ = y_nhwc.shape
    y = jnp.transpose(y_nhwc[..., :num_classes], (0, 3, 1, 2)).astype(jnp.float32)
    y = y.reshape(B * num_classes, h, w)
    up_h, up_w = 8 * h, 8 * w
    top, left = (up_h - out_h) // 2, (up_w - out_w) // 2
    mh = jnp.asarray(_bilinear_matrix_np(up_h, h)[top:top + out_h])            # (H, h)
    mwt = jnp.asarray(np.ascontiguousarray(
        _bilinear_matrix_np(up_w, w)[left:left + out_w].T))                    # (w, W)
    out = pl.pallas_call(
        _upsample_tail_kernel,
        out_shape=jax.ShapeDtypeStruct((B * num_classes, out_h, out_w), jnp.float32),
        grid=(B * num_classes,),
        in_specs=[pl.BlockSpec((1, h, w), lambda i: (i, 0, 0)),
                  pl.BlockSpec((out_h, h), lambda i: (0, 0)),
                  pl.BlockSpec((w, out_w), lambda i: (0, 0))],
        out_specs=pl.BlockSpec((1, out_h, out_w), lambda i: (i, 0, 0)),
        compiler_params=_compiler_params(),
    )(y, mh, mwt)
    return out.reshape(B, num_classes, out_h, out_w)


# ----------------------------------------------------------------------------- parameters

C_LOW = 40       # backbone.feature_dims[-3][-1] for mobilenet_v3_large
C_HIGH = 160     # backbone.feature_dims[-1][-2] for mobilenet_v3_large
HIDDEN = 128     # lr-aspp hidden_dim
NUM_CLASSES = 4  # output_size


def _fold_bn_conv(w_oihw, gamma, beta, mean, var, eps=1e-5):
    scale = gamma / jnp.sqrt(var + eps)
    return w_oihw * scale[:, None, None, None], beta - mean * scale


def _fold_bn_1x1(w_ic_oc, gamma, beta, mean, var, eps=1e-5):
    scale = gamma / jnp.sqrt(var + eps)
    return w_ic_oc * scale[None, :], beta - mean * scale


def init_params(key):
    ks = iter(jax.random.split(key, 32))

    def conv_bn(cout, cin, k):
        w = 0.1 * jax.random.normal(next(ks), (cout, cin, k, k), jnp.float32)
        gamma = 1.0 + 0.02 * jax.random.normal(next(ks), (cout,), jnp.float32)
        beta = 0.02 * jax.random.normal(next(ks), (cout,), jnp.float32)
        mean = 0.02 * jax.random.normal(next(ks), (cout,), jnp.float32)
        var = 1.0 + 0.1 * jnp.abs(jax.random.normal(next(ks), (cout,), jnp.float32))
        return _fold_bn_conv(w, gamma, beta, mean, var)

    def lin_bn(cin, cout):
        w = 0.1 * jax.random.normal(next(ks), (cin, cout), jnp.float32)
        gamma = 1.0 + 0.02 * jax.random.normal(next(ks), (cout,), jnp.float32)
        beta = 0.02 * jax.random.normal(next(ks), (cout,), jnp.float32)
        mean = 0.02 * jax.random.normal(next(ks), (cout,), jnp.float32)
        var = 1.0 + 0.1 * jnp.abs(jax.random.normal(next(ks), (cout,), jnp.float32))
        return _fold_bn_1x1(w, gamma, beta, mean, var)

    def lin(cin, cout):
        w = 0.1 * jax.random.normal(next(ks), (cin, cout), jnp.float32)
        b = 0.02 * jax.random.normal(next(ks), (cout,), jnp.float32)
        return w, b

    p = {}
    # backbone stand-in (stride 2, 4, 8, 16)
    p["bb1_w"], p["bb1_b"] = conv_bn(16, 3, 3)
    p["bb2_w"], p["bb2_b"] = conv_bn(24, 16, 3)
    p["bb3_w"], p["bb3_b"] = conv_bn(C_LOW, 24, 3)
    p["bb4_w"], p["bb4_b"] = conv_bn(C_HIGH, C_LOW, 3)
    # LR-ASPP head
    p["cbr_w"], p["cbr_b"] = lin_bn(C_HIGH, HIDDEN)              # 1x1 conv + BN + ReLU
    p["scale_w"], p["scale_b"] = lin(C_HIGH, HIDDEN)             # pool branch 1x1 -> sigmoid
    p["cls_high_w"], p["cls_high_b"] = lin(HIDDEN, NUM_CLASSES)
    p["cls_low_w"], p["cls_low_b"] = lin(C_LOW, NUM_CLASSES)
    return p


# ----------------------------------------------------------------------------- forward

def mobilenet_v3_seg_forward(params, x_nchw,
                             pool_kernel_size=(3, 3), pool_stride=(2, 2)):
    """Equivalent of MobileNetV3Seg.forward. Input NCHW float32, output NCHW float32."""
    B, _, H, W = x_nchw.shape
    x = jnp.transpose(x_nchw, (0, 2, 3, 1))      # -> NHWC (channels on the lane axis)

    # ---- backbone (stand-in, see TODO): stride-8 and stride-16 features, bf16
    f = conv3x3_s2(x, params["bb1_w"], params["bb1_b"], act="hardswish")
    f = conv3x3_s2(f, params["bb2_w"], params["bb2_b"], act="relu")
    low = conv3x3_s2(f, params["bb3_w"], params["bb3_b"], act="hardswish")     # (B,H/8, W/8, 40)
    high = conv3x3_s2(low, params["bb4_w"], params["bb4_b"], act="hardswish")  # (B,H/16,W/16,160)

    # ---- LR-ASPP head (pool branch first so the sigmoid gate fuses into the cbr conv)
    hh, wh = high.shape[1], high.shape[2]
    pooled = avg_pool(high, pool_kernel_size[0], pool_kernel_size[1],
                      pool_stride[0], pool_stride[1])                           # AvgPool2d
    gate = conv1x1(pooled, params["scale_w"], params["scale_b"], act="sigmoid")
    gate_up = bilinear_resize(gate, hh, wh)                                     # back to 1/16 size
    gated = conv1x1(high, params["cbr_w"], params["cbr_b"], act="relu",
                    gate=gate_up)                                               # relu(1x1+BN) * gate
    up2 = bilinear_resize(gated, low.shape[1], low.shape[2])                    # x2 to 1/8 size
    y = fused_classifier(up2, low,
                         params["cls_high_w"], params["cls_high_b"],
                         params["cls_low_w"], params["cls_low_b"])              # (B, H/8, W/8, K)

    # ---- model tail: x8 bilinear upsample (align_corners=True) + fused center crop, NCHW
    return upsample8_crop_nchw(y, NUM_CLASSES, H, W)


# ----------------------------------------------------------------------------- main

if __name__ == "__main__":
    key = jax.random.PRNGKey(0)
    pkey, xkey = jax.random.split(key)
    params = init_params(pkey)

    # small but stride-16-compatible input (NCHW like the PyTorch module)
    x = jax.random.normal(xkey, (2, 3, 64, 64), jnp.float32)

    fwd = jax.jit(mobilenet_v3_seg_forward)
    y = jax.block_until_ready(fwd(params, x))

    assert y.shape == (2, NUM_CLASSES, 64, 64), y.shape
    assert y.dtype == jnp.float32
    assert bool(jnp.all(jnp.isfinite(y)))
    print("KERNEL_OK")
</pallas_src>

<mosaic_0001>
module attributes {stable_mosaic.version = 11 : i64} {
  func.func @_conv3x3s2_kernel(%arg0: i32, %arg1: memref<1x33x33x16xbf16, #tpu.memory_space<vmem>>, %arg2: memref<4x16x16xbf16, #tpu.memory_space<vmem>>, %arg3: memref<1x16xf32, #tpu.memory_space<vmem>>, %arg4: memref<1x32x32x16xbf16, #tpu.memory_space<vmem>>) attributes {dimension_semantics = [#tpu.dimension_semantics<parallel>], iteration_bounds = array<i64: 2>, scalar_prefetch = 0 : i64, scratch_operands = 0 : i64, tpu.core_type = #tpu.core_type<tc>, window_params = [{transform_indices = @transform_0, window_bounds = array<i64: 1, 33, 33, 16>}, {pipeline_mode = #tpu.pipeline_mode<synchronous>, transform_indices = @transform_1, window_bounds = array<i64: 4, 16, 16>}, {pipeline_mode = #tpu.pipeline_mode<synchronous>, transform_indices = @transform_2, window_bounds = array<i64: 1, 16>}, {transform_indices = @transform_3, window_bounds = array<i64: 1, 32, 32, 16>}]} {
    %c0 = arith.constant 0 : index
    %c0_0 = arith.constant 0 : index
    %c0_1 = arith.constant 0 : index
    %0 = vector.load %arg2[%c0, %c0_0, %c0_1] : memref<4x16x16xbf16, #tpu.memory_space<vmem>>, vector<1x16x16xbf16>
    %1 = vector.shape_cast %0 : vector<1x16x16xbf16> to vector<16x16xbf16>
    %c1 = arith.constant 1 : index
    %c0_2 = arith.constant 0 : index
    %c0_3 = arith.constant 0 : index
    %2 = vector.load %arg2[%c1, %c0_2, %c0_3] : memref<4x16x16xbf16, #tpu.memory_space<vmem>>, vector<1x16x16xbf16>
    %3 = vector.shape_cast %2 : vector<1x16x16xbf16> to vector<16x16xbf16>
    %c2 = arith.constant 2 : index
    %c0_4 = arith.constant 0 : index
    %c0_5 = arith.constant 0 : index
    %4 = vector.load %arg2[%c2, %c0_4, %c0_5] : memref<4x16x16xbf16, #tpu.memory_space<vmem>>, vector<1x16x16xbf16>
    %5 = vector.shape_cast %4 : vector<1x16x16xbf16> to vector<16x16xbf16>
    %c3 = arith.constant 3 : index
    %c0_6 = arith.constant 0 : index
    %c0_7 = arith.constant 0 : index
    %6 = vector.load %arg2[%c3, %c0_6, %c0_7] : memref<4x16x16xbf16, #tpu.memory_space<vmem>>, vector<1x16x16xbf16>
    %7 = vector.shape_cast %6 : vector<1x16x16xbf16> to vector<16x16xbf16>
    %c0_8 = arith.constant 0 : index
    %c0_9 = arith.constant 0 : index
    %8 = vector.load %arg3[%c0_8, %c0_9] : memref<1x16xf32, #tpu.memory_space<vmem>>, vector<1x16xf32>
    %c0_i32 = arith.constant 0 : i32
    %c32_i32 = arith.constant 32 : i32
    %9 = arith.addi %c0_i32, %c32_i32 : i32
    %c1_i32 = arith.constant 1 : i32
    scf.for %arg5 = %c0_i32 to %9 step %c1_i32  : i32 {
      %c1_i32_11 = arith.constant 1 : i32
      %10 = arith.muli %arg5, %c1_i32_11 : i32
      %c0_i32_12 = arith.constant 0 : i32
      %11 = arith.addi %c0_i32_12, %10 : i32
      %cst = arith.constant 0.000000e+00 : f32
      %12 = vector.broadcast %cst : f32 to vector<32x16xf32>
      %c0_i32_13 = arith.constant 0 : i32
      %13 = arith.addi %11, %c0_i32_13 : i32
      %c0_14 = arith.constant 0 : index
      %14 = arith.index_cast %13 : i32 to index
      %c0_15 = arith.constant 0 : index
      %c0_16 = arith.constant 0 : index
      %15 = vector.load %arg1[%c0_14, %14, %c0_15, %c0_16] : memref<1x33x33x16xbf16, #tpu.memory_space<vmem>>, vector<1x1x33x16xbf16>
      %16 = vector.shape_cast %15 : vector<1x1x33x16xbf16> to vector<33x16xbf16>
      %17 = vector.extract_strided_slice %16 {offsets = [0, 0], sizes = [32, 16], strides = [1, 1]} : vector<33x16xbf16> to vector<32x16xbf16>
      %cst_17 = arith.constant dense<0.000000e+00> : vector<32x16xf32>
      %18 = tpu.matmul %17, %1, %cst_17 {dimension_numbers = #tpu.dot_dimension_numbers<[1], [0], [0], [1], [0, 0, 1, 1], [], []>} : vector<32x16xbf16>, vector<16x16xbf16>, vector<32x16xf32> -> vector<32x16xf32>
      %19 = arith.addf %12, %18 : vector<32x16xf32>
      %20 = vector.extract_strided_slice %16 {offsets = [1, 0], sizes = [32, 16], strides = [1, 1]} : vector<33x16xbf16> to vector<32x16xbf16>
      %cst_18 = arith.constant dense<0.000000e+00> : vector<32x16xf32>
      %21 = tpu.matmul %20, %3, %cst_18 {dimension_numbers = #tpu.dot_dimension_numbers<[1], [0], [0], [1], [0, 0, 1, 1], [], []>} : vector<32x16xbf16>, vector<16x16xbf16>, vector<32x16xf32> -> vector<32x16xf32>
      %22 = arith.addf %19, %21 : vector<32x16xf32>
      %c1_i32_19 = arith.constant 1 : i32
      %23 = arith.addi %11, %c1_i32_19 : i32
      %c0_20 = arith.constant 0 : index
      %24 = arith.index_cast %23 : i32 to index
      %c0_21 = arith.constant 0 : index
      %c0_22 = arith.constant 0 : index
      %25 = vector.load %arg1[%c0_20, %24, %c0_21, %c0_22] : memref<1x33x33x16xbf16, #tpu.memory_space<vmem>>, vector<1x1x33x16xbf16>
      %26 = vector.shape_cast %25 : vector<1x1x33x16xbf16> to vector<33x16xbf16>
      %27 = vector.extract_strided_slice %26 {offsets = [0, 0], sizes = [32, 16], strides = [1, 1]} : vector<33x16xbf16> to vector<32x16xbf16>
      %cst_23 = arith.constant dense<0.000000e+00> : vector<32x16xf32>
      %28 = tpu.matmul %27, %5, %cst_23 {dimension_numbers = #tpu.dot_dimension_numbers<[1], [0], [0], [1], [0, 0, 1, 1], [], []>} : vector<32x16xbf16>, vector<16x16xbf16>, vector<32x16xf32> -> vector<32x16xf32>
      %29 = arith.addf %22, %28 : vector<32x16xf32>
      %30 = vector.extract_strided_slice %26 {offsets = [1, 0], sizes = [32, 16], strides = [1, 1]} : vector<33x16xbf16> to vector<32x16xbf16>
      %cst_24 = arith.constant dense<0.000000e+00> : vector<32x16xf32>
      %31 = tpu.matmul %30, %7, %cst_24 {dimension_numbers = #tpu.dot_dimension_numbers<[1], [0], [0], [1], [0, 0, 1, 1], [], []>} : vector<32x16xbf16>, vector<16x16xbf16>, vector<32x16xf32> -> vector<32x16xf32>
      %32 = arith.addf %29, %31 : vector<32x16xf32>
      %33 = vector.broadcast %8 : vector<1x16xf32> to vector<32x16xf32>
      %34 = arith.addf %32, %33 : vector<32x16xf32>
      %cst_25 = arith.constant 3.000000e+00 : f32
      %35 = vector.broadcast %cst_25 : f32 to vector<32x16xf32>
      %36 = arith.addf %34, %35 : vector<32x16xf32>
      %cst_26 = arith.constant 0.000000e+00 : f32
      %cst_27 = arith.constant 6.000000e+00 : f32
      %37 = vector.broadcast %cst_26 : f32 to vector<32x16xf32>
      %38 = arith.maximumf %37, %36 : vector<32x16xf32>
      %39 = vector.broadcast %cst_27 : f32 to vector<32x16xf32>
      %40 = arith.minimumf %39, %38 : vector<32x16xf32>
      %41 = arith.mulf %34, %40 : vector<32x16xf32>
      %cst_28 = arith.constant 0.166666672 : f32
      %42 = vector.broadcast %cst_28 : f32 to vector<32x16xf32>
      %43 = arith.mulf %41, %42 : vector<32x16xf32>
      %44 = arith.truncf %43 : vector<32x16xf32> to vector<32x16xbf16>
      %c0_29 = arith.constant 0 : index
      %45 = arith.index_cast %11 : i32 to index
      %c0_30 = arith.constant 0 : index
      %c0_31 = arith.constant 0 : index
      %46 = vector.load %arg4[%c0_29, %45, %c0_30, %c0_31] : memref<1x32x32x16xbf16, #tpu.memory_space<vmem>>, vector<1x1x32x16xbf16>
      %47 = vector.shape_cast %46 : vector<1x1x32x16xbf16> to vector<32x16xbf16>
      %48 = vector.shape_cast %44 : vector<32x16xbf16> to vector<1x1x32x16xbf16>
      tpu.vector_store %arg4[%c0_29, %45, %c0_30, %c0_31], %48 {strides = array<i32>} : memref<1x32x32x16xbf16, #tpu.memory_space<vmem>>, vector<1x1x32x16xbf16>,
    }
    %c32_i32_10 = arith.constant 32 : i32
    return
  }
  func.func @transform_0(%arg0: i32) -> (i32, i32, i32, i32) {
    %c0_i32 = arith.constant 0 : i32
    %c0_i32_0 = arith.constant 0 : i32
    %c0_i32_1 = arith.constant 0 : i32
    %c0_i32_2 = arith.constant 0 : i32
    return %arg0, %c0_i32, %c0_i32_0, %c0_i32_1 : i32, i32, i32, i32
  }
  func.func @transform_1(%arg0: i32) -> (i32, i32, i32) {
    %c0_i32 = arith.constant 0 : i32
    %c0_i32_0 = arith.constant 0 : i32
    %c0_i32_1 = arith.constant 0 : i32
    %c0_i32_2 = arith.constant 0 : i32
    return %c0_i32, %c0_i32_0, %c0_i32_1 : i32, i32, i32
  }
  func.func @transform_2(%arg0: i32) -> (i32, i32) {
    %c0_i32 = arith.constant 0 : i32
    %c0_i32_0 = arith.constant 0 : i32
    %c0_i32_1 = arith.constant 0 : i32
    return %c0_i32, %c0_i32_0 : i32, i32
  }
  func.func @transform_3(%arg0: i32) -> (i32, i32, i32, i32) {
    %c0_i32 = arith.constant 0 : i32
    %c0_i32_0 = arith.constant 0 : i32
    %c0_i32_1 = arith.constant 0 : i32
    %c0_i32_2 = arith.constant 0 : i32
    return %arg0, %c0_i32, %c0_i32_0, %c0_i32_1 : i32, i32, i32, i32
  }
}

module attributes {stable_mosaic.version = 11 : i64} {
  func.func @_conv3x3s2_kernel(%arg0: i32, %arg1: memref<1x17x17x64xbf16, #tpu.memory_space<vmem>>, %arg2: memref<4x64x24xbf16, #tpu.memory_space<vmem>>, %arg3: memref<1x24xf32, #tpu.memory_space<vmem>>, %arg4: memref<1x16x16x24xbf16, #tpu.memory_space<vmem>>) attributes {dimension_semantics = [#tpu.dimension_semantics<parallel>], iteration_bounds = array<i64: 2>, scalar_prefetch = 0 : i64, scratch_operands = 0 : i64, tpu.core_type = #tpu.core_type<tc>, window_params = [{transform_indices = @transform_0, window_bounds = array<i64: 1, 17, 17, 64>}, {pipeline_mode = #tpu.pipeline_mode<synchronous>, transform_indices = @transform_1, window_bounds = array<i64: 4, 64, 24>}, {pipeline_mode = #tpu.pipeline_mode<synchronous>, transform_indices = @transform_2, window_bounds = array<i64: 1, 24>}, {transform_indices = @transform_3, window_bounds = array<i64: 1, 16, 16, 24>}]} {
    %c0 = arith.constant 0 : index
    %c0_0 = arith.constant 0 : index
    %c0_1 = arith.constant 0 : index
    %0 = vector.load %arg2[%c0, %c0_0, %c0_1] : memref<4x64x24xbf16, #tpu.memory_space<vmem>>, vector<1x64x24xbf16>
    %1 = vector.shape_cast %0 : vector<1x64x24xbf16> to vector<64x24xbf16>
    %c1 = arith.constant 1 : index
    %c0_2 = arith.constant 0 : index
    %c0_3 = arith.constant 0 : index
    %2 = vector.load %arg2[%c1, %c0_2, %c0_3] : memref<4x64x24xbf16, #tpu.memory_space<vmem>>, vector<1x64x24xbf16>
    %3 = vector.shape_cast %2 : vector<1x64x24xbf16> to vector<64x24xbf16>
    %c2 = arith.constant 2 : index
    %c0_4 = arith.constant 0 : index
    %c0_5 = arith.constant 0 : index
    %4 = vector.load %arg2[%c2, %c0_4, %c0_5] : memref<4x64x24xbf16, #tpu.memory_space<vmem>>, vector<1x64x24xbf16>
    %5 = vector.shape_cast %4 : vector<1x64x24xbf16> to vector<64x24xbf16>
    %c3 = arith.constant 3 : index
    %c0_6 = arith.constant 0 : index
    %c0_7 = arith.constant 0 : index
    %6 = vector.load %arg2[%c3, %c0_6, %c0_7] : memref<4x64x24xbf16, #tpu.memory_space<vmem>>, vector<1x64x24xbf16>
    %7 = vector.shape_cast %6 : vector<1x64x24xbf16> to vector<64x24xbf16>
    %c0_8 = arith.constant 0 : index
    %c0_9 = arith.constant 0 : index
    %8 = vector.load %arg3[%c0_8, %c0_9] : memref<1x24xf32, #tpu.memory_space<vmem>>, vector<1x24xf32>
    %c0_i32 = arith.constant 0 : i32
    %c16_i32 = arith.constant 16 : i32
    %9 = arith.addi %c0_i32, %c16_i32 : i32
    %c1_i32 = arith.constant 1 : i32
    scf.for %arg5 = %c0_i32 to %9 step %c1_i32  : i32 {
      %c1_i32_11 = arith.constant 1 : i32
      %10 = arith.muli %arg5, %c1_i32_11 : i32
      %c0_i32_12 = arith.constant 0 : i32
      %11 = arith.addi %c0_i32_12, %10 : i32
      %cst = arith.constant 0.000000e+00 : f32
      %12 = vector.broadcast %cst : f32 to vector<16x24xf32>
      %c0_i32_13 = arith.constant 0 : i32
      %13 = arith.addi %11, %c0_i32_13 : i32
      %c0_14 = arith.constant 0 : index
      %14 = arith.index_cast %13 : i32 to index
      %c0_15 = arith.constant 0 : index
      %c0_16 = arith.constant 0 : index
      %15 = vector.load %arg1[%c0_14, %14, %c0_15, %c0_16] : memref<1x17x17x64xbf16, #tpu.memory_space<vmem>>, vector<1x1x17x64xbf16>
      %16 = vector.shape_cast %15 : vector<1x1x17x64xbf16> to vector<17x64xbf16>
      %17 = vector.extract_strided_slice %16 {offsets = [0, 0], sizes = [16, 64], strides = [1, 1]} : vector<17x64xbf16> to vector<16x64xbf16>
      %cst_17 = arith.constant dense<0.000000e+00> : vector<16x24xf32>
      %18 = tpu.matmul %17, %1, %cst_17 {dimension_numbers = #tpu.dot_dimension_numbers<[1], [0], [0], [1], [0, 0, 1, 1], [], []>} : vector<16x64xbf16>, vector<64x24xbf16>, vector<16x24xf32> -> vector<16x24xf32>
      %19 = arith.addf %12, %18 : vector<16x24xf32>
      %20 = vector.extract_strided_slice %16 {offsets = [1, 0], sizes = [16, 64], strides = [1, 1]} : vector<17x64xbf16> to vector<16x64xbf16>
      %cst_18 = arith.constant dense<0.000000e+00> : vector<16x24xf32>
      %21 = tpu.matmul %20, %3, %cst_18 {dimension_numbers = #tpu.dot_dimension_numbers<[1], [0], [0], [1], [0, 0, 1, 1], [], []>} : vector<16x64xbf16>, vector<64x24xbf16>, vector<16x24xf32> -> vector<16x24xf32>
      %22 = arith.addf %19, %21 : vector<16x24xf32>
      %c1_i32_19 = arith.constant 1 : i32
      %23 = arith.addi %11, %c1_i32_19 : i32
      %c0_20 = arith.constant 0 : index
      %24 = arith.index_cast %23 : i32 to index
      %c0_21 = arith.constant 0 : index
      %c0_22 = arith.constant 0 : index
      %25 = vector.load %arg1[%c0_20, %24, %c0_21, %c0_22] : memref<1x17x17x64xbf16, #tpu.memory_space<vmem>>, vector<1x1x17x64xbf16>
      %26 = vector.shape_cast %25 : vector<1x1x17x64xbf16> to vector<17x64xbf16>
      %27 = vector.extract_strided_slice %26 {offsets = [0, 0], sizes = [16, 64], strides = [1, 1]} : vector<17x64xbf16> to vector<16x64xbf16>
      %cst_23 = arith.constant dense<0.000000e+00> : vector<16x24xf32>
      %28 = tpu.matmul %27, %5, %cst_23 {dimension_numbers = #tpu.dot_dimension_numbers<[1], [0], [0], [1], [0, 0, 1, 1], [], []>} : vector<16x64xbf16>, vector<64x24xbf16>, vector<16x24xf32> -> vector<16x24xf32>
      %29 = arith.addf %22, %28 : vector<16x24xf32>
      %30 = vector.extract_strided_slice %26 {offsets = [1, 0], sizes = [16, 64], strides = [1, 1]} : vector<17x64xbf16> to vector<16x64xbf16>
      %cst_24 = arith.constant dense<0.000000e+00> : vector<16x24xf32>
      %31 = tpu.matmul %30, %7, %cst_24 {dimension_numbers = #tpu.dot_dimension_numbers<[1], [0], [0], [1], [0, 0, 1, 1], [], []>} : vector<16x64xbf16>, vector<64x24xbf16>, vector<16x24xf32> -> vector<16x24xf32>
      %32 = arith.addf %29, %31 : vector<16x24xf32>
      %33 = vector.broadcast %8 : vector<1x24xf32> to vector<16x24xf32>
      %34 = arith.addf %32, %33 : vector<16x24xf32>
      %cst_25 = arith.constant 0.000000e+00 : f32
      %35 = vector.broadcast %cst_25 : f32 to vector<16x24xf32>
      %36 = arith.maximumf %34, %35 : vector<16x24xf32>
      %37 = arith.truncf %36 : vector<16x24xf32> to vector<16x24xbf16>
      %c0_26 = arith.constant 0 : index
      %38 = arith.index_cast %11 : i32 to index
      %c0_27 = arith.constant 0 : index
      %c0_28 = arith.constant 0 : index
      %39 = vector.load %arg4[%c0_26, %38, %c0_27, %c0_28] : memref<1x16x16x24xbf16, #tpu.memory_space<vmem>>, vector<1x1x16x24xbf16>
      %40 = vector.shape_cast %39 : vector<1x1x16x24xbf16> to vector<16x24xbf16>
      %41 = vector.shape_cast %37 : vector<16x24xbf16> to vector<1x1x16x24xbf16>
      tpu.vector_store %arg4[%c0_26, %38, %c0_27, %c0_28], %41 {strides = array<i32>} : memref<1x16x16x24xbf16, #tpu.memory_space<vmem>>, vector<1x1x16x24xbf16>,
    }
    %c16_i32_10 = arith.constant 16 : i32
    return
  }
  func.func @transform_0(%arg0: i32) -> (i32, i32, i32, i32) {
    %c0_i32 = arith.constant 0 : i32
    %c0_i32_0 = arith.constant 0 : i32
    %c0_i32_1 = arith.constant 0 : i32
    %c0_i32_2 = arith.constant 0 : i32
    return %arg0, %c0_i32, %c0_i32_0, %c0_i32_1 : i32, i32, i32, i32
  }
  func.func @transform_1(%arg0: i32) -> (i32, i32, i32) {
    %c0_i32 = arith.constant 0 : i32
    %c0_i32_0 = arith.constant 0 : i32
    %c0_i32_1 = arith.constant 0 : i32
    %c0_i32_2 = arith.constant 0 : i32
    return %c0_i32, %c0_i32_0, %c0_i32_1 : i32, i32, i32
  }
  func.func @transform_2(%arg0: i32) -> (i32, i32) {
    %c0_i32 = arith.constant 0 : i32
    %c0_i32_0 = arith.constant 0 : i32
    %c0_i32_1 = arith.constant 0 : i32
    return %c0_i32, %c0_i32_0 : i32, i32
  }
  func.func @transform_3(%arg0: i32) -> (i32, i32, i32, i32) {
    %c0_i32 = arith.constant 0 : i32
    %c0_i32_0 = arith.constant 0 : i32
    %c0_i32_1 = arith.constant 0 : i32
    %c0_i32_2 = arith.constant 0 : i32
    return %arg0, %c0_i32, %c0_i32_0, %c0_i32_1 : i32, i32, i32, i32
  }
}

module attributes {stable_mosaic.version = 11 : i64} {
  func.func @_conv3x3s2_kernel(%arg0: i32, %arg1: memref<1x9x9x96xbf16, #tpu.memory_space<vmem>>, %arg2: memref<4x96x40xbf16, #tpu.memory_space<vmem>>, %arg3: memref<1x40xf32, #tpu.memory_space<vmem>>, %arg4: memref<1x8x8x40xbf16, #tpu.memory_space<vmem>>) attributes {dimension_semantics = [#tpu.dimension_semantics<parallel>], iteration_bounds = array<i64: 2>, scalar_prefetch = 0 : i64, scratch_operands = 0 : i64, tpu.core_type = #tpu.core_type<tc>, window_params = [{transform_indices = @transform_0, window_bounds = array<i64: 1, 9, 9, 96>}, {pipeline_mode = #tpu.pipeline_mode<synchronous>, transform_indices = @transform_1, window_bounds = array<i64: 4, 96, 40>}, {pipeline_mode = #tpu.pipeline_mode<synchronous>, transform_indices = @transform_2, window_bounds = array<i64: 1, 40>}, {transform_indices = @transform_3, window_bounds = array<i64: 1, 8, 8, 40>}]} {
    %c0 = arith.constant 0 : index
    %c0_0 = arith.constant 0 : index
    %c0_1 = arith.constant 0 : index
    %0 = vector.load %arg2[%c0, %c0_0, %c0_1] : memref<4x96x40xbf16, #tpu.memory_space<vmem>>, vector<1x96x40xbf16>
    %1 = vector.shape_cast %0 : vector<1x96x40xbf16> to vector<96x40xbf16>
    %c1 = arith.constant 1 : index
    %c0_2 = arith.constant 0 : index
    %c0_3 = arith.constant 0 : index
    %2 = vector.load %arg2[%c1, %c0_2, %c0_3] : memref<4x96x40xbf16, #tpu.memory_space<vmem>>, vector<1x96x40xbf16>
    %3 = vector.shape_cast %2 : vector<1x96x40xbf16> to vector<96x40xbf16>
    %c2 = arith.constant 2 : index
    %c0_4 = arith.constant 0 : index
    %c0_5 = arith.constant 0 : index
    %4 = vector.load %arg2[%c2, %c0_4, %c0_5] : memref<4x96x40xbf16, #tpu.memory_space<vmem>>, vector<1x96x40xbf16>
    %5 = vector.shape_cast %4 : vector<1x96x40xbf16> to vector<96x40xbf16>
    %c3 = arith.constant 3 : index
    %c0_6 = arith.constant 0 : index
    %c0_7 = arith.constant 0 : index
    %6 = vector.load %arg2[%c3, %c0_6, %c0_7] : memref<4x96x40xbf16, #tpu.memory_space<vmem>>, vector<1x96x40xbf16>
    %7 = vector.shape_cast %6 : vector<1x96x40xbf16> to vector<96x40xbf16>
    %c0_8 = arith.constant 0 : index
    %c0_9 = arith.constant 0 : index
    %8 = vector.load %arg3[%c0_8, %c0_9] : memref<1x40xf32, #tpu.memory_space<vmem>>, vector<1x40xf32>
    %c0_i32 = arith.constant 0 : i32
    %c8_i32 = arith.constant 8 : i32
    %9 = arith.addi %c0_i32, %c8_i32 : i32
    %c1_i32 = arith.constant 1 : i32
    scf.for %arg5 = %c0_i32 to %9 step %c1_i32  : i32 {
      %c1_i32_11 = arith.constant 1 : i32
      %10 = arith.muli %arg5, %c1_i32_11 : i32
      %c0_i32_12 = arith.constant 0 : i32
      %11 = arith.addi %c0_i32_12, %10 : i32
      %cst = arith.constant 0.000000e+00 : f32
      %12 = vector.broadcast %cst : f32 to vector<8x40xf32>
      %c0_i32_13 = arith.constant 0 : i32
      %13 = arith.addi %11, %c0_i32_13 : i32
      %c0_14 = arith.constant 0 : index
      %14 = arith.index_cast %13 : i32 to index
      %c0_15 = arith.constant 0 : index
      %c0_16 = arith.constant 0 : index
      %15 = vector.load %arg1[%c0_14, %14, %c0_15, %c0_16] : memref<1x9x9x96xbf16, #tpu.memory_space<vmem>>, vector<1x1x9x96xbf16>
      %16 = vector.shape_cast %15 : vector<1x1x9x96xbf16> to vector<9x96xbf16>
      %17 = vector.extract_strided_slice %16 {offsets = [0, 0], sizes = [8, 96], strides = [1, 1]} : vector<9x96xbf16> to vector<8x96xbf16>
      %cst_17 = arith.constant dense<0.000000e+00> : vector<8x40xf32>
      %18 = tpu.matmul %17, %1, %cst_17 {dimension_numbers = #tpu.dot_dimension_numbers<[1], [0], [0], [1], [0, 0, 1, 1], [], []>} : vector<8x96xbf16>, vector<96x40xbf16>, vector<8x40xf32> -> vector<8x40xf32>
      %19 = arith.addf %12, %18 : vector<8x40xf32>
      %20 = vector.extract_strided_slice %16 {offsets = [1, 0], sizes = [8, 96], strides = [1, 1]} : vector<9x96xbf16> to vector<8x96xbf16>
      %cst_18 = arith.constant dense<0.000000e+00> : vector<8x40xf32>
      %21 = tpu.matmul %20, %3, %cst_18 {dimension_numbers = #tpu.dot_dimension_numbers<[1], [0], [0], [1], [0, 0, 1, 1], [], []>} : vector<8x96xbf16>, vector<96x40xbf16>, vector<8x40xf32> -> vector<8x40xf32>
      %22 = arith.addf %19, %21 : vector<8x40xf32>
      %c1_i32_19 = arith.constant 1 : i32
      %23 = arith.addi %11, %c1_i32_19 : i32
      %c0_20 = arith.constant 0 : index
      %24 = arith.index_cast %23 : i32 to index
      %c0_21 = arith.constant 0 : index
      %c0_22 = arith.constant 0 : index
      %25 = vector.load %arg1[%c0_20, %24, %c0_21, %c0_22] : memref<1x9x9x96xbf16, #tpu.memory_space<vmem>>, vector<1x1x9x96xbf16>
      %26 = vector.shape_cast %25 : vector<1x1x9x96xbf16> to vector<9x96xbf16>
      %27 = vector.extract_strided_slice %26 {offsets = [0, 0], sizes = [8, 96], strides = [1, 1]} : vector<9x96xbf16> to vector<8x96xbf16>
      %cst_23 = arith.constant dense<0.000000e+00> : vector<8x40xf32>
      %28 = tpu.matmul %27, %5, %cst_23 {dimension_numbers = #tpu.dot_dimension_numbers<[1], [0], [0], [1], [0, 0, 1, 1], [], []>} : vector<8x96xbf16>, vector<96x40xbf16>, vector<8x40xf32> -> vector<8x40xf32>
      %29 = arith.addf %22, %28 : vector<8x40xf32>
      %30 = vector.extract_strided_slice %26 {offsets = [1, 0], sizes = [8, 96], strides = [1, 1]} : vector<9x96xbf16> to vector<8x96xbf16>
      %cst_24 = arith.constant dense<0.000000e+00> : vector<8x40xf32>
      %31 = tpu.matmul %30, %7, %cst_24 {dimension_numbers = #tpu.dot_dimension_numbers<[1], [0], [0], [1], [0, 0, 1, 1], [], []>} : vector<8x96xbf16>, vector<96x40xbf16>, vector<8x40xf32> -> vector<8x40xf32>
      %32 = arith.addf %29, %31 : vector<8x40xf32>
      %33 = vector.broadcast %8 : vector<1x40xf32> to vector<8x40xf32>
      %34 = arith.addf %32, %33 : vector<8x40xf32>
      %cst_25 = arith.constant 3.000000e+00 : f32
      %35 = vector.broadcast %cst_25 : f32 to vector<8x40xf32>
      %36 = arith.addf %34, %35 : vector<8x40xf32>
      %cst_26 = arith.constant 0.000000e+00 : f32
      %cst_27 = arith.constant 6.000000e+00 : f32
      %37 = vector.broadcast %cst_26 : f32 to vector<8x40xf32>
      %38 = arith.maximumf %37, %36 : vector<8x40xf32>
      %39 = vector.broadcast %cst_27 : f32 to vector<8x40xf32>
      %40 = arith.minimumf %39, %38 : vector<8x40xf32>
      %41 = arith.mulf %34, %40 : vector<8x40xf32>
      %cst_28 = arith.constant 0.166666672 : f32
      %42 = vector.broadcast %cst_28 : f32 to vector<8x40xf32>
      %43 = arith.mulf %41, %42 : vector<8x40xf32>
      %44 = arith.truncf %43 : vector<8x40xf32> to vector<8x40xbf16>
      %c0_29 = arith.constant 0 : index
      %45 = arith.index_cast %11 : i32 to index
      %c0_30 = arith.constant 0 : index
      %c0_31 = arith.constant 0 : index
      %46 = vector.load %arg4[%c0_29, %45, %c0_30, %c0_31] : memref<1x8x8x40xbf16, #tpu.memory_space<vmem>>, vector<1x1x8x40xbf16>
      %47 = vector.shape_cast %46 : vector<1x1x8x40xbf16> to vector<8x40xbf16>
      %48 = vector.shape_cast %44 : vector<8x40xbf16> to vector<1x1x8x40xbf16>
      tpu.vector_store %arg4[%c0_29, %45, %c0_30, %c0_31], %48 {strides = array<i32>} : memref<1x8x8x40xbf16, #tpu.memory_space<vmem>>, vector<1x1x8x40xbf16>,
    }
    %c8_i32_10 = arith.constant 8 : i32
    return
  }
  func.func @transform_0(%arg0: i32) -> (i32, i32, i32, i32) {
    %c0_i32 = arith.constant 0 : i32
    %c0_i32_0 = arith.constant 0 : i32
    %c0_i32_1 = arith.constant 0 : i32
    %c0_i32_2 = arith.constant 0 : i32
    return %arg0, %c0_i32, %c0_i32_0, %c0_i32_1 : i32, i32, i32, i32
  }
  func.func @transform_1(%arg0: i32) -> (i32, i32, i32) {
    %c0_i32 = arith.constant 0 : i32
    %c0_i32_0 = arith.constant 0 : i32
    %c0_i32_1 = arith.constant 0 : i32
    %c0_i32_2 = arith.constant 0 : i32
    return %c0_i32, %c0_i32_0, %c0_i32_1 : i32, i32, i32
  }
  func.func @transform_2(%arg0: i32) -> (i32, i32) {
    %c0_i32 = arith.constant 0 : i32
    %c0_i32_0 = arith.constant 0 : i32
    %c0_i32_1 = arith.constant 0 : i32
    return %c0_i32, %c0_i32_0 : i32, i32
  }
  func.func @transform_3(%arg0: i32) -> (i32, i32, i32, i32) {
    %c0_i32 = arith.constant 0 : i32
    %c0_i32_0 = arith.constant 0 : i32
    %c0_i32_1 = arith.constant 0 : i32
    %c0_i32_2 = arith.constant 0 : i32
    return %arg0, %c0_i32, %c0_i32_0, %c0_i32_1 : i32, i32, i32, i32
  }
}

module attributes {stable_mosaic.version = 11 : i64} {
  func.func @_conv3x3s2_kernel(%arg0: i32, %arg1: memref<1x5x5x160xbf16, #tpu.memory_space<vmem>>, %arg2: memref<4x160x160xbf16, #tpu.memory_space<vmem>>, %arg3: memref<1x160xf32, #tpu.memory_space<vmem>>, %arg4: memref<1x4x4x160xbf16, #tpu.memory_space<vmem>>) attributes {dimension_semantics = [#tpu.dimension_semantics<parallel>], iteration_bounds = array<i64: 2>, scalar_prefetch = 0 : i64, scratch_operands = 0 : i64, tpu.core_type = #tpu.core_type<tc>, window_params = [{transform_indices = @transform_0, window_bounds = array<i64: 1, 5, 5, 160>}, {pipeline_mode = #tpu.pipeline_mode<synchronous>, transform_indices = @transform_1, window_bounds = array<i64: 4, 160, 160>}, {pipeline_mode = #tpu.pipeline_mode<synchronous>, transform_indices = @transform_2, window_bounds = array<i64: 1, 160>}, {transform_indices = @transform_3, window_bounds = array<i64: 1, 4, 4, 160>}]} {
    %c0 = arith.constant 0 : index
    %c0_0 = arith.constant 0 : index
    %c0_1 = arith.constant 0 : index
    %0 = vector.load %arg2[%c0, %c0_0, %c0_1] : memref<4x160x160xbf16, #tpu.memory_space<vmem>>, vector<1x160x160xbf16>
    %1 = vector.shape_cast %0 : vector<1x160x160xbf16> to vector<160x160xbf16>
    %c1 = arith.constant 1 : index
    %c0_2 = arith.constant 0 : index
    %c0_3 = arith.constant 0 : index
    %2 = vector.load %arg2[%c1, %c0_2, %c0_3] : memref<4x160x160xbf16, #tpu.memory_space<vmem>>, vector<1x160x160xbf16>
    %3 = vector.shape_cast %2 : vector<1x160x160xbf16> to vector<160x160xbf16>
    %c2 = arith.constant 2 : index
    %c0_4 = arith.constant 0 : index
    %c0_5 = arith.constant 0 : index
    %4 = vector.load %arg2[%c2, %c0_4, %c0_5] : memref<4x160x160xbf16, #tpu.memory_space<vmem>>, vector<1x160x160xbf16>
    %5 = vector.shape_cast %4 : vector<1x160x160xbf16> to vector<160x160xbf16>
    %c3 = arith.constant 3 : index
    %c0_6 = arith.constant 0 : index
    %c0_7 = arith.constant 0 : index
    %6 = vector.load %arg2[%c3, %c0_6, %c0_7] : memref<4x160x160xbf16, #tpu.memory_space<vmem>>, vector<1x160x160xbf16>
    %7 = vector.shape_cast %6 : vector<1x160x160xbf16> to vector<160x160xbf16>
    %c0_8 = arith.constant 0 : index
    %c0_9 = arith.constant 0 : index
    %8 = vector.load %arg3[%c0_8, %c0_9] : memref<1x160xf32, #tpu.memory_space<vmem>>, vector<1x160xf32>
    %c0_i32 = arith.constant 0 : i32
    %c4_i32 = arith.constant 4 : i32
    %9 = arith.addi %c0_i32, %c4_i32 : i32
    %c1_i32 = arith.constant 1 : i32
    scf.for %arg5 = %c0_i32 to %9 step %c1_i32  : i32 {
      %c1_i32_11 = arith.constant 1 : i32
      %10 = arith.muli %arg5, %c1_i32_11 : i32
      %c0_i32_12 = arith.constant 0 : i32
      %11 = arith.addi %c0_i32_12, %10 : i32
      %cst = arith.constant 0.000000e+00 : f32
      %12 = vector.broadcast %cst : f32 to vector<4x160xf32>
      %c0_i32_13 = arith.constant 0 : i32
      %13 = arith.addi %11, %c0_i32_13 : i32
      %c0_14 = arith.constant 0 : index
      %14 = arith.index_cast %13 : i32 to index
      %c0_15 = arith.constant 0 : index
      %c0_16 = arith.constant 0 : index
      %15 = vector.load %arg1[%c0_14, %14, %c0_15, %c0_16] : memref<1x5x5x160xbf16, #tpu.memory_space<vmem>>, vector<1x1x5x160xbf16>
      %16 = vector.shape_cast %15 : vector<1x1x5x160xbf16> to vector<5x160xbf16>
      %17 = vector.extract_strided_slice %16 {offsets = [0, 0], sizes = [4, 160], strides = [1, 1]} : vector<5x160xbf16> to vector<4x160xbf16>
      %cst_17 = arith.constant dense<0.000000e+00> : vector<4x160xf32>
      %18 = tpu.matmul %17, %1, %cst_17 {dimension_numbers = #tpu.dot_dimension_numbers<[1], [0], [0], [1], [0, 0, 1, 1], [], []>} : vector<4x160xbf16>, vector<160x160xbf16>, vector<4x160xf32> -> vector<4x160xf32>
      %19 = arith.addf %12, %18 : vector<4x160xf32>
      %20 = vector.extract_strided_slice %16 {offsets = [1, 0], sizes = [4, 160], strides = [1, 1]} : vector<5x160xbf16> to vector<4x160xbf16>
      %cst_18 = arith.constant dense<0.000000e+00> : vector<4x160xf32>
      %21 = tpu.matmul %20, %3, %cst_18 {dimension_numbers = #tpu.dot_dimension_numbers<[1], [0], [0], [1], [0, 0, 1, 1], [], []>} : vector<4x160xbf16>, vector<160x160xbf16>, vector<4x160xf32> -> vector<4x160xf32>
      %22 = arith.addf %19, %21 : vector<4x160xf32>
      %c1_i32_19 = arith.constant 1 : i32
      %23 = arith.addi %11, %c1_i32_19 : i32
      %c0_20 = arith.constant 0 : index
      %24 = arith.index_cast %23 : i32 to index
      %c0_21 = arith.constant 0 : index
      %c0_22 = arith.constant 0 : index
      %25 = vector.load %arg1[%c0_20, %24, %c0_21, %c0_22] : memref<1x5x5x160xbf16, #tpu.memory_space<vmem>>, vector<1x1x5x160xbf16>
      %26 = vector.shape_cast %25 : vector<1x1x5x160xbf16> to vector<5x160xbf16>
      %27 = vector.extract_strided_slice %26 {offsets = [0, 0], sizes = [4, 160], strides = [1, 1]} : vector<5x160xbf16> to vector<4x160xbf16>
      %cst_23 = arith.constant dense<0.000000e+00> : vector<4x160xf32>
      %28 = tpu.matmul %27, %5, %cst_23 {dimension_numbers = #tpu.dot_dimension_numbers<[1], [0], [0], [1], [0, 0, 1, 1], [], []>} : vector<4x160xbf16>, vector<160x160xbf16>, vector<4x160xf32> -> vector<4x160xf32>
      %29 = arith.addf %22, %28 : vector<4x160xf32>
      %30 = vector.extract_strided_slice %26 {offsets = [1, 0], sizes = [4, 160], strides = [1, 1]} : vector<5x160xbf16> to vector<4x160xbf16>
      %cst_24 = arith.constant dense<0.000000e+00> : vector<4x160xf32>
      %31 = tpu.matmul %30, %7, %cst_24 {dimension_numbers = #tpu.dot_dimension_numbers<[1], [0], [0], [1], [0, 0, 1, 1], [], []>} : vector<4x160xbf16>, vector<160x160xbf16>, vector<4x160xf32> -> vector<4x160xf32>
      %32 = arith.addf %29, %31 : vector<4x160xf32>
      %33 = vector.broadcast %8 : vector<1x160xf32> to vector<4x160xf32>
      %34 = arith.addf %32, %33 : vector<4x160xf32>
      %cst_25 = arith.constant 3.000000e+00 : f32
      %35 = vector.broadcast %cst_25 : f32 to vector<4x160xf32>
      %36 = arith.addf %34, %35 : vector<4x160xf32>
      %cst_26 = arith.constant 0.000000e+00 : f32
      %cst_27 = arith.constant 6.000000e+00 : f32
      %37 = vector.broadcast %cst_26 : f32 to vector<4x160xf32>
      %38 = arith.maximumf %37, %36 : vector<4x160xf32>
      %39 = vector.broadcast %cst_27 : f32 to vector<4x160xf32>
      %40 = arith.minimumf %39, %38 : vector<4x160xf32>
      %41 = arith.mulf %34, %40 : vector<4x160xf32>
      %cst_28 = arith.constant 0.166666672 : f32
      %42 = vector.broadcast %cst_28 : f32 to vector<4x160xf32>
      %43 = arith.mulf %41, %42 : vector<4x160xf32>
      %44 = arith.truncf %43 : vector<4x160xf32> to vector<4x160xbf16>
      %c0_29 = arith.constant 0 : index
      %45 = arith.index_cast %11 : i32 to index
      %c0_30 = arith.constant 0 : index
      %c0_31 = arith.constant 0 : index
      %46 = vector.load %arg4[%c0_29, %45, %c0_30, %c0_31] : memref<1x4x4x160xbf16, #tpu.memory_space<vmem>>, vector<1x1x4x160xbf16>
      %47 = vector.shape_cast %46 : vector<1x1x4x160xbf16> to vector<4x160xbf16>
      %48 = vector.shape_cast %44 : vector<4x160xbf16> to vector<1x1x4x160xbf16>
      tpu.vector_store %arg4[%c0_29, %45, %c0_30, %c0_31], %48 {strides = array<i32>} : memref<1x4x4x160xbf16, #tpu.memory_space<vmem>>, vector<1x1x4x160xbf16>,
    }
    %c4_i32_10 = arith.constant 4 : i32
    return
  }
  func.func @transform_0(%arg0: i32) -> (i32, i32, i32, i32) {
    %c0_i32 = arith.constant 0 : i32
    %c0_i32_0 = arith.constant 0 : i32
    %c0_i32_1 = arith.constant 0 : i32
    %c0_i32_2 = arith.constant 0 : i32
    return %arg0, %c0_i32, %c0_i32_0, %c0_i32_1 : i32, i32, i32, i32
  }
  func.func @transform_1(%arg0: i32) -> (i32, i32, i32) {
    %c0_i32 = arith.constant 0 : i32
    %c0_i32_0 = arith.constant 0 : i32
    %c0_i32_1 = arith.constant 0 : i32
    %c0_i32_2 = arith.constant 0 : i32
    return %c0_i32, %c0_i32_0, %c0_i32_1 : i32, i32, i32
  }
  func.func @transform_2(%arg0: i32) -> (i32, i32) {
    %c0_i32 = arith.constant 0 : i32
    %c0_i32_0 = arith.constant 0 : i32
    %c0_i32_1 = arith.constant 0 : i32
    return %c0_i32, %c0_i32_0 : i32, i32
  }
  func.func @transform_3(%arg0: i32) -> (i32, i32, i32, i32) {
    %c0_i32 = arith.constant 0 : i32
    %c0_i32_0 = arith.constant 0 : i32
    %c0_i32_1 = arith.constant 0 : i32
    %c0_i32_2 = arith.constant 0 : i32
    return %arg0, %c0_i32, %c0_i32_0, %c0_i32_1 : i32, i32, i32, i32
  }
}

module attributes {stable_mosaic.version = 11 : i64} {
  func.func @_separable_kernel(%arg0: i32, %arg1: memref<1x4x4x160xbf16, #tpu.memory_space<vmem>>, %arg2: memref<1x4xf32, #tpu.memory_space<vmem>>, %arg3: memref<1x1x1x160xbf16, #tpu.memory_space<vmem>>) attributes {dimension_semantics = [#tpu.dimension_semantics<parallel>], iteration_bounds = array<i64: 2>, scalar_prefetch = 0 : i64, scratch_operands = 0 : i64, tpu.core_type = #tpu.core_type<tc>, window_params = [{transform_indices = @transform_0, window_bounds = array<i64: 1, 4, 4, 160>}, {pipeline_mode = #tpu.pipeline_mode<synchronous>, transform_indices = @transform_1, window_bounds = array<i64: 1, 4>}, {transform_indices = @transform_2, window_bounds = array<i64: 1, 1, 1, 160>}]} {
    %c0 = arith.constant 0 : index
    %c0_0 = arith.constant 0 : index
    %0 = vector.load %arg2[%c0, %c0_0] : memref<1x4xf32, #tpu.memory_space<vmem>>, vector<1x4xf32>
    %c0_1 = arith.constant 0 : index
    %c0_2 = arith.constant 0 : index
    %c0_3 = arith.constant 0 : index
    %c0_4 = arith.constant 0 : index
    %1 = vector.load %arg1[%c0_1, %c0_2, %c0_3, %c0_4] : memref<1x4x4x160xbf16, #tpu.memory_space<vmem>>, vector<1x1x4x160xbf16>
    %2 = vector.shape_cast %1 : vector<1x1x4x160xbf16> to vector<4x160xbf16>
    %3 = arith.extf %2 : vector<4x160xbf16> to vector<4x160xf32>
    %cst = arith.constant dense<0.000000e+00> : vector<1x160xf32>
    %4 = tpu.matmul %0, %3, %cst {dimension_numbers = #tpu.dot_dimension_numbers<[1], [0], [0], [1], [0, 0, 1, 1], [], []>} : vector<1x4xf32>, vector<4x160xf32>, vector<1x160xf32> -> vector<1x160xf32>
    %cst_5 = arith.constant 0.333333343 : f32
    %5 = vector.broadcast %cst_5 : f32 to vector<1x160xf32>
    %6 = arith.mulf %4, %5 : vector<1x160xf32>
    %c0_6 = arith.constant 0 : index
    %c1 = arith.constant 1 : index
    %c0_7 = arith.constant 0 : index
    %c0_8 = arith.constant 0 : index
    %7 = vector.load %arg1[%c0_6, %c1, %c0_7, %c0_8] : memref<1x4x4x160xbf16, #tpu.memory_space<vmem>>, vector<1x1x4x160xbf16>
    %8 = vector.shape_cast %7 : vector<1x1x4x160xbf16> to vector<4x160xbf16>
    %9 = arith.extf %8 : vector<4x160xbf16> to vector<4x160xf32>
    %cst_9 = arith.constant dense<0.000000e+00> : vector<1x160xf32>
    %10 = tpu.matmul %0, %9, %cst_9 {dimension_numbers = #tpu.dot_dimension_numbers<[1], [0], [0], [1], [0, 0, 1, 1], [], []>} : vector<1x4xf32>, vector<4x160xf32>, vector<1x160xf32> -> vector<1x160xf32>
    %cst_10 = arith.constant 0.333333343 : f32
    %11 = vector.broadcast %cst_10 : f32 to vector<1x160xf32>
    %12 = arith.mulf %10, %11 : vector<1x160xf32>
    %13 = arith.addf %6, %12 : vector<1x160xf32>
    %c0_11 = arith.constant 0 : index
    %c2 = arith.constant 2 : index
    %c0_12 = arith.constant 0 : index
    %c0_13 = arith.constant 0 : index
    %14 = vector.load %arg1[%c0_11, %c2, %c0_12, %c0_13] : memref<1x4x4x160xbf16, #tpu.memory_space<vmem>>, vector<1x1x4x160xbf16>
    %15 = vector.shape_cast %14 : vector<1x1x4x160xbf16> to vector<4x160xbf16>
    %16 = arith.extf %15 : vector<4x160xbf16> to vector<4x160xf32>
    %cst_14 = arith.constant dense<0.000000e+00> : vector<1x160xf32>
    %17 = tpu.matmul %0, %16, %cst_14 {dimension_numbers = #tpu.dot_dimension_numbers<[1], [0], [0], [1], [0, 0, 1, 1], [], []>} : vector<1x4xf32>, vector<4x160xf32>, vector<1x160xf32> -> vector<1x160xf32>
    %cst_15 = arith.constant 0.333333343 : f32
    %18 = vector.broadcast %cst_15 : f32 to vector<1x160xf32>
    %19 = arith.mulf %17, %18 : vector<1x160xf32>
    %20 = arith.addf %13, %19 : vector<1x160xf32>
    %21 = arith.truncf %20 : vector<1x160xf32> to vector<1x160xbf16>
    %c0_16 = arith.constant 0 : index
    %c0_17 = arith.constant 0 : index
    %c0_18 = arith.constant 0 : index
    %c0_19 = arith.constant 0 : index
    %22 = vector.load %arg3[%c0_16, %c0_17, %c0_18, %c0_19] : memref<1x1x1x160xbf16, #tpu.memory_space<vmem>>, vector<1x1x1x160xbf16>
    %23 = vector.shape_cast %22 : vector<1x1x1x160xbf16> to vector<1x160xbf16>
    %24 = vector.shape_cast %21 : vector<1x160xbf16> to vector<1x1x1x160xbf16>
    tpu.vector_store %arg3[%c0_16, %c0_17, %c0_18, %c0_19], %24 {strides = array<i32>} : memref<1x1x1x160xbf16, #tpu.memory_space<vmem>>, vector<1x1x1x160xbf16>,
    return
  }
  func.func @transform_0(%arg0: i32) -> (i32, i32, i32, i32) {
    %c0_i32 = arith.constant 0 : i32
    %c0_i32_0 = arith.constant 0 : i32
    %c0_i32_1 = arith.constant 0 : i32
    %c0_i32_2 = arith.constant 0 : i32
    return %arg0, %c0_i32, %c0_i32_0, %c0_i32_1 : i32, i32, i32, i32
  }
  func.func @transform_1(%arg0: i32) -> (i32, i32) {
    %c0_i32 = arith.constant 0 : i32
    %c0_i32_0 = arith.constant 0 : i32
    %c0_i32_1 = arith.constant 0 : i32
    return %c0_i32, %c0_i32_0 : i32, i32
  }
  func.func @transform_2(%arg0: i32) -> (i32, i32, i32, i32) {
    %c0_i32 = arith.constant 0 : i32
    %c0_i32_0 = arith.constant 0 : i32
    %c0_i32_1 = arith.constant 0 : i32
    %c0_i32_2 = arith.constant 0 : i32
    return %arg0, %c0_i32, %c0_i32_0, %c0_i32_1 : i32, i32, i32, i32
  }
}

module attributes {stable_mosaic.version = 11 : i64} {
  func.func @_mm_bias_gate_kernel(%arg0: i32, %arg1: memref<32x160xbf16, #tpu.memory_space<vmem>>, %arg2: memref<160x128xbf16, #tpu.memory_space<vmem>>, %arg3: memref<1x128xf32, #tpu.memory_space<vmem>>, %arg4: memref<32x128xbf16, #tpu.memory_space<vmem>>, %arg5: memref<32x128xbf16, #tpu.memory_space<vmem>>) attributes {dimension_semantics = [#tpu.dimension_semantics<parallel>], iteration_bounds = array<i64: 1>, scalar_prefetch = 0 : i64, scratch_operands = 0 : i64, tpu.core_type = #tpu.core_type<tc>, window_params = [{transform_indices = @transform_0, window_bounds = array<i64: 32, 160>}, {pipeline_mode = #tpu.pipeline_mode<synchronous>, transform_indices = @transform_1, window_bounds = array<i64: 160, 128>}, {pipeline_mode = #tpu.pipeline_mode<synchronous>, transform_indices = @transform_2, window_bounds = array<i64: 1, 128>}, {transform_indices = @transform_3, window_bounds = array<i64: 32, 128>}, {transform_indices = @transform_4, window_bounds = array<i64: 32, 128>}]} {
    %c0 = arith.constant 0 : index
    %c0_0 = arith.constant 0 : index
    %0 = vector.load %arg1[%c0, %c0_0] : memref<32x160xbf16, #tpu.memory_space<vmem>>, vector<32x160xbf16>
    %c0_1 = arith.constant 0 : index
    %c0_2 = arith.constant 0 : index
    %1 = vector.load %arg2[%c0_1, %c0_2] : memref<160x128xbf16, #tpu.memory_space<vmem>>, vector<160x128xbf16>
    %cst = arith.constant dense<0.000000e+00> : vector<32x128xf32>
    %2 = tpu.matmul %0, %1, %cst {dimension_numbers = #tpu.dot_dimension_numbers<[1], [0], [0], [1], [0, 0, 1, 1], [], []>} : vector<32x160xbf16>, vector<160x128xbf16>, vector<32x128xf32> -> vector<32x128xf32>
    %c0_3 = arith.constant 0 : index
    %c0_4 = arith.constant 0 : index
    %3 = vector.load %arg3[%c0_3, %c0_4] : memref<1x128xf32, #tpu.memory_space<vmem>>, vector<1x128xf32>
    %c0_5 = arith.constant 0 : index
    %c0_6 = arith.constant 0 : index
    %4 = vector.load %arg4[%c0_5, %c0_6] : memref<32x128xbf16, #tpu.memory_space<vmem>>, vector<32x128xbf16>
    %5 = vector.broadcast %3 : vector<1x128xf32> to vector<32x128xf32>
    %6 = arith.addf %2, %5 : vector<32x128xf32>
    %cst_7 = arith.constant 0.000000e+00 : f32
    %7 = vector.broadcast %cst_7 : f32 to vector<32x128xf32>
    %8 = arith.maximumf %6, %7 : vector<32x128xf32>
    %9 = arith.extf %4 : vector<32x128xbf16> to vector<32x128xf32>
    %10 = arith.mulf %8, %9 : vector<32x128xf32>
    %11 = arith.truncf %10 : vector<32x128xf32> to vector<32x128xbf16>
    %c0_8 = arith.constant 0 : index
    %c0_9 = arith.constant 0 : index
    %12 = vector.load %arg5[%c0_8, %c0_9] : memref<32x128xbf16, #tpu.memory_space<vmem>>, vector<32x128xbf16>
    tpu.vector_store %arg5[%c0_8, %c0_9], %11 {strides = array<i32>} : memref<32x128xbf16, #tpu.memory_space<vmem>>, vector<32x128xbf16>,
    return
  }
  func.func @transform_0(%arg0: i32) -> (i32, i32) {
    %c0_i32 = arith.constant 0 : i32
    %c0_i32_0 = arith.constant 0 : i32
    return %arg0, %c0_i32 : i32, i32
  }
  func.func @transform_1(%arg0: i32) -> (i32, i32) {
    %c0_i32 = arith.constant 0 : i32
    %c0_i32_0 = arith.constant 0 : i32
    %c0_i32_1 = arith.constant 0 : i32
    return %c0_i32, %c0_i32_0 : i32, i32
  }
  func.func @transform_2(%arg0: i32) -> (i32, i32) {
    %c0_i32 = arith.constant 0 : i32
    %c0_i32_0 = arith.constant 0 : i32
    %c0_i32_1 = arith.constant 0 : i32
    return %c0_i32, %c0_i32_0 : i32, i32
  }
  func.func @transform_3(%arg0: i32) -> (i32, i32) {
    %c0_i32 = arith.constant 0 : i32
    %c0_i32_0 = arith.constant 0 : i32
    return %arg0, %c0_i32 : i32, i32
  }
  func.func @transform_4(%arg0: i32) -> (i32, i32) {
    %c0_i32 = arith.constant 0 : i32
    %c0_i32_0 = arith.constant 0 : i32
    return %arg0, %c0_i32 : i32, i32
  }
}

module attributes {stable_mosaic.version = 11 : i64} {
  func.func @_mm_bias_kernel(%arg0: i32, %arg1: memref<8x160xbf16, #tpu.memory_space<vmem>>, %arg2: memref<160x128xbf16, #tpu.memory_space<vmem>>, %arg3: memref<1x128xf32, #tpu.memory_space<vmem>>, %arg4: memref<8x128xbf16, #tpu.memory_space<vmem>>) attributes {dimension_semantics = [#tpu.dimension_semantics<parallel>], iteration_bounds = array<i64: 1>, scalar_prefetch = 0 : i64, scratch_operands = 0 : i64, tpu.core_type = #tpu.core_type<tc>, window_params = [{transform_indices = @transform_0, window_bounds = array<i64: 8, 160>}, {pipeline_mode = #tpu.pipeline_mode<synchronous>, transform_indices = @transform_1, window_bounds = array<i64: 160, 128>}, {pipeline_mode = #tpu.pipeline_mode<synchronous>, transform_indices = @transform_2, window_bounds = array<i64: 1, 128>}, {transform_indices = @transform_3, window_bounds = array<i64: 8, 128>}]} {
    %c0 = arith.constant 0 : index
    %c0_0 = arith.constant 0 : index
    %0 = vector.load %arg1[%c0, %c0_0] : memref<8x160xbf16, #tpu.memory_space<vmem>>, vector<8x160xbf16>
    %c0_1 = arith.constant 0 : index
    %c0_2 = arith.constant 0 : index
    %1 = vector.load %arg2[%c0_1, %c0_2] : memref<160x128xbf16, #tpu.memory_space<vmem>>, vector<160x128xbf16>
    %cst = arith.constant dense<0.000000e+00> : vector<8x128xf32>
    %2 = tpu.matmul %0, %1, %cst {dimension_numbers = #tpu.dot_dimension_numbers<[1], [0], [0], [1], [0, 0, 1, 1], [], []>} : vector<8x160xbf16>, vector<160x128xbf16>, vector<8x128xf32> -> vector<8x128xf32>
    %c0_3 = arith.constant 0 : index
    %c0_4 = arith.constant 0 : index
    %3 = vector.load %arg3[%c0_3, %c0_4] : memref<1x128xf32, #tpu.memory_space<vmem>>, vector<1x128xf32>
    %4 = vector.broadcast %3 : vector<1x128xf32> to vector<8x128xf32>
    %5 = arith.addf %2, %4 : vector<8x128xf32>
    %6 = arith.negf %5 : vector<8x128xf32>
    %7 = math.exp %6 : vector<8x128xf32>
    %cst_5 = arith.constant 1.000000e+00 : f32
    %8 = vector.broadcast %cst_5 : f32 to vector<8x128xf32>
    %9 = arith.addf %8, %7 : vector<8x128xf32>
    %10 = arith.divf %8, %9 : vector<8x128xf32>
    %11 = arith.truncf %10 : vector<8x128xf32> to vector<8x128xbf16>
    %c0_6 = arith.constant 0 : index
    %c0_7 = arith.constant 0 : index
    %12 = vector.load %arg4[%c0_6, %c0_7] : memref<8x128xbf16, #tpu.memory_space<vmem>>, vector<8x128xbf16>
    tpu.vector_store %arg4[%c0_6, %c0_7], %11 {strides = array<i32>} : memref<8x128xbf16, #tpu.memory_space<vmem>>, vector<8x128xbf16>,
    return
  }
  func.func @transform_0(%arg0: i32) -> (i32, i32) {
    %c0_i32 = arith.constant 0 : i32
    %c0_i32_0 = arith.constant 0 : i32
    return %arg0, %c0_i32 : i32, i32
  }
  func.func @transform_1(%arg0: i32) -> (i32, i32) {
    %c0_i32 = arith.constant 0 : i32
    %c0_i32_0 = arith.constant 0 : i32
    %c0_i32_1 = arith.constant 0 : i32
    return %c0_i32, %c0_i32_0 : i32, i32
  }
  func.func @transform_2(%arg0: i32) -> (i32, i32) {
    %c0_i32 = arith.constant 0 : i32
    %c0_i32_0 = arith.constant 0 : i32
    %c0_i32_1 = arith.constant 0 : i32
    return %c0_i32, %c0_i32_0 : i32, i32
  }
  func.func @transform_3(%arg0: i32) -> (i32, i32) {
    %c0_i32 = arith.constant 0 : i32
    %c0_i32_0 = arith.constant 0 : i32
    return %arg0, %c0_i32 : i32, i32
  }
}

module attributes {stable_mosaic.version = 11 : i64} {
  func.func @_separable_kernel(%arg0: i32, %arg1: memref<1x4x4x128xbf16, #tpu.memory_space<vmem>>, %arg2: memref<8x4xf32, #tpu.memory_space<vmem>>, %arg3: memref<1x8x8x128xbf16, #tpu.memory_space<vmem>>) attributes {dimension_semantics = [#tpu.dimension_semantics<parallel>], iteration_bounds = array<i64: 2>, scalar_prefetch = 0 : i64, scratch_operands = 0 : i64, tpu.core_type = #tpu.core_type<tc>, window_params = [{transform_indices = @transform_0, window_bounds = array<i64: 1, 4, 4, 128>}, {pipeline_mode = #tpu.pipeline_mode<synchronous>, transform_indices = @transform_1, window_bounds = array<i64: 8, 4>}, {transform_indices = @transform_2, window_bounds = array<i64: 1, 8, 8, 128>}]} {
    %c0 = arith.constant 0 : index
    %c0_0 = arith.constant 0 : index
    %0 = vector.load %arg2[%c0, %c0_0] : memref<8x4xf32, #tpu.memory_space<vmem>>, vector<8x4xf32>
    %c0_1 = arith.constant 0 : index
    %c0_2 = arith.constant 0 : index
    %c0_3 = arith.constant 0 : index
    %c0_4 = arith.constant 0 : index
    %1 = vector.load %arg1[%c0_1, %c0_2, %c0_3, %c0_4] : memref<1x4x4x128xbf16, #tpu.memory_space<vmem>>, vector<1x1x4x128xbf16>
    %2 = vector.shape_cast %1 : vector<1x1x4x128xbf16> to vector<4x128xbf16>
    %3 = arith.extf %2 : vector<4x128xbf16> to vector<4x128xf32>
    %cst = arith.constant dense<0.000000e+00> : vector<8x128xf32>
    %4 = tpu.matmul %0, %3, %cst {dimension_numbers = #tpu.dot_dimension_numbers<[1], [0], [0], [1], [0, 0, 1, 1], [], []>} : vector<8x4xf32>, vector<4x128xf32>, vector<8x128xf32> -> vector<8x128xf32>
    %cst_5 = arith.constant 1.000000e+00 : f32
    %5 = vector.broadcast %cst_5 : f32 to vector<8x128xf32>
    %6 = arith.mulf %4, %5 : vector<8x128xf32>
    %7 = arith.truncf %6 : vector<8x128xf32> to vector<8x128xbf16>
    %c0_6 = arith.constant 0 : index
    %c0_7 = arith.constant 0 : index
    %c0_8 = arith.constant 0 : index
    %c0_9 = arith.constant 0 : index
    %8 = vector.load %arg3[%c0_6, %c0_7, %c0_8, %c0_9] : memref<1x8x8x128xbf16, #tpu.memory_space<vmem>>, vector<1x1x8x128xbf16>
    %9 = vector.shape_cast %8 : vector<1x1x8x128xbf16> to vector<8x128xbf16>
    %10 = vector.shape_cast %7 : vector<8x128xbf16> to vector<1x1x8x128xbf16>
    tpu.vector_store %arg3[%c0_6, %c0_7, %c0_8, %c0_9], %10 {strides = array<i32>} : memref<1x8x8x128xbf16, #tpu.memory_space<vmem>>, vector<1x1x8x128xbf16>,
    %c0_10 = arith.constant 0 : index
    %c0_11 = arith.constant 0 : index
    %c0_12 = arith.constant 0 : index
    %c0_13 = arith.constant 0 : index
    %11 = vector.load %arg1[%c0_10, %c0_11, %c0_12, %c0_13] : memref<1x4x4x128xbf16, #tpu.memory_space<vmem>>, vector<1x1x4x128xbf16>
    %12 = vector.shape_cast %11 : vector<1x1x4x128xbf16> to vector<4x128xbf16>
    %13 = arith.extf %12 : vector<4x128xbf16> to vector<4x128xf32>
    %cst_14 = arith.constant dense<0.000000e+00> : vector<8x128xf32>
    %14 = tpu.matmul %0, %13, %cst_14 {dimension_numbers = #tpu.dot_dimension_numbers<[1], [0], [0], [1], [0, 0, 1, 1], [], []>} : vector<8x4xf32>, vector<4x128xf32>, vector<8x128xf32> -> vector<8x128xf32>
    %cst_15 = arith.constant 0.571428597 : f32
    %15 = vector.broadcast %cst_15 : f32 to vector<8x128xf32>
    %16 = arith.mulf %14, %15 : vector<8x128xf32>
    %c0_16 = arith.constant 0 : index
    %c1 = arith.constant 1 : index
    %c0_17 = arith.constant 0 : index
    %c0_18 = arith.constant 0 : index
    %17 = vector.load %arg1[%c0_16, %c1, %c0_17, %c0_18] : memref<1x4x4x128xbf16, #tpu.memory_space<vmem>>, vector<1x1x4x128xbf16>
    %18 = vector.shape_cast %17 : vector<1x1x4x128xbf16> to vector<4x128xbf16>
    %19 = arith.extf %18 : vector<4x128xbf16> to vector<4x128xf32>
    %cst_19 = arith.constant dense<0.000000e+00> : vector<8x128xf32>
    %20 = tpu.matmul %0, %19, %cst_19 {dimension_numbers = #tpu.dot_dimension_numbers<[1], [0], [0], [1], [0, 0, 1, 1], [], []>} : vector<8x4xf32>, vector<4x128xf32>, vector<8x128xf32> -> vector<8x128xf32>
    %cst_20 = arith.constant 0.428571433 : f32
    %21 = vector.broadcast %cst_20 : f32 to vector<8x128xf32>
    %22 = arith.mulf %20, %21 : vector<8x128xf32>
    %23 = arith.addf %16, %22 : vector<8x128xf32>
    %24 = arith.truncf %23 : vector<8x128xf32> to vector<8x128xbf16>
    %c0_21 = arith.constant 0 : index
    %c1_22 = arith.constant 1 : index
    %c0_23 = arith.constant 0 : index
    %c0_24 = arith.constant 0 : index
    %25 = vector.load %arg3[%c0_21, %c1_22, %c0_23, %c0_24] : memref<1x8x8x128xbf16, #tpu.memory_space<vmem>>, vector<1x1x8x128xbf16>
    %26 = vector.shape_cast %25 : vector<1x1x8x128xbf16> to vector<8x128xbf16>
    %27 = vector.shape_cast %24 : vector<8x128xbf16> to vector<1x1x8x128xbf16>
    tpu.vector_store %arg3[%c0_21, %c1_22, %c0_23, %c0_24], %27 {strides = array<i32>} : memref<1x8x8x128xbf16, #tpu.memory_space<vmem>>, vector<1x1x8x128xbf16>,
    %c0_25 = arith.constant 0 : index
    %c0_26 = arith.constant 0 : index
    %c0_27 = arith.constant 0 : index
    %c0_28 = arith.constant 0 : index
    %28 = vector.load %arg1[%c0_25, %c0_26, %c0_27, %c0_28] : memref<1x4x4x128xbf16, #tpu.memory_space<vmem>>, vector<1x1x4x128xbf16>
    %29 = vector.shape_cast %28 : vector<1x1x4x128xbf16> to vector<4x128xbf16>
    %30 = arith.extf %29 : vector<4x128xbf16> to vector<4x128xf32>
    %cst_29 = arith.constant dense<0.000000e+00> : vector<8x128xf32>
    %31 = tpu.matmul %0, %30, %cst_29 {dimension_numbers = #tpu.dot_dimension_numbers<[1], [0], [0], [1], [0, 0, 1, 1], [], []>} : vector<8x4xf32>, vector<4x128xf32>, vector<8x128xf32> -> vector<8x128xf32>
    %cst_30 = arith.constant 0.142857149 : f32
    %32 = vector.broadcast %cst_30 : f32 to vector<8x128xf32>
    %33 = arith.mulf %31, %32 : vector<8x128xf32>
    %c0_31 = arith.constant 0 : index
    %c1_32 = arith.constant 1 : index
    %c0_33 = arith.constant 0 : index
    %c0_34 = arith.constant 0 : index
    %34 = vector.load %arg1[%c0_31, %c1_32, %c0_33, %c0_34] : memref<1x4x4x128xbf16, #tpu.memory_space<vmem>>, vector<1x1x4x128xbf16>
    %35 = vector.shape_cast %34 : vector<1x1x4x128xbf16> to vector<4x128xbf16>
    %36 = arith.extf %35 : vector<4x128xbf16> to vector<4x128xf32>
    %cst_35 = arith.constant dense<0.000000e+00> : vector<8x128xf32>
    %37 = tpu.matmul %0, %36, %cst_35 {dimension_numbers = #tpu.dot_dimension_numbers<[1], [0], [0], [1], [0, 0, 1, 1], [], []>} : vector<8x4xf32>, vector<4x128xf32>, vector<8x128xf32> -> vector<8x128xf32>
    %cst_36 = arith.constant 0.857142865 : f32
    %38 = vector.broadcast %cst_36 : f32 to vector<8x128xf32>
    %39 = arith.mulf %37, %38 : vector<8x128xf32>
    %40 = arith.addf %33, %39 : vector<8x128xf32>
    %41 = arith.truncf %40 : vector<8x128xf32> to vector<8x128xbf16>
    %c0_37 = arith.constant 0 : index
    %c2 = arith.constant 2 : index
    %c0_38 = arith.constant 0 : index
    %c0_39 = arith.constant 0 : index
    %42 = vector.load %arg3[%c0_37, %c2, %c0_38, %c0_39] : memref<1x8x8x128xbf16, #tpu.memory_space<vmem>>, vector<1x1x8x128xbf16>
    %43 = vector.shape_cast %42 : vector<1x1x8x128xbf16> to vector<8x128xbf16>
    %44 = vector.shape_cast %41 : vector<8x128xbf16> to vector<1x1x8x128xbf16>
    tpu.vector_store %arg3[%c0_37, %c2, %c0_38, %c0_39], %44 {strides = array<i32>} : memref<1x8x8x128xbf16, #tpu.memory_space<vmem>>, vector<1x1x8x128xbf16>,
    %c0_40 = arith.constant 0 : index
    %c1_41 = arith.constant 1 : index
    %c0_42 = arith.constant 0 : index
    %c0_43 = arith.constant 0 : index
    %45 = vector.load %arg1[%c0_40, %c1_41, %c0_42, %c0_43] : memref<1x4x4x128xbf16, #tpu.memory_space<vmem>>, vector<1x1x4x128xbf16>
    %46 = vector.shape_cast %45 : vector<1x1x4x128xbf16> to vector<4x128xbf16>
    %47 = arith.extf %46 : vector<4x128xbf16> to vector<4x128xf32>
    %cst_44 = arith.constant dense<0.000000e+00> : vector<8x128xf32>
    %48 = tpu.matmul %0, %47, %cst_44 {dimension_numbers = #tpu.dot_dimension_numbers<[1], [0], [0], [1], [0, 0, 1, 1], [], []>} : vector<8x4xf32>, vector<4x128xf32>, vector<8x128xf32> -> vector<8x128xf32>
    %cst_45 = arith.constant 0.714285731 : f32
    %49 = vector.broadcast %cst_45 : f32 to vector<8x128xf32>
    %50 = arith.mulf %48, %49 : vector<8x128xf32>
    %c0_46 = arith.constant 0 : index
    %c2_47 = arith.constant 2 : index
    %c0_48 = arith.constant 0 : index
    %c0_49 = arith.constant 0 : index
    %51 = vector.load %arg1[%c0_46, %c2_47, %c0_48, %c0_49] : memref<1x4x4x128xbf16, #tpu.memory_space<vmem>>, vector<1x1x4x128xbf16>
    %52 = vector.shape_cast %51 : vector<1x1x4x128xbf16> to vector<4x128xbf16>
    %53 = arith.extf %52 : vector<4x128xbf16> to vector<4x128xf32>
    %cst_50 = arith.constant dense<0.000000e+00> : vector<8x128xf32>
    %54 = tpu.matmul %0, %53, %cst_50 {dimension_numbers = #tpu.dot_dimension_numbers<[1], [0], [0], [1], [0, 0, 1, 1], [], []>} : vector<8x4xf32>, vector<4x128xf32>, vector<8x128xf32> -> vector<8x128xf32>
    %cst_51 = arith.constant 0.285714298 : f32
    %55 = vector.broadcast %cst_51 : f32 to vector<8x128xf32>
    %56 = arith.mulf %54, %55 : vector<8x128xf32>
    %57 = arith.addf %50, %56 : vector<8x128xf32>
    %58 = arith.truncf %57 : vector<8x128xf32> to vector<8x128xbf16>
    %c0_52 = arith.constant 0 : index
    %c3 = arith.constant 3 : index
    %c0_53 = arith.constant 0 : index
    %c0_54 = arith.constant 0 : index
    %59 = vector.load %arg3[%c0_52, %c3, %c0_53, %c0_54] : memref<1x8x8x128xbf16, #tpu.memory_space<vmem>>, vector<1x1x8x128xbf16>
    %60 = vector.shape_cast %59 : vector<1x1x8x128xbf16> to vector<8x128xbf16>
    %61 = vector.shape_cast %58 : vector<8x128xbf16> to vector<1x1x8x128xbf16>
    tpu.vector_store %arg3[%c0_52, %c3, %c0_53, %c0_54], %61 {strides = array<i32>} : memref<1x8x8x128xbf16, #tpu.memory_space<vmem>>, vector<1x1x8x128xbf16>,
    %c0_55 = arith.constant 0 : index
    %c1_56 = arith.constant 1 : index
    %c0_57 = arith.constant 0 : index
    %c0_58 = arith.constant 0 : index
    %62 = vector.load %arg1[%c0_55, %c1_56, %c0_57, %c0_58] : memref<1x4x4x128xbf16, #tpu.memory_space<vmem>>, vector<1x1x4x128xbf16>
    %63 = vector.shape_cast %62 : vector<1x1x4x128xbf16> to vector<4x128xbf16>
    %64 = arith.extf %63 : vector<4x128xbf16> to vector<4x128xf32>
    %cst_59 = arith.constant dense<0.000000e+00> : vector<8x128xf32>
    %65 = tpu.matmul %0, %64, %cst_59 {dimension_numbers = #tpu.dot_dimension_numbers<[1], [0], [0], [1], [0, 0, 1, 1], [], []>} : vector<8x4xf32>, vector<4x128xf32>, vector<8x128xf32> -> vector<8x128xf32>
    %cst_60 = arith.constant 0.285714298 : f32
    %66 = vector.broadcast %cst_60 : f32 to vector<8x128xf32>
    %67 = arith.mulf %65, %66 : vector<8x128xf32>
    %c0_61 = arith.constant 0 : index
    %c2_62 = arith.constant 2 : index
    %c0_63 = arith.constant 0 : index
    %c0_64 = arith.constant 0 : index
    %68 = vector.load %arg1[%c0_61, %c2_62, %c0_63, %c0_64] : memref<1x4x4x128xbf16, #tpu.memory_space<vmem>>, vector<1x1x4x128xbf16>
    %69 = vector.shape_cast %68 : vector<1x1x4x128xbf16> to vector<4x128xbf16>
    %70 = arith.extf %69 : vector<4x128xbf16> to vector<4x128xf32>
    %cst_65 = arith.constant dense<0.000000e+00> : vector<8x128xf32>
    %71 = tpu.matmul %0, %70, %cst_65 {dimension_numbers = #tpu.dot_dimension_numbers<[1], [0], [0], [1], [0, 0, 1, 1], [], []>} : vector<8x4xf32>, vector<4x128xf32>, vector<8x128xf32> -> vector<8x128xf32>
    %cst_66 = arith.constant 0.714285731 : f32
    %72 = vector.broadcast %cst_66 : f32 to vector<8x128xf32>
    %73 = arith.mulf %71, %72 : vector<8x128xf32>
    %74 = arith.addf %67, %73 : vector<8x128xf32>
    %75 = arith.truncf %74 : vector<8x128xf32> to vector<8x128xbf16>
    %c0_67 = arith.constant 0 : index
    %c4 = arith.constant 4 : index
    %c0_68 = arith.constant 0 : index
    %c0_69 = arith.constant 0 : index
    %76 = vector.load %arg3[%c0_67, %c4, %c0_68, %c0_69] : memref<1x8x8x128xbf16, #tpu.memory_space<vmem>>, vector<1x1x8x128xbf16>
    %77 = vector.shape_cast %76 : vector<1x1x8x128xbf16> to vector<8x128xbf16>
    %78 = vector.shape_cast %75 : vector<8x128xbf16> to vector<1x1x8x128xbf16>
    tpu.vector_store %arg3[%c0_67, %c4, %c0_68, %c0_69], %78 {strides = array<i32>} : memref<1x8x8x128xbf16, #tpu.memory_space<vmem>>, vector<1x1x8x128xbf16>,
    %c0_70 = arith.constant 0 : index
    %c2_71 = arith.constant 2 : index
    %c0_72 = arith.constant 0 : index
    %c0_73 = arith.constant 0 : index
    %79 = vector.load %arg1[%c0_70, %c2_71, %c0_72, %c0_73] : memref<1x4x4x128xbf16, #tpu.memory_space<vmem>>, vector<1x1x4x128xbf16>
    %80 = vector.shape_cast %79 : vector<1x1x4x128xbf16> to vector<4x128xbf16>
    %81 = arith.extf %80 : vector<4x128xbf16> to vector<4x128xf32>
    %cst_74 = arith.constant dense<0.000000e+00> : vector<8x128xf32>
    %82 = tpu.matmul %0, %81, %cst_74 {dimension_numbers = #tpu.dot_dimension_numbers<[1], [0], [0], [1], [0, 0, 1, 1], [], []>} : vector<8x4xf32>, vector<4x128xf32>, vector<8x128xf32> -> vector<8x128xf32>
    %cst_75 = arith.constant 0.857142865 : f32
    %83 = vector.broadcast %cst_75 : f32 to vector<8x128xf32>
    %84 = arith.mulf %82, %83 : vector<8x128xf32>
    %c0_76 = arith.constant 0 : index
    %c3_77 = arith.constant 3 : index
    %c0_78 = arith.constant 0 : index
    %c0_79 = arith.constant 0 : index
    %85 = vector.load %arg1[%c0_76, %c3_77, %c0_78, %c0_79] : memref<1x4x4x128xbf16, #tpu.memory_space<vmem>>, vector<1x1x4x128xbf16>
    %86 = vector.shape_cast %85 : vector<1x1x4x128xbf16> to vector<4x128xbf16>
    %87 = arith.extf %86 : vector<4x128xbf16> to vector<4x128xf32>
    %cst_80 = arith.constant dense<0.000000e+00> : vector<8x128xf32>
    %88 = tpu.matmul %0, %87, %cst_80 {dimension_numbers = #tpu.dot_dimension_numbers<[1], [0], [0], [1], [0, 0, 1, 1], [], []>} : vector<8x4xf32>, vector<4x128xf32>, vector<8x128xf32> -> vector<8x128xf32>
    %cst_81 = arith.constant 0.142857149 : f32
    %89 = vector.broadcast %cst_81 : f32 to vector<8x128xf32>
    %90 = arith.mulf %88, %89 : vector<8x128xf32>
    %91 = arith.addf %84, %90 : vector<8x128xf32>
    %92 = arith.truncf %91 : vector<8x128xf32> to vector<8x128xbf16>
    %c0_82 = arith.constant 0 : index
    %c5 = arith.constant 5 : index
    %c0_83 = arith.constant 0 : index
    %c0_84 = arith.constant 0 : index
    %93 = vector.load %arg3[%c0_82, %c5, %c0_83, %c0_84] : memref<1x8x8x128xbf16, #tpu.memory_space<vmem>>, vector<1x1x8x128xbf16>
    %94 = vector.shape_cast %93 : vector<1x1x8x128xbf16> to vector<8x128xbf16>
    %95 = vector.shape_cast %92 : vector<8x128xbf16> to vector<1x1x8x128xbf16>
    tpu.vector_store %arg3[%c0_82, %c5, %c0_83, %c0_84], %95 {strides = array<i32>} : memref<1x8x8x128xbf16, #tpu.memory_space<vmem>>, vector<1x1x8x128xbf16>,
    %c0_85 = arith.constant 0 : index
    %c2_86 = arith.constant 2 : index
    %c0_87 = arith.constant 0 : index
    %c0_88 = arith.constant 0 : index
    %96 = vector.load %arg1[%c0_85, %c2_86, %c0_87, %c0_88] : memref<1x4x4x128xbf16, #tpu.memory_space<vmem>>, vector<1x1x4x128xbf16>
    %97 = vector.shape_cast %96 : vector<1x1x4x128xbf16> to vector<4x128xbf16>
    %98 = arith.extf %97 : vector<4x128xbf16> to vector<4x128xf32>
    %cst_89 = arith.constant dense<0.000000e+00> : vector<8x128xf32>
    %99 = tpu.matmul %0, %98, %cst_89 {dimension_numbers = #tpu.dot_dimension_numbers<[1], [0], [0], [1], [0, 0, 1, 1], [], []>} : vector<8x4xf32>, vector<4x128xf32>, vector<8x128xf32> -> vector<8x128xf32>
    %cst_90 = arith.constant 0.428571433 : f32
    %100 = vector.broadcast %cst_90 : f32 to vector<8x128xf32>
    %101 = arith.mulf %99, %100 : vector<8x128xf32>
    %c0_91 = arith.constant 0 : index
    %c3_92 = arith.constant 3 : index
    %c0_93 = arith.constant 0 : index
    %c0_94 = arith.constant 0 : index
    %102 = vector.load %arg1[%c0_91, %c3_92, %c0_93, %c0_94] : memref<1x4x4x128xbf16, #tpu.memory_space<vmem>>, vector<1x1x4x128xbf16>
    %103 = vector.shape_cast %102 : vector<1x1x4x128xbf16> to vector<4x128xbf16>
    %104 = arith.extf %103 : vector<4x128xbf16> to vector<4x128xf32>
    %cst_95 = arith.constant dense<0.000000e+00> : vector<8x128xf32>
    %105 = tpu.matmul %0, %104, %cst_95 {dimension_numbers = #tpu.dot_dimension_numbers<[1], [0], [0], [1], [0, 0, 1, 1], [], []>} : vector<8x4xf32>, vector<4x128xf32>, vector<8x128xf32> -> vector<8x128xf32>
    %cst_96 = arith.constant 0.571428597 : f32
    %106 = vector.broadcast %cst_96 : f32 to vector<8x128xf32>
    %107 = arith.mulf %105, %106 : vector<8x128xf32>
    %108 = arith.addf %101, %107 : vector<8x128xf32>
    %109 = arith.truncf %108 : vector<8x128xf32> to vector<8x128xbf16>
    %c0_97 = arith.constant 0 : index
    %c6 = arith.constant 6 : index
    %c0_98 = arith.constant 0 : index
    %c0_99 = arith.constant 0 : index
    %110 = vector.load %arg3[%c0_97, %c6, %c0_98, %c0_99] : memref<1x8x8x128xbf16, #tpu.memory_space<vmem>>, vector<1x1x8x128xbf16>
    %111 = vector.shape_cast %110 : vector<1x1x8x128xbf16> to vector<8x128xbf16>
    %112 = vector.shape_cast %109 : vector<8x128xbf16> to vector<1x1x8x128xbf16>
    tpu.vector_store %arg3[%c0_97, %c6, %c0_98, %c0_99], %112 {strides = array<i32>} : memref<1x8x8x128xbf16, #tpu.memory_space<vmem>>, vector<1x1x8x128xbf16>,
    %c0_100 = arith.constant 0 : index
    %c3_101 = arith.constant 3 : index
    %c0_102 = arith.constant 0 : index
    %c0_103 = arith.constant 0 : index
    %113 = vector.load %arg1[%c0_100, %c3_101, %c0_102, %c0_103] : memref<1x4x4x128xbf16, #tpu.memory_space<vmem>>, vector<1x1x4x128xbf16>
    %114 = vector.shape_cast %113 : vector<1x1x4x128xbf16> to vector<4x128xbf16>
    %115 = arith.extf %114 : vector<4x128xbf16> to vector<4x128xf32>
    %cst_104 = arith.constant dense<0.000000e+00> : vector<8x128xf32>
    %116 = tpu.matmul %0, %115, %cst_104 {dimension_numbers = #tpu.dot_dimension_numbers<[1], [0], [0], [1], [0, 0, 1, 1], [], []>} : vector<8x4xf32>, vector<4x128xf32>, vector<8x128xf32> -> vector<8x128xf32>
    %cst_105 = arith.constant 1.000000e+00 : f32
    %117 = vector.broadcast %cst_105 : f32 to vector<8x128xf32>
    %118 = arith.mulf %116, %117 : vector<8x128xf32>
    %119 = arith.truncf %118 : vector<8x128xf32> to vector<8x128xbf16>
    %c0_106 = arith.constant 0 : index
    %c7 = arith.constant 7 : index
    %c0_107 = arith.constant 0 : index
    %c0_108 = arith.constant 0 : index
    %120 = vector.load %arg3[%c0_106, %c7, %c0_107, %c0_108] : memref<1x8x8x128xbf16, #tpu.memory_space<vmem>>, vector<1x1x8x128xbf16>
    %121 = vector.shape_cast %120 : vector<1x1x8x128xbf16> to vector<8x128xbf16>
    %122 = vector.shape_cast %119 : vector<8x128xbf16> to vector<1x1x8x128xbf16>
    tpu.vector_store %arg3[%c0_106, %c7, %c0_107, %c0_108], %122 {strides = array<i32>} : memref<1x8x8x128xbf16, #tpu.memory_space<vmem>>, vector<1x1x8x128xbf16>,
    return
  }
  func.func @transform_0(%arg0: i32) -> (i32, i32, i32, i32) {
    %c0_i32 = arith.constant 0 : i32
    %c0_i32_0 = arith.constant 0 : i32
    %c0_i32_1 = arith.constant 0 : i32
    %c0_i32_2 = arith.constant 0 : i32
    return %arg0, %c0_i32, %c0_i32_0, %c0_i32_1 : i32, i32, i32, i32
  }
  func.func @transform_1(%arg0: i32) -> (i32, i32) {
    %c0_i32 = arith.constant 0 : i32
    %c0_i32_0 = arith.constant 0 : i32
    %c0_i32_1 = arith.constant 0 : i32
    return %c0_i32, %c0_i32_0 : i32, i32
  }
  func.func @transform_2(%arg0: i32) -> (i32, i32, i32, i32) {
    %c0_i32 = arith.constant 0 : i32
    %c0_i32_0 = arith.constant 0 : i32
    %c0_i32_1 = arith.constant 0 : i32
    %c0_i32_2 = arith.constant 0 : i32
    return %arg0, %c0_i32, %c0_i32_0, %c0_i32_1 : i32, i32, i32, i32
  }
}

module attributes {stable_mosaic.version = 11 : i64} {
  func.func @_dual_mm_bias_kernel(%arg0: i32, %arg1: memref<128x128xbf16, #tpu.memory_space<vmem>>, %arg2: memref<128x128xbf16, #tpu.memory_space<vmem>>, %arg3: memref<128x48xbf16, #tpu.memory_space<vmem>>, %arg4: memref<48x128xbf16, #tpu.memory_space<vmem>>, %arg5: memref<1x128xf32, #tpu.memory_space<vmem>>, %arg6: memref<128x128xf32, #tpu.memory_space<vmem>>) attributes {dimension_semantics = [#tpu.dimension_semantics<parallel>], iteration_bounds = array<i64: 1>, scalar_prefetch = 0 : i64, scratch_operands = 0 : i64, tpu.core_type = #tpu.core_type<tc>, window_params = [{transform_indices = @transform_0, window_bounds = array<i64: 128, 128>}, {pipeline_mode = #tpu.pipeline_mode<synchronous>, transform_indices = @transform_1, window_bounds = array<i64: 128, 128>}, {transform_indices = @transform_2, window_bounds = array<i64: 128, 48>}, {pipeline_mode = #tpu.pipeline_mode<synchronous>, transform_indices = @transform_3, window_bounds = array<i64: 48, 128>}, {pipeline_mode = #tpu.pipeline_mode<synchronous>, transform_indices = @transform_4, window_bounds = array<i64: 1, 128>}, {transform_indices = @transform_5, window_bounds = array<i64: 128, 128>}]} {
    %c0 = arith.constant 0 : index
    %c0_0 = arith.constant 0 : index
    %0 = vector.load %arg1[%c0, %c0_0] : memref<128x128xbf16, #tpu.memory_space<vmem>>, vector<128x128xbf16>
    %c0_1 = arith.constant 0 : index
    %c0_2 = arith.constant 0 : index
    %1 = vector.load %arg2[%c0_1, %c0_2] : memref<128x128xbf16, #tpu.memory_space<vmem>>, vector<128x128xbf16>
    %cst = arith.constant dense<0.000000e+00> : vector<128x128xf32>
    %2 = tpu.matmul %0, %1, %cst {dimension_numbers = #tpu.dot_dimension_numbers<[1], [0], [0], [1], [0, 0, 1, 1], [], []>} : vector<128x128xbf16>, vector<128x128xbf16>, vector<128x128xf32> -> vector<128x128xf32>
    %c0_3 = arith.constant 0 : index
    %c0_4 = arith.constant 0 : index
    %3 = vector.load %arg3[%c0_3, %c0_4] : memref<128x48xbf16, #tpu.memory_space<vmem>>, vector<128x48xbf16>
    %c0_5 = arith.constant 0 : index
    %c0_6 = arith.constant 0 : index
    %4 = vector.load %arg4[%c0_5, %c0_6] : memref<48x128xbf16, #tpu.memory_space<vmem>>, vector<48x128xbf16>
    %cst_7 = arith.constant dense<0.000000e+00> : vector<128x128xf32>
    %5 = tpu.matmul %3, %4, %cst_7 {dimension_numbers = #tpu.dot_dimension_numbers<[1], [0], [0], [1], [0, 0, 1, 1], [], []>} : vector<128x48xbf16>, vector<48x128xbf16>, vector<128x128xf32> -> vector<128x128xf32>
    %6 = arith.addf %2, %5 : vector<128x128xf32>
    %c0_8 = arith.constant 0 : index
    %c0_9 = arith.constant 0 : index
    %7 = vector.load %arg5[%c0_8, %c0_9] : memref<1x128xf32, #tpu.memory_space<vmem>>, vector<1x128xf32>
    %8 = vector.broadcast %7 : vector<1x128xf32> to vector<128x128xf32>
    %9 = arith.addf %6, %8 : vector<128x128xf32>
    %c0_10 = arith.constant 0 : index
    %c0_11 = arith.constant 0 : index
    %10 = vector.load %arg6[%c0_10, %c0_11] : memref<128x128xf32, #tpu.memory_space<vmem>>, vector<128x128xf32>
    tpu.vector_store %arg6[%c0_10, %c0_11], %9 {strides = array<i32>} : memref<128x128xf32, #tpu.memory_space<vmem>>, vector<128x128xf32>,
    return
  }
  func.func @transform_0(%arg0: i32) -> (i32, i32) {
    %c0_i32 = arith.constant 0 : i32
    %c0_i32_0 = arith.constant 0 : i32
    return %arg0, %c0_i32 : i32, i32
  }
  func.func @transform_1(%arg0: i32) -> (i32, i32) {
    %c0_i32 = arith.constant 0 : i32
    %c0_i32_0 = arith.constant 0 : i32
    %c0_i32_1 = arith.constant 0 : i32
    return %c0_i32, %c0_i32_0 : i32, i32
  }
  func.func @transform_2(%arg0: i32) -> (i32, i32) {
    %c0_i32 = arith.constant 0 : i32
    %c0_i32_0 = arith.constant 0 : i32
    return %arg0, %c0_i32 : i32, i32
  }
  func.func @transform_3(%arg0: i32) -> (i32, i32) {
    %c0_i32 = arith.constant 0 : i32
    %c0_i32_0 = arith.constant 0 : i32
    %c0_i32_1 = arith.constant 0 : i32
    return %c0_i32, %c0_i32_0 : i32, i32
  }
  func.func @transform_4(%arg0: i32) -> (i32, i32) {
    %c0_i32 = arith.constant 0 : i32
    %c0_i32_0 = arith.constant 0 : i32
    %c0_i32_1 = arith.constant 0 : i32
    return %c0_i32, %c0_i32_0 : i32, i32
  }
  func.func @transform_5(%arg0: i32) -> (i32, i32) {
    %c0_i32 = arith.constant 0 : i32
    %c0_i32_0 = arith.constant 0 : i32
    return %arg0, %c0_i32 : i32, i32
  }
}

module attributes {stable_mosaic.version = 11 : i64} {
  func.func @_upsample_tail_kernel(%arg0: i32, %arg1: memref<1x8x8xf32, #tpu.memory_space<vmem>>, %arg2: memref<64x8xf32, #tpu.memory_space<vmem>>, %arg3: memref<8x64xf32, #tpu.memory_space<vmem>>, %arg4: memref<1x64x64xf32, #tpu.memory_space<vmem>>) attributes {dimension_semantics = [#tpu.dimension_semantics<parallel>], iteration_bounds = array<i64: 8>, scalar_prefetch = 0 : i64, scratch_operands = 0 : i64, tpu.core_type = #tpu.core_type<tc>, window_params = [{transform_indices = @transform_0, window_bounds = array<i64: 1, 8, 8>}, {pipeline_mode = #tpu.pipeline_mode<synchronous>, transform_indices = @transform_1, window_bounds = array<i64: 64, 8>}, {pipeline_mode = #tpu.pipeline_mode<synchronous>, transform_indices = @transform_2, window_bounds = array<i64: 8, 64>}, {transform_indices = @transform_3, window_bounds = array<i64: 1, 64, 64>}]} {
    %c0 = arith.constant 0 : index
    %c0_0 = arith.constant 0 : index
    %0 = vector.load %arg2[%c0, %c0_0] : memref<64x8xf32, #tpu.memory_space<vmem>>, vector<64x8xf32>
    %c0_1 = arith.constant 0 : index
    %c0_2 = arith.constant 0 : index
    %c0_3 = arith.constant 0 : index
    %1 = vector.load %arg1[%c0_1, %c0_2, %c0_3] : memref<1x8x8xf32, #tpu.memory_space<vmem>>, vector<1x8x8xf32>
    %2 = vector.shape_cast %1 : vector<1x8x8xf32> to vector<8x8xf32>
    %cst = arith.constant dense<0.000000e+00> : vector<64x8xf32>
    %3 = tpu.matmul %0, %2, %cst {dimension_numbers = #tpu.dot_dimension_numbers<[1], [0], [0], [1], [0, 0, 1, 1], [], []>} : vector<64x8xf32>, vector<8x8xf32>, vector<64x8xf32> -> vector<64x8xf32>
    %c0_4 = arith.constant 0 : index
    %c0_5 = arith.constant 0 : index
    %4 = vector.load %arg3[%c0_4, %c0_5] : memref<8x64xf32, #tpu.memory_space<vmem>>, vector<8x64xf32>
    %cst_6 = arith.constant dense<0.000000e+00> : vector<64x64xf32>
    %5 = tpu.matmul %3, %4, %cst_6 {dimension_numbers = #tpu.dot_dimension_numbers<[1], [0], [0], [1], [0, 0, 1, 1], [], []>} : vector<64x8xf32>, vector<8x64xf32>, vector<64x64xf32> -> vector<64x64xf32>
    %c0_7 = arith.constant 0 : index
    %c0_8 = arith.constant 0 : index
    %c0_9 = arith.constant 0 : index
    %6 = vector.load %arg4[%c0_7, %c0_8, %c0_9] : memref<1x64x64xf32, #tpu.memory_space<vmem>>, vector<1x64x64xf32>
    %7 = vector.shape_cast %6 : vector<1x64x64xf32> to vector<64x64xf32>
    %8 = vector.shape_cast %5 : vector<64x64xf32> to vector<1x64x64xf32>
    tpu.vector_store %arg4[%c0_7, %c0_8, %c0_9], %8 {strides = array<i32>} : memref<1x64x64xf32, #tpu.memory_space<vmem>>, vector<1x64x64xf32>,
    return
  }
  func.func @transform_0(%arg0: i32) -> (i32, i32, i32) {
    %c0_i32 = arith.constant 0 : i32
    %c0_i32_0 = arith.constant 0 : i32
    %c0_i32_1 = arith.constant 0 : i32
    return %arg0, %c0_i32, %c0_i32_0 : i32, i32, i32
  }
  func.func @transform_1(%arg0: i32) -> (i32, i32) {
    %c0_i32 = arith.constant 0 : i32
    %c0_i32_0 = arith.constant 0 : i32
    %c0_i32_1 = arith.constant 0 : i32
    return %c0_i32, %c0_i32_0 : i32, i32
  }
  func.func @transform_2(%arg0: i32) -> (i32, i32) {
    %c0_i32 = arith.constant 0 : i32
    %c0_i32_0 = arith.constant 0 : i32
    %c0_i32_1 = arith.constant 0 : i32
    return %c0_i32, %c0_i32_0 : i32, i32
  }
  func.func @transform_3(%arg0: i32) -> (i32, i32, i32) {
    %c0_i32 = arith.constant 0 : i32
    %c0_i32_0 = arith.constant 0 : i32
    %c0_i32_1 = arith.constant 0 : i32
    return %arg0, %c0_i32, %c0_i32_0 : i32, i32, i32
  }
}

</mosaic_0001>

<bundles_post_ra>
// kernel: mobilenet_v3_seg_forward.10
= control target key start
LH: loop header
LB: loop body
LE: loop exit
PB: predicated region body
PF: predicated region fallthrough
CT: control target
= control target key end

     0   :  { %s805_s12 = smov 0   ;;  %s907_s0 = inlined_call_operand.vmem [shape: bf16[2,33,33,16], index: 0, kind: input, shape index: {}]   ;;  %s908_s1 = inlined_call_operand.vmem [shape: bf16[4,16,16], index: 1, kind: input, shape index: {}]   ;;  %s909_s2 = inlined_call_operand.vmem [shape: f32[1,16], index: 2, kind: input, shape index: {}]   ;;  %s910_s3 = inlined_call_operand.vmem [shape: bf16[2,32,32,16], index: 3, kind: output, shape index: {}]  }
   0x1 LB: > { %s644_s13 = sadd.s32 4294967295, %s779_s12   ;;  %p648_p0 = scmp.ge.s32.totalorder %s779_s12, 1  ;;  %s779_s12 = sphi %s805_s12, %s13_s12  }
   0x2   : > { %p137_p1 = scmp.lt.s32.totalorder %s779_s12, 3 }
   0x4   : > { %p138_p2 = pnand %p648_p0, %p137_p1 }
   0x5   : > { %p161_p3 = scmp.lt.s32.totalorder (!%p138_p2), %s644_s13, 1  ;;  %v816_v0 = vld [vmem:[%s908_s1] sm:$0xf] (!%p138_p2)  ;;  %v821_v1 = vld [vmem:[%s908_s1 + $0x4] sm:$0xf] (!%p138_p2)  ;;  %s868_s15 = smov (!%p138_p2), 0  }
   0x6   : > { %141 = sbr.rel (%p138_p2) target bundleno = 274 (0x112), region = 32  ;;  %v826_v2 = vld [vmem:[%s908_s1 + $0x8] sm:$0xf] (!%p138_p2)  ;;  %v831_v3 = vld [vmem:[%s908_s1 + $0xc] sm:$0xf] (!%p138_p2) }
   0x7   : > { %v836_v4 = vld [vmem:[%s908_s1 + $0x10] sm:$0xf] (!%p138_p2)  ;;  %v841_v5 = vld [vmem:[%s908_s1 + $0x14] sm:$0xf] (!%p138_p2)  ;;  %v846_v6 = vld [vmem:[%s908_s1 + $0x18] sm:$0xf] (!%p138_p2) }
   0x8   : > { %v851_v7 = vld [vmem:[%s908_s1 + $0x1c] sm:$0xf] (!%p138_p2)  ;;  %v856_v8 = vld [vmem:[%s909_s2] ss:$0 sm:$0xff] (!%p138_p2) }
   0xd   : > { %s912_s13 = smov (!%p161_p3, %s644_s13), 1 }
   0xe   : > { %s746_s5 = smul.u32 660, %s912_s13  ;;  %s691_s6 = sshll.u32 %s912_s13, 9 }
   0xf   : > { %s861_s9 = scalar_lea.vmem %s910_s3, %s691_s6 }
  0x10   : > { %s866_s14 = scalar_lea.vmem %s907_s0, %s746_s5 }
  0x11 LB: >> { %v675_v9 = vcombine.low %v836_v4, %v841_v5  ;;  %v662_v10 = vcombine.low %v826_v2, %v831_v3  ;;  %v665_v11 = vcombine.low %v816_v0, %v821_v1  ;;  %v679_v12 = vcombine.low %v846_v6, %v851_v7  ;;  %s692_s13 = smul.u32 20, %s783_s15  ;;  %s697_s17 = sshll.u32 %s783_s15, 4  ;;  %s783_s15 = sphi %s868_s15, %s189_s15  }
  0x12   : >> { %vm238_vm0 = vcmask 130048   ;;  %vm211_vm1 = vsmask.f32 7424  ;;  %s571_s18 = scalar_lea.vmem %s861_s9, %s697_s17  ;;  %vm572_vm2 = vcmask 125952   ;;  %s189_s15 = sadd.s32 1, %s783_s15  }
  0x13   : >> { %722 = vmatprep.subr.bf16.mxu0 %v675_v9  ;;  %710 = vmatprep.subr.bf16.mxu1 %v662_v10  ;;  %s192_s16 = scalar_lea.vmem %s866_s14, %s692_s13  ;;  %p186_p4 = scmp.ge.s32.totalorder %s189_s15, 32  }
  0x14   : >> { %723 = vmatpush3.bf16.msra.mxu0 %v675_v9  ;;  %711 = vmatpush3.bf16.msra.mxu1 %v662_v10  ;;  %v763_v13 = vld [vmem:[%s192_s16 + $0x14] sm:$0xff]   ;;  %v764_v14 = vld [vmem:[%s192_s16 + $0x1c] sm:$0xff]   ;;  %v766_v20 = vld [vmem:[%s192_s16 + $0x8] sm:$0xff]  }
  0x15   : >> { %716 = vmatprep.subr.bf16.mxu1 %v665_v11  ;;  %728 = vmatprep.subr.bf16.mxu0 %v679_v12  ;;  %v440_v15 = vshrl.u32 %v763_v13, 16  ;;  %v442_v16 = vshll.u32 %v763_v13, 16  ;;  %v765_v17 = vld [vmem:[%s192_s16] sm:$0xff]   ;;  %v446_v18 = vshll.u32 %v764_v14, 16  ;;  %v450_v21 = vshrl.u32 %v764_v14, 16 }
  0x16   : >> { %724 = vmatprep.mubr.msk.bf16.mxu0 %vm238_vm0, %v763_v13  ;;  %v213_v22 = vshrl.u32 %v765_v17, 16  ;;  %v215_v23 = vshll.u32 %v765_v17, 16  ;;  %v767_v24 = vld [vmem:[%s192_s16 + $0x10] ss:$0 sps:$4 sm:$0x11]   ;;  %v220_v26 = vshll.u32 %v766_v20, 16 }
  0x17   : >> { %725 = vmatmul.mubr.msk.bf16.vlgmr.msra.gmra.mrb[0].mxu0 %vm238_vm0, %v764_v14  ;;  %v444_v19 = vrot.slane %v442_v16, 1  ;;  %v448_v25 = vrot.slane %v446_v18, 1  ;;  %v224_v27 = vshrl.u32 %v766_v20, 16  ;;  %v228_v30 = vshll.u32 %v767_v24, 16 }
  0x18   : >> { %729 = vmatpush3.bf16.msra.mxu0 %v679_v12  ;;  %v217_v29 = vrot.slane %v215_v23, 1  ;;  %v768_v31 = vld [vmem:[%s192_s16 + $0x24] ss:$0 sps:$4 sm:$0x11]   ;;  %v222_v32 = vrot.slane %v220_v26, 1 }
  0x19   : >> { %v445_v28 = vor.u32 %v444_v19, %v440_v15  ;;  %v230_v35 = vrot.slane %v228_v30, 1  ;;  %v452_v36 = vor.u32 %v450_v21, %v448_v25  ;;  %v454_v37 = vshll.u32 %v768_v31, 16 }
  0x1a   : >> { %v218_v34 = vor.u32 %v217_v29, %v213_v22  ;;  %v226_v38 = vor.u32 %v224_v27, %v222_v32 }
  0x1b   : >> { %v449_v33 = vsel %vm211_vm1, %v445_v28, %v448_v25  ;;  %v456_v40 = vrot.slane %v454_v37, 1 }
  0x1c   : >> { %730 = vmatprep.mubr.msk.bf16.mxu0 %vm238_vm0, %v449_v33  ;;  %v223_v39 = vsel %vm211_vm1, %v218_v34, %v222_v32  ;;  %v231_v41 = vsel %vm211_vm1, %v226_v38, %v230_v35 }
  0x1d   : >> { %712 = vmatprep.mubr.msk.bf16.mxu1 %vm238_vm0, %v223_v39  ;;  %v457_v42 = vsel %vm211_vm1, %v452_v36, %v456_v40 }
  0x1e   : >> { %713 = vmatmul.mubr.msk.bf16.vlgmr.msra.gmra.mrb[0].mxu1 %vm238_vm0, %v231_v41 }
  0x1f   : >> { %717 = vmatpush3.bf16.msra.mxu1 %v665_v11  ;;  %718 = vmatprep.mubr.msk.bf16.mxu1 %vm238_vm0, %v765_v17 }
  0x23   : >> { %731 = vmatmul.mubr.msk.bf16.vlgmr.msra.gmra.mrb[0].mxu0 %vm238_vm0, %v457_v42 }
  0x2a   : >> { %719 = vmatmul.mubr.msk.bf16.vlgmr.msra.gmra.mrb[0].mxu1 %vm238_vm0, %v766_v20 }
  0xf6   : >> { %v732_v43 = vpop.f32.mrb[0].mxu0 }
  0xf7   : >> { %v504_v44 = vpop.f32.mrb[1].mxu0 }
  0xf8   : >> { %v733_v45 = vpop.f32.mrb[2].mxu0 }
  0xf9   : >> { %v507_v46 = vpop.f32.mrb[3].mxu0 }
  0xfd   : >> { %v720_v47 = vpop.f32.mrb[0].mxu1 }
  0xfe   : >> { %v734_v48 = vadd.f32 %v732_v43, %v720_v47  ;;  %v338_v49 = vpop.f32.mrb[1].mxu1 }
  0xff   : >> { %v735_v50 = vadd.f32 %v504_v44, %v338_v49  ;;  %v721_v51 = vpop.f32.mrb[2].mxu1 }
 0x100   : >> { %v531_v52 = vadd.f32 %v734_v48, %v856_v8  ;;  %v736_v53 = vadd.f32 %v733_v45, %v721_v51  ;;  %v341_v54 = vpop.f32.mrb[3].mxu1 }
 0x101   : >> { %v529_v55 = vadd.f32 %v735_v50, %v856_v8  ;;  %v737_v56 = vadd.f32 %v507_v46, %v341_v54 }
 0x102   : >> { %v535_v57 = vadd.f32 3.0, %v531_v52  ;;  %v532_v58 = vadd.f32 %v736_v53, %v856_v8 }
 0x103   : >> { %v533_v59 = vadd.f32 3.0, %v529_v55  ;;  %v530_v60 = vadd.f32 %v737_v56, %v856_v8 }
 0x104   : >> { %v539_v61 = vmax.f32 %v535_v57, 0.0  ;;  %v536_v62 = vadd.f32 3.0, %v532_v58 }
 0x105   : >> { %v537_v63 = vmax.f32 %v533_v59, 0.0  ;;  %v534_v9 = vadd.f32 3.0, %v530_v60 }
 0x106   : >> { %v543_v10 = vmin.f32 %v539_v61, 6.0  ;;  %v540_v11 = vmax.f32 %v536_v62, 0.0 }
 0x107   : >> { %v541_v12 = vmin.f32 %v537_v63, 6.0  ;;  %v538_v13 = vmax.f32 %v534_v9, 0.0 }
 0x108   : >> { %v547_v14 = vmul.f32 %v543_v10, %v531_v52  ;;  %v544_v15 = vmin.f32 %v540_v11, 6.0 }
 0x109   : >> { %v545_v16 = vmul.f32 %v541_v12, %v529_v55  ;;  %v542_v17 = vmin.f32 %v538_v13, 6.0 }
 0x10a   : >> { %v551_v18 = vmul.f32 0.16666667, %v547_v14  ;;  %v548_v19 = vmul.f32 %v544_v15, %v532_v58 }
 0x10b   : >> { %v549_v20 = vmul.f32 0.16666667, %v545_v16  ;;  %v546_v21 = vmul.f32 %v542_v17, %v530_v60  ;;  %188 = sbr.rel (!%p186_p4) target bundleno = 17 (0x11), region = 75 }
 0x10c   : >> { %v695_v22 = vpack.c.bf16 %v551_v18, %v551_v18  ;;  %v552_v23 = vmul.f32 0.16666667, %v548_v19 }
 0x10d   : >> { %v693_v24 = vpack.c.bf16 %v549_v20, %v549_v20  ;;  %v550_v25 = vmul.f32 0.16666667, %v546_v21 }
 0x10e   : >> { %575 = vst.msk [vmem:[%s571_s18 + $0x8] sm:$0xf] %vm572_vm2, %v695_v22  ;;  %v696_v26 = vpack.c.bf16 %v552_v23, %v552_v23 }
 0x10f   : >> { %573 = vst.msk [vmem:[%s571_s18] sm:$0xf] %vm572_vm2, %v693_v24  ;;  %v694_v27 = vpack.c.bf16 %v550_v25, %v550_v25 }
 0x110   : >> { %576 = vst.msk [vmem:[%s571_s18 + $0xc] sm:$0xf] %vm572_vm2, %v696_v26 }
 0x111   : >> { %574 = vst.msk [vmem:[%s571_s18 + $0x4] sm:$0xf] %vm572_vm2, %v694_v27 }
 0x112 PF: > { %s13_s12 = sadd.s32 1, %s779_s12  }
 0x113   : > { %p10_p5 = scmp.ge.s32.totalorder %s13_s12, 4  }
 0x115   :  { %12 = sbr.rel (!%p10_p5) target bundleno = 1 (0x1), region = 86 }

// kernel: mobilenet_v3_seg_forward.11
= control target key start
LH: loop header
LB: loop body
LE: loop exit
PB: predicated region body
PF: predicated region fallthrough
CT: control target
= control target key end

     0   :  { %s835_s12 = smov 0   ;;  %s1103_s0 = inlined_call_operand.vmem [shape: bf16[2,17,17,64], index: 0, kind: input, shape index: {}]   ;;  %s1104_s1 = inlined_call_operand.vmem [shape: bf16[4,64,24], index: 1, kind: input, shape index: {}]   ;;  %s1105_s2 = inlined_call_operand.vmem [shape: f32[1,24], index: 2, kind: input, shape index: {}]   ;;  %s1106_s3 = inlined_call_operand.vmem [shape: bf16[2,16,16,24], index: 3, kind: output, shape index: {}]  }
   0x1 LB: > { %s634_s13 = sadd.s32 4294967295, %s807_s12   ;;  %p638_p0 = scmp.ge.s32.totalorder %s807_s12, 1  ;;  %s807_s12 = sphi %s835_s12, %s13_s12  }
   0x2   : > { %p137_p1 = scmp.lt.s32.totalorder %s807_s12, 3 }
   0x4   : > { %p138_p2 = pnand %p638_p0, %p137_p1 }
   0x5   : > { %p161_p3 = scmp.lt.s32.totalorder (!%p138_p2), %s634_s13, 1  ;;  %v846_v0 = vld [vmem:[%s1104_s1] sm:$0xf] (!%p138_p2)  ;;  %v851_v1 = vld [vmem:[%s1104_s1 + $0x4] sm:$0xf] (!%p138_p2)  ;;  %s1018_s11 = smov (!%p138_p2), 0  }
   0x6   : > { %141 = sbr.rel (%p138_p2) target bundleno = 276 (0x114), region = 32  ;;  %v856_v2 = vld [vmem:[%s1104_s1 + $0x8] sm:$0xf] (!%p138_p2)  ;;  %v861_v3 = vld [vmem:[%s1104_s1 + $0xc] sm:$0xf] (!%p138_p2) }
   0x7   : > { %v866_v4 = vld [vmem:[%s1104_s1 + $0x10] sm:$0xf] (!%p138_p2)  ;;  %v871_v5 = vld [vmem:[%s1104_s1 + $0x14] sm:$0xf] (!%p138_p2)  ;;  %v876_v6 = vld [vmem:[%s1104_s1 + $0x18] sm:$0xf] (!%p138_p2) }
   0x8   : > { %v881_v7 = vld [vmem:[%s1104_s1 + $0x1c] sm:$0xf] (!%p138_p2)  ;;  %v886_v8 = vld [vmem:[%s1104_s1 + $0x20] sm:$0xf] (!%p138_p2)  ;;  %v891_v9 = vld [vmem:[%s1104_s1 + $0x24] sm:$0xf] (!%p138_p2) }
   0x9   : > { %v896_v10 = vld [vmem:[%s1104_s1 + $0x28] sm:$0xf] (!%p138_p2)  ;;  %v901_v11 = vld [vmem:[%s1104_s1 + $0x2c] sm:$0xf] (!%p138_p2)  ;;  %v911_v12 = vld [vmem:[%s1104_s1 + $0x30] sm:$0xf] (!%p138_p2) }
   0xa   : > { %v916_v13 = vld [vmem:[%s1104_s1 + $0x34] sm:$0xf] (!%p138_p2)  ;;  %v921_v14 = vld [vmem:[%s1104_s1 + $0x38] sm:$0xf] (!%p138_p2)  ;;  %v931_v15 = vld [vmem:[%s1104_s1 + $0x3c] sm:$0xf] (!%p138_p2) }
   0xb   : > { %v936_v16 = vld [vmem:[%s1104_s1 + $0x40] sm:$0xf] (!%p138_p2)  ;;  %v941_v17 = vld [vmem:[%s1104_s1 + $0x44] sm:$0xf] (!%p138_p2)  ;;  %v946_v18 = vld [vmem:[%s1104_s1 + $0x48] sm:$0xf] (!%p138_p2) }
   0xc   : > { %v951_v19 = vld [vmem:[%s1104_s1 + $0x4c] sm:$0xf] (!%p138_p2)  ;;  %v956_v20 = vld [vmem:[%s1104_s1 + $0x50] sm:$0xf] (!%p138_p2)  ;;  %v961_v21 = vld [vmem:[%s1104_s1 + $0x54] sm:$0xf] (!%p138_p2) }
   0xd   : > { %s1108_s13 = smov (!%p161_p3, %s634_s13), 1  ;;  %v966_v22 = vld [vmem:[%s1104_s1 + $0x58] sm:$0xf]  ;;  %v971_v23 = vld [vmem:[%s1104_s1 + $0x5c] sm:$0xf] }
   0xe   : > { %s774_s7 = smul.u32 204, %s1108_s13  ;;  %s701_s8 = sshll.u32 %s1108_s13, 7  ;;  %v976_v24 = vld [vmem:[%s1104_s1 + $0x60] sm:$0xf]  ;;  %v981_v25 = vld [vmem:[%s1104_s1 + $0x64] sm:$0xf] }
   0xf   : > { %s906_s17 = scalar_lea.vmem %s1106_s3, %s701_s8  ;;  %v986_v26 = vld [vmem:[%s1104_s1 + $0x68] sm:$0xf]  ;;  %v991_v27 = vld [vmem:[%s1104_s1 + $0x6c] sm:$0xf]  ;;  %v996_v28 = vld [vmem:[%s1104_s1 + $0x70] sm:$0xf] }
  0x10   : > { %s926_s25 = scalar_lea.vmem %s1103_s0, %s774_s7  ;;  %v1001_v29 = vld [vmem:[%s1104_s1 + $0x74] sm:$0xf]  ;;  %v1006_v30 = vld [vmem:[%s1104_s1 + $0x78] sm:$0xf]  ;;  %v1011_v31 = vld [vmem:[%s1104_s1 + $0x7c] sm:$0xf] }
  0x11   : > { %v1016_v32 = vld [vmem:[%s1105_s2] ss:$0 sm:$0xff] }
  0x12 LB: >> { %v669_v33 = vcombine.low %v886_v8, %v891_v9  ;;  %v674_v34 = vcombine.low %v846_v0, %v851_v1  ;;  %v813_v35 = vmov 0.0   ;;  %v670_v36 = vcombine.low %v896_v10, %v901_v11  ;;  %s702_s14 = smul.u32 12, %s811_s11  ;;  %s705_s16 = sshll.u32 %s811_s11, 3  ;;  %s811_s11 = sphi %s1018_s11, %s213_s11  }
  0x13   : >> { %726 = vmatprep.subr.bf16.mxu0 %v813_v35  ;;  %738 = vmatprep.subr.bf16.mxu1 %v813_v35  ;;  %v675_v37 = vcombine.low %v856_v2, %v861_v3  ;;  %vm814_vm0 = vmmov 0   ;;  %v671_v38 = vcombine.low %v911_v12, %v916_v13  ;;  %v676_v39 = vcombine.low %v866_v4, %v871_v5  ;;  %s563_s18 = scalar_lea.vmem %s906_s17, %s705_s16  ;;  %s213_s11 = sadd.s32 1, %s811_s11  }
  0x14   : >> { %727 = vmatpush3.bf16.msra.mxu0 %v669_v33  ;;  %739 = vmatpush3.bf16.msra.mxu1 %v674_v34  ;;  %s1041_s15 = scalar_lea.vmem %s926_s25, %s702_s14  ;;  %v672_v45 = vcombine.low %v921_v14, %v931_v15  ;;  %v677_v46 = vcombine.low %v876_v6, %v881_v7  ;;  %vm228_vm1 = vsmask.f32 7424  ;;  %vm265_vm2 = vcmask 523264   ;;  %p210_p4 = scmp.ge.s32.totalorder %s213_s11, 16  }
  0x15   : >> { %728 = vmatprep.subr.bf16.mxu0 %v813_v35  ;;  %740 = vmatprep.subr.bf16.mxu1 %v813_v35  ;;  %v793_v40 = vld [vmem:[%s1041_s15] sm:$0xff]   ;;  %v794_v41 = vld [vmem:[%s1041_s15 + $0x8] ss:$0 sps:$4 sm:$0x11]   ;;  %v683_v51 = vcombine.low %v936_v16, %v941_v17  ;;  %v689_v52 = vcombine.low %v976_v24, %v981_v25  ;;  %v795_v53 = vld [vmem:[%s1041_s15 + $0xc] sm:$0xff]   ;;  %v684_v54 = vcombine.low %v946_v18, %v951_v19  ;;  %vm564_vm3 = vcmask 191488  }
  0x16   : >> { %734 = vmatprep.mubr.msk.bf16.mxu0 %vm814_vm0, %v813_v35  ;;  %746 = vmatprep.mubr.msk.bf16.mxu1 %vm814_vm0, %v813_v35  ;;  %v230_v42 = vshrl.u32 %v793_v40, 16  ;;  %v232_v43 = vshll.u32 %v793_v40, 16  ;;  %v237_v44 = vshll.u32 %v794_v41, 16  ;;  %v690_v55 = vcombine.low %v986_v26, %v991_v27  ;;  %v796_v56 = vld [vmem:[%s1041_s15 + $0x14] ss:$0 sps:$4 sm:$0x11]  }
  0x17   : >> { %v464_v57 = vshll.u32 %v795_v53, 16  ;;  %v685_v58 = vcombine.low %v956_v20, %v961_v21  ;;  %v691_v59 = vcombine.low %v996_v28, %v1001_v29  ;;  %v462_v60 = vshrl.u32 %v795_v53, 16 }
  0x18   : >> { %729 = vmatpush3.bf16.msra.mxu0 %v670_v36  ;;  %741 = vmatpush3.bf16.msra.mxu1 %v675_v37  ;;  %v234_v47 = vrot.slane %v232_v43, 1  ;;  %v239_v48 = vrot.slane %v237_v44, 1  ;;  %v469_v62 = vshll.u32 %v796_v56, 16  ;;  %v686_v63 = vcombine.low %v966_v22, %v971_v23 }
  0x19   : >> { %730 = vmatprep.subr.bf16.mxu0 %v813_v35  ;;  %742 = vmatprep.subr.bf16.mxu1 %v813_v35  ;;  %v466_v61 = vrot.slane %v464_v57, 1  ;;  %v692_v33 = vcombine.low %v1006_v30, %v1011_v31 }
  0x1a   : >> { %v235_v49 = vor.u32 %v234_v47, %v230_v42  ;;  %v471_v36 = vrot.slane %v469_v62, 1 }
  0x1b   : >> { %v467_v34 = vor.u32 %v466_v61, %v462_v60 }
  0x1c   : >> { %731 = vmatpush3.bf16.msra.mxu0 %v671_v38  ;;  %743 = vmatpush3.bf16.msra.mxu1 %v676_v39  ;;  %v240_v50 = vsel %vm228_vm1, %v235_v49, %v239_v48 }
  0x1d   : >> { %732 = vmatprep.subr.bf16.mxu0 %v813_v35  ;;  %744 = vmatprep.subr.bf16.mxu1 %v813_v35  ;;  %v472_v37 = vsel %vm228_vm1, %v467_v34, %v471_v36 }
  0x20   : >> { %733 = vmatpush3.bf16.msra.mxu0 %v672_v45  ;;  %745 = vmatpush3.bf16.msra.mxu1 %v677_v46 }
  0x21   : >> { %750 = vmatprep.subr.bf16.mxu0 %v813_v35  ;;  %762 = vmatprep.subr.bf16.mxu1 %v813_v35 }
  0x23   : >> { %735 = vmatmul.mubr.msk.bf16.vlgmr.msra.gmra.mrb[0].mxu0 %vm265_vm2, %v240_v50  ;;  %747 = vmatmul.mubr.msk.bf16.vlgmr.msra.gmra.mrb[0].mxu1 %vm265_vm2, %v793_v40 }
  0x24   : >> { %751 = vmatpush3.bf16.msra.mxu0 %v683_v51  ;;  %763 = vmatpush3.bf16.msra.mxu1 %v689_v52 }
  0x25   : >> { %752 = vmatprep.subr.bf16.mxu0 %v813_v35  ;;  %764 = vmatprep.subr.bf16.mxu1 %v813_v35 }
  0x26   : >> { %758 = vmatprep.mubr.msk.bf16.mxu0 %vm814_vm0, %v813_v35  ;;  %770 = vmatprep.mubr.msk.bf16.mxu1 %vm814_vm0, %v813_v35 }
  0x28   : >> { %753 = vmatpush3.bf16.msra.mxu0 %v684_v54  ;;  %765 = vmatpush3.bf16.msra.mxu1 %v690_v55 }
  0x29   : >> { %754 = vmatprep.subr.bf16.mxu0 %v813_v35  ;;  %766 = vmatprep.subr.bf16.mxu1 %v813_v35 }
  0x2c   : >> { %755 = vmatpush3.bf16.msra.mxu0 %v685_v58  ;;  %767 = vmatpush3.bf16.msra.mxu1 %v691_v59 }
  0x2d   : >> { %756 = vmatprep.subr.bf16.mxu0 %v813_v35  ;;  %768 = vmatprep.subr.bf16.mxu1 %v813_v35 }
  0x30   : >> { %757 = vmatpush3.bf16.msra.mxu0 %v686_v63  ;;  %769 = vmatpush3.bf16.msra.mxu1 %v692_v33 }
  0x33   : >> { %759 = vmatmul.mubr.msk.bf16.vlgmr.msra.gmra.mrb[4].mxu0 %vm265_vm2, %v795_v53  ;;  %771 = vmatmul.mubr.msk.bf16.vlgmr.msra.gmra.mrb[4].mxu1 %vm265_vm2, %v472_v37 }
  0xf6   : >> { %v303_v38 = vpop.f32.mrb[0].mxu0  ;;  %v370_v39 = vpop.f32.mrb[0].mxu1 }
  0xf7   : >> { %v371_v40 = vadd.f32 %v370_v39, %v303_v38  ;;  %v736_v41 = vpop.f32.mrb[1].mxu0  ;;  %v748_v42 = vpop.f32.mrb[1].mxu1 }
  0xf8   : >> { %v306_v43 = vpop.f32.mrb[2].mxu0  ;;  %v373_v44 = vpop.f32.mrb[2].mxu1 }
  0xf9   : >> { %v374_v45 = vadd.f32 %v373_v44, %v306_v43  ;;  %v737_v46 = vpop.f32.mrb[3].mxu0  ;;  %v749_v47 = vpop.f32.mrb[3].mxu1 }
 0x106   : >> { %v450_v35 = vpop.f32.mrb[4].mxu0  ;;  %v534_v48 = vpop.f32.mrb[4].mxu1 }
 0x107   : >> { %v457_v49 = vadd.f32 %v450_v35, %v371_v40  ;;  %v760_v50 = vpop.f32.mrb[5].mxu0  ;;  %v772_v51 = vpop.f32.mrb[5].mxu1 }
 0x108   : >> { %v453_v52 = vpop.f32.mrb[6].mxu0  ;;  %v537_v53 = vpop.f32.mrb[6].mxu1 }
 0x109   : >> { %v541_v54 = vadd.f32 %v534_v48, %v457_v49  ;;  %v458_v55 = vadd.f32 %v453_v52, %v374_v45  ;;  %v761_v56 = vpop.f32.mrb[7].mxu0  ;;  %v773_v57 = vpop.f32.mrb[7].mxu1 }
 0x10b   : >> { %v549_v58 = vadd.f32 %v1016_v32, %v541_v54  ;;  %v542_v59 = vadd.f32 %v537_v53, %v458_v55 }
 0x10d   : >> { %v551_v60 = vmax.f32 %v549_v58, 0.0  ;;  %v550_v61 = vadd.f32 %v1016_v32, %v542_v59  ;;  %212 = sbr.rel (!%p210_p4) target bundleno = 18 (0x12), region = 75 }
 0x10f   : >> { %v703_v62 = vpack.c.bf16 %v551_v60, %v551_v60  ;;  %v552_v63 = vmax.f32 %v550_v61, 0.0 }
 0x111   : >> { %565 = vst.msk [vmem:[%s563_s18] sm:$0xf] %vm564_vm3, %v703_v62  ;;  %v704_v33 = vpack.c.bf16 %v552_v63, %v552_v63 }
 0x113   : >> { %566 = vst.msk [vmem:[%s563_s18 + $0x4] sm:$0xf] %vm564_vm3, %v704_v33 }
 0x114 PF: > { %s13_s12 = sadd.s32 1, %s807_s12  }
 0x115   : > { %p10_p5 = scmp.ge.s32.totalorder %s13_s12, 4  }
 0x117   :  { %12 = sbr.rel (!%p10_p5) target bundleno = 1 (0x1), region = 86 }

// kernel: mobilenet_v3_seg_forward.12
= control target key start
LH: loop header
LB: loop body
LE: loop exit
PB: predicated region body
PF: predicated region fallthrough
CT: control target
= control target key end

     0   :  { %s904_s12 = smov 0   ;;  %s1273_s0 = inlined_call_operand.vmem [shape: bf16[2,9,9,96], index: 0, kind: input, shape index: {}]   ;;  %s1274_s1 = inlined_call_operand.vmem [shape: bf16[4,96,40], index: 1, kind: input, shape index: {}]   ;;  %s1275_s2 = inlined_call_operand.vmem [shape: f32[1,40], index: 2, kind: input, shape index: {}]   ;;  %s1276_s3 = inlined_call_operand.vmem [shape: bf16[2,8,8,40], index: 3, kind: output, shape index: {}]  }
   0x1 LB: > { %s668_s13 = sadd.s32 4294967295, %s876_s12   ;;  %p672_p0 = scmp.ge.s32.totalorder %s876_s12, 1  ;;  %s876_s12 = sphi %s904_s12, %s13_s12  }
   0x2   : > { %p137_p1 = scmp.lt.s32.totalorder %s876_s12, 3 }
   0x4   : > { %p138_p2 = pnand %p672_p0, %p137_p1 }
   0x5   : > { %p161_p3 = scmp.lt.s32.totalorder (!%p138_p2), %s668_s13, 1  ;;  %v915_v0 = vld [vmem:[%s1274_s1] sm:$0xf] (!%p138_p2)  ;;  %v920_v1 = vld [vmem:[%s1274_s1 + $0x4] sm:$0xf] (!%p138_p2)  ;;  %s1167_s21 = smov (!%p138_p2), 0  }
   0x6   : > { %141 = sbr.rel (%p138_p2) target bundleno = 304 (0x130), region = 32  ;;  %1277 = vst [vmem:[#allocation2_spill] sm:$0xff] (!%p138_p2), %v915_v0  ;;  %1278 = vst [vmem:[#allocation3_spill] sm:$0xff] (!%p138_p2), %v920_v1  ;;  %v925_v2 = vld [vmem:[%s1274_s1 + $0x8] sm:$0xf] (!%p138_p2) }
   0x7   : > { %1279 = vst [vmem:[#allocation4_spill] sm:$0xff] (!%p138_p2), %v925_v2  ;;  %v930_v3 = vld [vmem:[%s1274_s1 + $0xc] sm:$0xf] (!%p138_p2)  ;;  %v935_v4 = vld [vmem:[%s1274_s1 + $0x10] sm:$0xf] (!%p138_p2) }
   0x8   : > { %1280 = vst [vmem:[#allocation5_spill] sm:$0xff] (!%p138_p2), %v930_v3  ;;  %v940_v5 = vld [vmem:[%s1274_s1 + $0x14] sm:$0xf] (!%p138_p2)  ;;  %v945_v6 = vld [vmem:[%s1274_s1 + $0x18] sm:$0xf] (!%p138_p2) }
   0x9   : > { %v950_v7 = vld [vmem:[%s1274_s1 + $0x1c] sm:$0xf] (!%p138_p2)  ;;  %v955_v8 = vld [vmem:[%s1274_s1 + $0x20] sm:$0xf] (!%p138_p2)  ;;  %v960_v9 = vld [vmem:[%s1274_s1 + $0x24] sm:$0xf] (!%p138_p2) }
   0xa   : > { %v965_v10 = vld [vmem:[%s1274_s1 + $0x28] sm:$0xf] (!%p138_p2)  ;;  %v970_v11 = vld [vmem:[%s1274_s1 + $0x2c] sm:$0xf] (!%p138_p2)  ;;  %v980_v12 = vld [vmem:[%s1274_s1 + $0x30] sm:$0xf] (!%p138_p2) }
   0xb   : > { %v985_v13 = vld [vmem:[%s1274_s1 + $0x34] sm:$0xf] (!%p138_p2)  ;;  %v990_v14 = vld [vmem:[%s1274_s1 + $0x38] sm:$0xf] (!%p138_p2)  ;;  %v1000_v15 = vld [vmem:[%s1274_s1 + $0x3c] sm:$0xf] (!%p138_p2) }
   0xc   : > { %v1005_v16 = vld [vmem:[%s1274_s1 + $0x40] sm:$0xf] (!%p138_p2)  ;;  %v1010_v17 = vld [vmem:[%s1274_s1 + $0x44] sm:$0xf] (!%p138_p2)  ;;  %v1015_v18 = vld [vmem:[%s1274_s1 + $0x48] sm:$0xf] (!%p138_p2) }
   0xd   : > { %s1286_s13 = smov (!%p161_p3, %s668_s13), 1  ;;  %v1020_v19 = vld [vmem:[%s1274_s1 + $0x4c] sm:$0xf]  ;;  %v1025_v20 = vld [vmem:[%s1274_s1 + $0x50] sm:$0xf] }
   0xe   : > { %s845_s7 = smul.u32 72, %s1286_s13  ;;  %s751_s8 = sshll.u32 %s1286_s13, 5  ;;  %v1030_v21 = vld [vmem:[%s1274_s1 + $0x54] sm:$0xf]  ;;  %v1035_v22 = vld [vmem:[%s1274_s1 + $0x58] sm:$0xf] }
   0xf   : > { %s975_s17 = scalar_lea.vmem %s1276_s3, %s751_s8  ;;  %v1040_v23 = vld [vmem:[%s1274_s1 + $0x5c] sm:$0xf]  ;;  %v1045_v24 = vld [vmem:[%s1274_s1 + $0x60] sm:$0xf]  ;;  %v1050_v25 = vld [vmem:[%s1274_s1 + $0x64] sm:$0xf] }
  0x10   : > { %s995_s25 = scalar_lea.vmem %s1273_s0, %s845_s7  ;;  %v1055_v26 = vld [vmem:[%s1274_s1 + $0x68] sm:$0xf]  ;;  %v1060_v27 = vld [vmem:[%s1274_s1 + $0x6c] sm:$0xf]  ;;  %v1065_v28 = vld [vmem:[%s1274_s1 + $0x70] sm:$0xf] }
  0x11   : > { %v1070_v29 = vld [vmem:[%s1274_s1 + $0x74] sm:$0xf]  ;;  %v1075_v30 = vld [vmem:[%s1274_s1 + $0x78] sm:$0xf]  ;;  %v1080_v31 = vld [vmem:[%s1274_s1 + $0x7c] sm:$0xf] }
  0x12   : > { %v1085_v32 = vld [vmem:[%s1274_s1 + $0x80] sm:$0xf]  ;;  %v1090_v33 = vld [vmem:[%s1274_s1 + $0x84] sm:$0xf]  ;;  %v1095_v34 = vld [vmem:[%s1274_s1 + $0x88] sm:$0xf] }
  0x13   : > { %v1100_v35 = vld [vmem:[%s1274_s1 + $0x8c] sm:$0xf]  ;;  %v1105_v36 = vld [vmem:[%s1274_s1 + $0x90] sm:$0xf]  ;;  %v1110_v37 = vld [vmem:[%s1274_s1 + $0x94] sm:$0xf] }
  0x14   : > { %v1115_v38 = vld [vmem:[%s1274_s1 + $0x98] sm:$0xf]  ;;  %v1120_v39 = vld [vmem:[%s1274_s1 + $0x9c] sm:$0xf]  ;;  %v1125_v40 = vld [vmem:[%s1274_s1 + $0xa0] sm:$0xf] }
  0x15   : > { %v1130_v41 = vld [vmem:[%s1274_s1 + $0xa4] sm:$0xf]  ;;  %v1135_v42 = vld [vmem:[%s1274_s1 + $0xa8] sm:$0xf]  ;;  %v1140_v43 = vld [vmem:[%s1274_s1 + $0xac] sm:$0xf] }
  0x16   : > { %v1145_v44 = vld [vmem:[%s1274_s1 + $0xb0] sm:$0xf]  ;;  %v1150_v45 = vld [vmem:[%s1274_s1 + $0xb4] sm:$0xf]  ;;  %v1155_v46 = vld [vmem:[%s1274_s1 + $0xb8] sm:$0xf] }
  0x17   : > { %v1160_v47 = vld [vmem:[%s1274_s1 + $0xbc] sm:$0xf]  ;;  %v1165_v48 = vld [vmem:[%s1275_s2] ss:$0 sm:$0xff] }
  0x18 LB: >> { %v715_v49 = vcombine.low %v980_v12, %v985_v13  ;;  %v1281_v1 = vld [vmem:[#allocation3_spill] sm:$0xff]  ;;  %v1282_v0 = vld [vmem:[#allocation2_spill] sm:$0xff]  ;;  %v882_v51 = vmov 0.0   ;;  %v716_v52 = vcombine.low %v990_v14, %v1000_v15  ;;  %v1283_v3 = vld [vmem:[#allocation5_spill] sm:$0xff]  ;;  %s752_s22 = sshll.u32 %s880_s21, 3  ;;  %vm883_vm0 = vmmov 0   ;;  %s880_s21 = sphi %s1167_s21, %s229_s21  }
  0x19   : >> { %v722_v50 = vcombine.low %v1282_v0, %v1281_v1  ;;  %781 = vmatprep.subr.bf16.mxu0 %v882_v51  ;;  %797 = vmatprep.subr.bf16.mxu1 %v882_v51  ;;  %v1284_v2 = vld [vmem:[#allocation4_spill] sm:$0xff]  ;;  %s1186_s23 = scalar_lea.vmem %s995_s25, %s752_s22  ;;  %v717_v54 = vcombine.low %v1005_v16, %v1010_v17  ;;  %v724_v55 = vcombine.low %v935_v4, %v940_v5  ;;  %vm283_vm1 = vcmask 785408   ;;  %s748_s24 = sshll.u32 %s880_s21, 2 }
  0x1a   : >> { %782 = vmatpush3.bf16.msra.mxu0 %v715_v49  ;;  %v723_v53 = vcombine.low %v1284_v2, %v1283_v3  ;;  %793 = vmatprep.mubr.msk.bf16.mxu0 %vm883_vm0, %v882_v51  ;;  %v233_v56 = vld [vmem:[%s1186_s23] sm:$0xf]  ;;  %v234_v57 = vld [vmem:[%s1186_s23 + $0x4] sm:$0x1]  ;;  %v718_v59 = vcombine.low %v1015_v18, %v1020_v19  ;;  %v725_v60 = vcombine.low %v945_v6, %v950_v7  ;;  %s598_s26 = scalar_lea.vmem %s975_s17, %s748_s24  ;;  %vm599_vm2 = vcmask 322560   ;;  %s229_s21 = sadd.s32 1, %s880_s21  }
  0x1b   : >> { %798 = vmatpush3.bf16.msra.mxu1 %v722_v50  ;;  %783 = vmatprep.subr.bf16.mxu0 %v882_v51  ;;  %v714_v58 = vcombine.low %v233_v56, %v234_v57  ;;  %v719_v62 = vcombine.low %v1025_v20, %v1030_v21  ;;  %v726_v63 = vcombine.low %v955_v8, %v960_v9  ;;  %p226_p4 = scmp.ge.s32.totalorder %s229_s21, 8  }
  0x1c   : >> { %799 = vmatprep.subr.bf16.mxu1 %v882_v51  ;;  %809 = vmatprep.mubr.msk.bf16.mxu1 %vm883_vm0, %v882_v51  ;;  %v740_v57 = vcombine.low %v1105_v36, %v1110_v37 }
  0x1d   : >> { %v243_v61 = vshll.u32 %v714_v58, 16  ;;  %v241_v49 = vshrl.u32 %v714_v58, 16  ;;  %v733_v58 = vcombine.low %v1055_v26, %v1060_v27 }
  0x1e   : >> { %784 = vmatpush3.bf16.msra.mxu0 %v716_v52  ;;  %v720_v52 = vcombine.low %v1035_v22, %v1040_v23 }
  0x1f   : >> { %800 = vmatpush3.bf16.msra.mxu1 %v723_v53  ;;  %785 = vmatprep.subr.bf16.mxu0 %v882_v51  ;;  %v245_v50 = vrot.slane %v243_v61, 1  ;;  %v727_v53 = vcombine.low %v965_v10, %v970_v11  ;;  %v730_v61 = vld [vmem:[%s1186_s23 + $0x8] sm:$0xf] }
  0x20   : >> { %801 = vmatprep.subr.bf16.mxu1 %v882_v51 }
  0x22   : >> { %786 = vmatpush3.bf16.msra.mxu0 %v717_v54  ;;  %v246_v54 = vor.u32 %v245_v50, %v241_v49  ;;  %v735_v49 = vcombine.low %v1075_v30, %v1080_v31  ;;  %v743_v50 = vcombine.low %v1135_v42, %v1140_v43 }
  0x23   : >> { %802 = vmatpush3.bf16.msra.mxu1 %v724_v55  ;;  %787 = vmatprep.subr.bf16.mxu0 %v882_v51  ;;  %v732_v55 = vcombine.low %v1045_v24, %v1050_v25 }
  0x24   : >> { %803 = vmatprep.subr.bf16.mxu1 %v882_v51 }
  0x26   : >> { %788 = vmatpush3.bf16.msra.mxu0 %v718_v59  ;;  %v741_v59 = vcombine.low %v1115_v38, %v1120_v39 }
  0x27   : >> { %804 = vmatpush3.bf16.msra.mxu1 %v725_v60  ;;  %789 = vmatprep.subr.bf16.mxu0 %v882_v51  ;;  %v742_v60 = vcombine.low %v1125_v40, %v1130_v41 }
  0x28   : >> { %805 = vmatprep.subr.bf16.mxu1 %v882_v51 }
  0x2a   : >> { %790 = vmatpush3.bf16.msra.mxu0 %v719_v62  ;;  %v731_v62 = vld [vmem:[%s1186_s23 + $0xc] sm:$0x1] }
  0x2b   : >> { %806 = vmatpush3.bf16.msra.mxu1 %v726_v63  ;;  %791 = vmatprep.subr.bf16.mxu0 %v882_v51  ;;  %v739_v63 = vcombine.low %v730_v61, %v731_v62 }
  0x2c   : >> { %807 = vmatprep.subr.bf16.mxu1 %v882_v51 }
  0x2e   : >> { %792 = vmatpush3.bf16.msra.mxu0 %v720_v52  ;;  %v500_v52 = vshll.u32 %v739_v63, 16 }
  0x2f   : >> { %808 = vmatpush3.bf16.msra.mxu1 %v727_v53  ;;  %813 = vmatprep.subr.bf16.mxu0 %v882_v51  ;;  %v736_v53 = vcombine.low %v1085_v32, %v1090_v33 }
  0x30   : >> { %829 = vmatprep.subr.bf16.mxu1 %v882_v51 }
  0x31   : >> { %794 = vmatmul.mubr.msk.bf16.vlgmr.msra.gmra.mrb[0].mxu0 %vm283_vm1, %v246_v54  ;;  %v744_v54 = vcombine.low %v1145_v44, %v1150_v45 }
  0x32   : >> { %810 = vmatmul.mubr.msk.bf16.vlgmr.msra.gmra.mrb[0].mxu1 %vm283_vm1, %v233_v56  ;;  %814 = vmatpush3.bf16.msra.mxu0 %v732_v55  ;;  %v734_v56 = vcombine.low %v1065_v28, %v1070_v29  ;;  %v498_v55 = vshrl.u32 %v739_v63, 16 }
  0x33   : >> { %830 = vmatpush3.bf16.msra.mxu1 %v740_v57  ;;  %815 = vmatprep.subr.bf16.mxu0 %v882_v51  ;;  %v502_v57 = vrot.slane %v500_v52, 1 }
  0x34   : >> { %831 = vmatprep.subr.bf16.mxu1 %v882_v51  ;;  %825 = vmatprep.mubr.msk.bf16.mxu0 %vm883_vm0, %v882_v51 }
  0x35   : >> { %841 = vmatprep.mubr.msk.bf16.mxu1 %vm883_vm0, %v882_v51 }
  0x36   : >> { %816 = vmatpush3.bf16.msra.mxu0 %v733_v58  ;;  %v737_v58 = vcombine.low %v1095_v34, %v1100_v35 }
  0x37   : >> { %832 = vmatpush3.bf16.msra.mxu1 %v741_v59  ;;  %817 = vmatprep.subr.bf16.mxu0 %v882_v51  ;;  %v745_v59 = vcombine.low %v1155_v46, %v1160_v47 }
  0x38   : >> { %833 = vmatprep.subr.bf16.mxu1 %v882_v51 }
  0x3a   : >> { %818 = vmatpush3.bf16.msra.mxu0 %v734_v56  ;;  %v503_v56 = vor.u32 %v502_v57, %v498_v55 }
  0x3b   : >> { %834 = vmatpush3.bf16.msra.mxu1 %v742_v60  ;;  %819 = vmatprep.subr.bf16.mxu0 %v882_v51 }
  0x3c   : >> { %835 = vmatprep.subr.bf16.mxu1 %v882_v51 }
  0x3e   : >> { %820 = vmatpush3.bf16.msra.mxu0 %v735_v49 }
  0x3f   : >> { %836 = vmatpush3.bf16.msra.mxu1 %v743_v50  ;;  %821 = vmatprep.subr.bf16.mxu0 %v882_v51 }
  0x40   : >> { %837 = vmatprep.subr.bf16.mxu1 %v882_v51 }
  0x42   : >> { %822 = vmatpush3.bf16.msra.mxu0 %v736_v53 }
  0x43   : >> { %838 = vmatpush3.bf16.msra.mxu1 %v744_v54  ;;  %823 = vmatprep.subr.bf16.mxu0 %v882_v51 }
  0x44   : >> { %839 = vmatprep.subr.bf16.mxu1 %v882_v51 }
  0x46   : >> { %824 = vmatpush3.bf16.msra.mxu0 %v737_v58 }
  0x47   : >> { %840 = vmatpush3.bf16.msra.mxu1 %v745_v59 }
  0x49   : >> { %826 = vmatmul.mubr.msk.bf16.vlgmr.msra.gmra.mrb[4].mxu0 %vm283_vm1, %v730_v61 }
  0x4a   : >> { %842 = vmatmul.mubr.msk.bf16.vlgmr.msra.gmra.mrb[4].mxu1 %vm283_vm1, %v503_v56 }
 0x104   : >> { %v321_v60 = vpop.f32.mrb[0].mxu0 }
 0x105   : >> { %v400_v62 = vpop.f32.mrb[0].mxu1  ;;  %v795_v49 = vpop.f32.mrb[1].mxu0 }
 0x106   : >> { %v401_v63 = vadd.f32 %v400_v62, %v321_v60  ;;  %v811_v50 = vpop.f32.mrb[1].mxu1  ;;  %v324_v52 = vpop.f32.mrb[2].mxu0 }
 0x107   : >> { %v403_v53 = vpop.f32.mrb[2].mxu1  ;;  %v796_v54 = vpop.f32.mrb[3].mxu0 }
 0x108   : >> { %v812_v0 = vpop.f32.mrb[3].mxu1 }
 0x11c   : >> { %v485_v1 = vpop.f32.mrb[4].mxu0 }
 0x11d   : >> { %v577_v2 = vpop.f32.mrb[4].mxu1  ;;  %v491_v51 = vadd.f32 %v485_v1, %v401_v63  ;;  %v827_v55 = vpop.f32.mrb[5].mxu0 }
 0x11e   : >> { %v843_v57 = vpop.f32.mrb[5].mxu1  ;;  %v488_v58 = vpop.f32.mrb[6].mxu0 }
 0x11f   : >> { %v580_v61 = vpop.f32.mrb[6].mxu1  ;;  %v583_v59 = vadd.f32 %v577_v2, %v491_v51  ;;  %v828_v56 = vpop.f32.mrb[7].mxu0 }
 0x120   : >> { %v844_v3 = vpop.f32.mrb[7].mxu1 }
 0x121   : >> { %v590_v60 = vadd.f32 %v1165_v48, %v583_v59 }
 0x123   : >> { %v591_v62 = vadd.f32 3.0, %v590_v60 }
 0x125   : >> { %v592_v49 = vmax.f32 %v591_v62, 0.0 }
 0x127   : >> { %v593_v50 = vmin.f32 %v592_v49, 6.0 }
 0x129   : >> { %v594_v52 = vmul.f32 %v593_v50, %v590_v60  ;;  %228 = sbr.rel (!%p226_p4) target bundleno = 24 (0x18), region = 75 }
 0x12b   : >> { %v595_v0 = vmul.f32 0.16666667, %v594_v52 }
 0x12d   : >> { %v596_v53 = vpack.c.bf16 %v595_v0, %v595_v0 }
 0x12f   : >> { %600 = vst.msk [vmem:[%s598_s26] sm:$0xf] %vm599_vm2, %v596_v53 }
 0x130 PF: > { %s13_s12 = sadd.s32 1, %s876_s12  }
 0x131   : > { %p10_p5 = scmp.ge.s32.totalorder %s13_s12, 4  }
 0x133   :  { %12 = sbr.rel (!%p10_p5) target bundleno = 1 (0x1), region = 86 }

// kernel: mobilenet_v3_seg_forward.13
= control target key start
LH: loop header
LB: loop body
LE: loop exit
PB: predicated region body
PF: predicated region fallthrough
CT: control target
= control target key end

     0   :  { %s1227_s12 = smov 0   ;;  %s1841_s0 = inlined_call_operand.vmem [shape: bf16[2,5,5,160], index: 0, kind: input, shape index: {}]   ;;  %s1842_s1 = inlined_call_operand.vmem [shape: bf16[4,160,160], index: 1, kind: input, shape index: {}]   ;;  %s1843_s2 = inlined_call_operand.vmem [shape: f32[1,160], index: 2, kind: input, shape index: {}]   ;;  %s1844_s3 = inlined_call_operand.vmem [shape: bf16[2,4,4,160], index: 3, kind: output, shape index: {}]  }
   0x1 LB: > { %s1001_s13 = sadd.s32 4294967295, %s1200_s12   ;;  %p1005_p0 = scmp.ge.s32.totalorder %s1200_s12, 1  ;;  %s1200_s12 = sphi %s1227_s12, %s13_s12  }
   0x2   : > { %p137_p1 = scmp.lt.s32.totalorder %s1200_s12, 3 }
   0x4   : > { %p138_p2 = pnand %p1005_p0, %p137_p1 }
   0x5   : > { %p161_p3 = scmp.lt.s32.totalorder (!%p138_p2), %s1001_s13, 1  ;;  %v1238_v0 = vld [vmem:[%s1842_s1] sm:$0xff] (!%p138_p2)  ;;  %v1243_v1 = vld [vmem:[%s1842_s1 + $0x8] sm:$0xff] (!%p138_p2)  ;;  %v1248_v2 = vld [vmem:[%s1842_s1 + $0x10] sm:$0xff] (!%p138_p2) }
   0x6   : > { %141 = sbr.rel (%p138_p2) target bundleno = 366 (0x16e), region = 32  ;;  %1911 = vst [vmem:[#allocation2_spill] sm:$0xff] (!%p138_p2), %v1238_v0  ;;  %1912 = vst [vmem:[#allocation3_spill] sm:$0xff] (!%p138_p2), %v1243_v1  ;;  %v1253_v3 = vld [vmem:[%s1842_s1 + $0x18] sm:$0xff] (!%p138_p2)  ;;  %v1258_v4 = vld [vmem:[%s1842_s1 + $0x20] sm:$0xff] (!%p138_p2) }
   0x7   : > { %1913 = vst [vmem:[#allocation4_spill] sm:$0xff] (!%p138_p2), %v1248_v2  ;;  %1914 = vst [vmem:[#allocation5_spill] sm:$0xff] (!%p138_p2), %v1253_v3  ;;  %v1263_v5 = vld [vmem:[%s1842_s1 + $0x28] sm:$0xff] (!%p138_p2)  ;;  %v1268_v6 = vld [vmem:[%s1842_s1 + $0x30] sm:$0xff] (!%p138_p2) }
   0x8   : > { %1915 = vst [vmem:[#allocation6_spill] sm:$0xff] (!%p138_p2), %v1258_v4  ;;  %1916 = vst [vmem:[#allocation7_spill] sm:$0xff] (!%p138_p2), %v1263_v5  ;;  %v1273_v7 = vld [vmem:[%s1842_s1 + $0x38] sm:$0xff] (!%p138_p2)  ;;  %v1278_v8 = vld [vmem:[%s1842_s1 + $0x40] sm:$0xff] (!%p138_p2) }
   0x9   : > { %1917 = vst [vmem:[#allocation8_spill] sm:$0xff] (!%p138_p2), %v1268_v6  ;;  %1918 = vst [vmem:[#allocation9_spill] sm:$0xff] (!%p138_p2), %v1273_v7  ;;  %v1283_v9 = vld [vmem:[%s1842_s1 + $0x48] sm:$0xff] (!%p138_p2)  ;;  %v1288_v10 = vld [vmem:[%s1842_s1 + $0x50] sm:$0xff] (!%p138_p2) }
   0xa   : > { %1919 = vst [vmem:[#allocation10_spill] sm:$0xff] (!%p138_p2), %v1278_v8  ;;  %1920 = vst [vmem:[#allocation11_spill] sm:$0xff] (!%p138_p2), %v1283_v9  ;;  %v1293_v11 = vld [vmem:[%s1842_s1 + $0x58] sm:$0xff] (!%p138_p2)  ;;  %v1298_v12 = vld [vmem:[%s1842_s1 + $0x60] sm:$0xff] (!%p138_p2) }
   0xb   : > { %1921 = vst [vmem:[#allocation12_spill] sm:$0xff] (!%p138_p2), %v1288_v10  ;;  %1922 = vst [vmem:[#allocation13_spill] sm:$0xff] (!%p138_p2), %v1293_v11  ;;  %v1303_v13 = vld [vmem:[%s1842_s1 + $0x68] sm:$0xff] (!%p138_p2)  ;;  %v1308_v14 = vld [vmem:[%s1842_s1 + $0x70] sm:$0xff] (!%p138_p2) }
   0xc   : > { %1923 = vst [vmem:[#allocation14_spill] sm:$0xff] (!%p138_p2), %v1298_v12  ;;  %1924 = vst [vmem:[#allocation15_spill] sm:$0xff] (!%p138_p2), %v1303_v13  ;;  %v1318_v15 = vld [vmem:[%s1842_s1 + $0x78] sm:$0xff] (!%p138_p2)  ;;  %v1323_v16 = vld [vmem:[%s1842_s1 + $0x80] sm:$0xff] (!%p138_p2) }
   0xd   : > { %s2008_s13 = smov (!%p161_p3, %s1001_s13), 1  ;;  %1925 = vst [vmem:[#allocation16_spill] sm:$0xff] %v1308_v14  ;;  %1926 = vst [vmem:[#allocation17_spill] sm:$0xff] %v1318_v15  ;;  %v1328_v17 = vld [vmem:[%s1842_s1 + $0x88] sm:$0xff]  ;;  %v1338_v18 = vld [vmem:[%s1842_s1 + $0x90] sm:$0xff] }
   0xe   : > { %s1168_s11 = smul.u32 40, %s2008_s13  ;;  %s1165_s14 = sshll.u32 %s2008_s13, 4  ;;  %1927 = vst [vmem:[#allocation18_spill] sm:$0xff] %v1323_v16  ;;  %1928 = vst [vmem:[#allocation19_spill] sm:$0xff] %v1328_v17  ;;  %v1343_v19 = vld [vmem:[%s1842_s1 + $0x98] sm:$0xff]  ;;  %v1348_v20 = vld [vmem:[%s1842_s1 + $0xa0] sm:$0xff] }
   0xf   : > { %s1313_s23 = scalar_lea.vmem %s1844_s3, %s1165_s14  ;;  %1929 = vst [vmem:[#allocation20_spill] sm:$0xff] %v1338_v18  ;;  %1930 = vst [vmem:[#allocation21_spill] sm:$0xff] %v1343_v19  ;;  %v1353_v21 = vld [vmem:[%s1842_s1 + $0xa8] sm:$0xff]  ;;  %v1358_v22 = vld [vmem:[%s1842_s1 + $0xb0] sm:$0xff]  ;;  %s1650_s14 = smov 0  }
  0x10   : > { %s1333_s4 = scalar_lea.vmem %s1841_s0, %s1168_s11  ;;  %1931 = vst [vmem:[#allocation22_spill] sm:$0xff] %v1348_v20  ;;  %1932 = vst [vmem:[#allocation23_spill] sm:$0xff] %v1353_v21  ;;  %v1363_v23 = vld [vmem:[%s1842_s1 + $0xb8] sm:$0xff]  ;;  %v1368_v24 = vld [vmem:[%s1842_s1 + $0xc0] sm:$0xff] }
  0x11   : > { %1933 = vst [vmem:[#allocation24_spill] sm:$0xff] %v1358_v22  ;;  %1934 = vst [vmem:[#allocation25_spill] sm:$0xff] %v1363_v23  ;;  %v1373_v25 = vld [vmem:[%s1842_s1 + $0xc8] sm:$0xff]  ;;  %v1378_v26 = vld [vmem:[%s1842_s1 + $0xd0] sm:$0xff] }
  0x12   : > { %v1383_v27 = vld [vmem:[%s1842_s1 + $0xd8] sm:$0xff]  ;;  %v1388_v28 = vld [vmem:[%s1842_s1 + $0xe0] sm:$0xff]  ;;  %v1393_v29 = vld [vmem:[%s1842_s1 + $0xe8] sm:$0xff] }
  0x13   : > { %v1398_v30 = vld [vmem:[%s1842_s1 + $0xf0] sm:$0xff]  ;;  %v1403_v31 = vld [vmem:[%s1842_s1 + $0xf8] sm:$0xff]  ;;  %v1408_v32 = vld [vmem:[%s1842_s1 + $0x100] sm:$0xff] }
  0x14   : > { %v1413_v33 = vld [vmem:[%s1842_s1 + $0x108] sm:$0xff]  ;;  %v1418_v34 = vld [vmem:[%s1842_s1 + $0x110] sm:$0xff]  ;;  %v1423_v35 = vld [vmem:[%s1842_s1 + $0x118] sm:$0xff] }
  0x15   : > { %v1428_v36 = vld [vmem:[%s1842_s1 + $0x120] sm:$0xff]  ;;  %v1433_v37 = vld [vmem:[%s1842_s1 + $0x128] sm:$0xff]  ;;  %v1438_v38 = vld [vmem:[%s1842_s1 + $0x130] sm:$0xff] }
  0x16   : > { %v1443_v39 = vld [vmem:[%s1842_s1 + $0x138] sm:$0xff]  ;;  %v1448_v40 = vld [vmem:[%s1842_s1 + $0x140] sm:$0xff]  ;;  %v1453_v41 = vld [vmem:[%s1842_s1 + $0x148] sm:$0xff] }
  0x17   : > { %v1458_v42 = vld [vmem:[%s1842_s1 + $0x150] sm:$0xff]  ;;  %v1463_v43 = vld [vmem:[%s1842_s1 + $0x158] sm:$0xff]  ;;  %v1468_v44 = vld [vmem:[%s1842_s1 + $0x160] sm:$0xff] }
  0x18   : > { %v1473_v45 = vld [vmem:[%s1842_s1 + $0x168] sm:$0xff]  ;;  %v1478_v46 = vld [vmem:[%s1842_s1 + $0x170] sm:$0xff]  ;;  %v1483_v47 = vld [vmem:[%s1842_s1 + $0x178] sm:$0xff] }
  0x19   : > { %v1488_v48 = vld [vmem:[%s1842_s1 + $0x180] sm:$0xff]  ;;  %v1493_v49 = vld [vmem:[%s1842_s1 + $0x188] sm:$0xff]  ;;  %v1498_v50 = vld [vmem:[%s1842_s1 + $0x190] sm:$0xff] }
  0x1a   : > { %1935 = vst [vmem:[#allocation26_spill] sm:$0xff] %v1488_v48  ;;  %1936 = vst [vmem:[#allocation27_spill] sm:$0xff] %v1498_v50  ;;  %v1503_v51 = vld [vmem:[%s1842_s1 + $0x198] sm:$0xff]  ;;  %v1508_v52 = vld [vmem:[%s1842_s1 + $0x1a0] sm:$0xff] }
  0x1b   : > { %1937 = vst [vmem:[#allocation28_spill] sm:$0xff] %v1503_v51  ;;  %1938 = vst [vmem:[#allocation29_spill] sm:$0xff] %v1508_v52  ;;  %v1513_v53 = vld [vmem:[%s1842_s1 + $0x1a8] sm:$0xff]  ;;  %v1518_v54 = vld [vmem:[%s1842_s1 + $0x1b0] sm:$0xff] }
  0x1c   : > { %1939 = vst [vmem:[#allocation30_spill] sm:$0xff] %v1513_v53  ;;  %1940 = vst [vmem:[#allocation31_spill] sm:$0xff] %v1518_v54  ;;  %v1523_v55 = vld [vmem:[%s1842_s1 + $0x1b8] sm:$0xff]  ;;  %v1528_v56 = vld [vmem:[%s1842_s1 + $0x1c0] sm:$0xff] }
  0x1d   : > { %1941 = vst [vmem:[#allocation32_spill] sm:$0xff] %v1523_v55  ;;  %1942 = vst [vmem:[#allocation33_spill] sm:$0xff] %v1528_v56  ;;  %v1533_v57 = vld [vmem:[%s1842_s1 + $0x1c8] sm:$0xff]  ;;  %v1538_v58 = vld [vmem:[%s1842_s1 + $0x1d0] sm:$0xff] }
  0x1e   : > { %1943 = vst [vmem:[#allocation34_spill] sm:$0xff] %v1533_v57  ;;  %1944 = vst [vmem:[#allocation35_spill] sm:$0xff] %v1538_v58  ;;  %v1543_v59 = vld [vmem:[%s1842_s1 + $0x1d8] sm:$0xff]  ;;  %v1548_v60 = vld [vmem:[%s1842_s1 + $0x1e0] sm:$0xff] }
  0x1f   : > { %1945 = vst [vmem:[#allocation36_spill] sm:$0xff] %v1543_v59  ;;  %v1553_v61 = vld [vmem:[%s1842_s1 + $0x1e8] sm:$0xff]  ;;  %v1558_v62 = vld [vmem:[%s1842_s1 + $0x1f0] sm:$0xff]  ;;  %v1563_v63 = vld [vmem:[%s1842_s1 + $0x1f8] sm:$0xff] }
  0x20   : > { %v1568_v58 = vld [vmem:[%s1842_s1 + $0x200] sm:$0xff]  ;;  %v1573_v59 = vld [vmem:[%s1842_s1 + $0x208] sm:$0xff]  ;;  %v1578_v56 = vld [vmem:[%s1842_s1 + $0x210] sm:$0xff] }
  0x21   : > { %v1583_v57 = vld [vmem:[%s1842_s1 + $0x218] sm:$0xff]  ;;  %v1588_v54 = vld [vmem:[%s1842_s1 + $0x220] sm:$0xff]  ;;  %v1593_v55 = vld [vmem:[%s1842_s1 + $0x228] sm:$0xff] }
  0x22   : > { %1946 = vst [vmem:[#allocation37_spill] sm:$0xff] %v1588_v54  ;;  %1947 = vst [vmem:[#allocation38_spill] sm:$0xff] %v1593_v55  ;;  %v1598_v52 = vld [vmem:[%s1842_s1 + $0x230] sm:$0xff]  ;;  %v1603_v53 = vld [vmem:[%s1842_s1 + $0x238] sm:$0xff] }
  0x23   : > { %1948 = vst [vmem:[#allocation39_spill] sm:$0xff] %v1598_v52  ;;  %1949 = vst [vmem:[#allocation40_spill] sm:$0xff] %v1603_v53  ;;  %v1608_v50 = vld [vmem:[%s1842_s1 + $0x240] sm:$0xff]  ;;  %v1613_v51 = vld [vmem:[%s1842_s1 + $0x248] sm:$0xff] }
  0x24   : > { %1950 = vst [vmem:[#allocation41_spill] sm:$0xff] %v1608_v50  ;;  %1951 = vst [vmem:[#allocation42_spill] sm:$0xff] %v1613_v51  ;;  %v1618_v54 = vld [vmem:[%s1842_s1 + $0x250] sm:$0xff]  ;;  %v1623_v52 = vld [vmem:[%s1842_s1 + $0x258] sm:$0xff] }
  0x25   : > { %1952 = vst [vmem:[#allocation43_spill] sm:$0xff] %v1618_v54  ;;  %1953 = vst [vmem:[#allocation44_spill] sm:$0xff] %v1623_v52  ;;  %v1628_v53 = vld [vmem:[%s1842_s1 + $0x260] sm:$0xff]  ;;  %v1633_v50 = vld [vmem:[%s1842_s1 + $0x268] sm:$0xff] }
  0x26   : > { %1954 = vst [vmem:[#allocation45_spill] sm:$0xff] %v1628_v53  ;;  %1955 = vst [vmem:[#allocation46_spill] sm:$0xff] %v1633_v50  ;;  %v1638_v51 = vld [vmem:[%s1842_s1 + $0x270] sm:$0xff]  ;;  %v1643_v54 = vld [vmem:[%s1842_s1 + $0x278] sm:$0xff] }
  0x27   : > { %1956 = vst [vmem:[#allocation47_spill] sm:$0xff] %v1638_v51  ;;  %1957 = vst [vmem:[#allocation48_spill] sm:$0xff] %v1643_v54  ;;  %v1648_v52 = vld [vmem:[%s1843_s2] sm:$0x3] }
  0x28   : > { %1958 = vst [vmem:[#allocation49_spill] sm:$0xff] %v1648_v52 }
  0x29 LB: >> { %v1959_v23 = vld [vmem:[#allocation25_spill] sm:$0xff]  ;;  %v1960_v22 = vld [vmem:[#allocation24_spill] sm:$0xff]  ;;  %v1961_v21 = vld [vmem:[#allocation23_spill] sm:$0xff]  ;;  %s1166_s15 = sshll.u32 %s1204_s14, 3  ;;  %vm386_vm0 = vcmask 261120   ;;  %s1167_s16 = sshll.u32 %s1204_s14, 2  ;;  %s1204_s14 = sphi %s1650_s14, %s261_s14  }
  0x2a   : >> { %v1962_v19 = vld [vmem:[#allocation21_spill] sm:$0xff]  ;;  %v1963_v18 = vld [vmem:[#allocation20_spill] sm:$0xff]  ;;  %v1964_v17 = vld [vmem:[#allocation19_spill] sm:$0xff]  ;;  %v1076_v50 = vcombine.high %v1960_v22, %v1959_v23  ;;  %v1075_v48 = vcombine.low %v1960_v22, %v1959_v23  ;;  %s1677_s11 = scalar_lea.vmem %s1333_s4, %s1166_s15  ;;  %v1206_v22 = vmov 1983009808   ;;  %vm930_vm1 = vcmask 1041408   ;;  %s929_s17 = scalar_lea.vmem %s1313_s23, %s1167_s16 }
  0x2b   : >> { %v1965_v16 = vld [vmem:[#allocation18_spill] sm:$0xff]  ;;  %v1966_v15 = vld [vmem:[#allocation17_spill] sm:$0xff]  ;;  %v1967_v14 = vld [vmem:[#allocation16_spill] sm:$0xff]  ;;  %vm931_vm2 = vcmask 257026   ;;  %s261_s14 = sadd.s32 1, %s1204_s14  }
  0x2c   : >> { %v1968_v13 = vld [vmem:[#allocation15_spill] sm:$0xff]  ;;  %v1969_v12 = vld [vmem:[#allocation14_spill] sm:$0xff]  ;;  %v1970_v11 = vld [vmem:[#allocation13_spill] sm:$0xff]  ;;  %p258_p4 = scmp.ge.s32.totalorder %s261_s14, 4  }
  0x2d   : >> { %v1971_v10 = vld [vmem:[#allocation12_spill] sm:$0xff]  ;;  %v1972_v9 = vld [vmem:[#allocation11_spill] sm:$0xff]  ;;  %v1973_v8 = vld [vmem:[#allocation10_spill] sm:$0xff] }
  0x2e   : >> { %v1974_v7 = vld [vmem:[#allocation9_spill] sm:$0xff]  ;;  %v1975_v6 = vld [vmem:[#allocation8_spill] sm:$0xff]  ;;  %v1976_v5 = vld [vmem:[#allocation7_spill] sm:$0xff] }
  0x2f   : >> { %v1977_v4 = vld [vmem:[#allocation6_spill] sm:$0xff]  ;;  %v1978_v3 = vld [vmem:[#allocation5_spill] sm:$0xff]  ;;  %v1979_v2 = vld [vmem:[#allocation4_spill] sm:$0xff] }
  0x30   : >> { %v1980_v1 = vld [vmem:[#allocation3_spill] sm:$0xff]  ;;  %v1981_v0 = vld [vmem:[#allocation2_spill] sm:$0xff]  ;;  %v1097_v55 = vcombine.high %v1979_v2, %v1978_v3  ;;  %vm932_vm3 = vmor %vm931_vm2, %vm930_vm1 }
  0x31   : >> { %v1982_v20 = vld [vmem:[#allocation22_spill] sm:$0xff]  ;;  %v1095_v53 = vcombine.high %v1981_v0, %v1980_v1  ;;  %v1094_v52 = vcombine.low %v1981_v0, %v1980_v1  ;;  %v1078_v0 = vcombine.high %v1368_v24, %v1373_v25  ;;  %v1099_v1 = vcombine.high %v1977_v4, %v1976_v5 }
  0x32   : >> { %v1074_v51 = vcombine.high %v1982_v20, %v1961_v21  ;;  %v1073_v54 = vcombine.low %v1982_v20, %v1961_v21  ;;  %v1096_v20 = vcombine.low %v1979_v2, %v1978_v3 }
  0x33   : >> { %534 = vmatprep.subr.bf16.mxu1 %v1095_v53  ;;  %v1101_v53 = vcombine.high %v1975_v6, %v1974_v7 }
  0x34   : >> { %390 = vmatprep.subr.bf16.mxu0 %v1074_v51  ;;  %535 = vmatpush1.bf16.msra.mxu1 %v1094_v52  ;;  %v1077_v51 = vcombine.low %v1368_v24, %v1373_v25  ;;  %v1098_v52 = vcombine.low %v1977_v4, %v1976_v5  ;;  %v1105_v4 = vcombine.high %v1971_v10, %v1970_v11 }
  0x35   : >> { %391 = vmatpush1.bf16.msra.mxu0 %v1073_v54  ;;  %536 = vmatprep.subr.bf16.mxu1 %v1097_v55  ;;  %v265_v54 = vld [vmem:[%s1677_s11] sm:$0x77] }
  0x36   : >> { %392 = vmatprep.subr.bf16.mxu0 %v1076_v50  ;;  %v1080_v50 = vcombine.high %v1378_v26, %v1383_v27  ;;  %v1072_v55 = vcombine.high %v265_v54, %v265_v54 }
  0x38   : >> { %537 = vmatpush1.bf16.msra.mxu1 %v1096_v20  ;;  %v1079_v20 = vcombine.low %v1378_v26, %v1383_v27  ;;  %v279_v2 = vshrl.u32 %v1072_v55, 16  ;;  %v281_v3 = vshll.u32 %v1072_v55, 16  ;;  %1114 = vmatprep.mubr.msk.bf16.mxu1 %vm386_vm0, %v1072_v55  ;;  %v1107_v55 = vcombine.high %v1969_v12, %v1968_v13 }
  0x39   : >> { %393 = vmatpush1.bf16.msra.mxu0 %v1075_v48  ;;  %538 = vmatprep.subr.bf16.mxu1 %v1099_v1  ;;  %v1100_v48 = vcombine.low %v1975_v6, %v1974_v7  ;;  %v1103_v1 = vcombine.high %v1973_v8, %v1972_v9 }
  0x3a   : >> { %394 = vmatprep.subr.bf16.mxu0 %v1078_v0  ;;  %v1082_v0 = vcombine.high %v1388_v28, %v1393_v29 }
  0x3c   : >> { %539 = vmatpush1.bf16.msra.mxu1 %v1098_v52  ;;  %v1102_v52 = vcombine.low %v1973_v8, %v1972_v9 }
  0x3d   : >> { %395 = vmatpush1.bf16.msra.mxu0 %v1077_v51  ;;  %540 = vmatprep.subr.bf16.mxu1 %v1101_v53  ;;  %v1081_v51 = vcombine.low %v1388_v28, %v1393_v29  ;;  %v1084_v53 = vcombine.high %v1398_v30, %v1403_v31 }
  0x3e   : >> { %396 = vmatprep.subr.bf16.mxu0 %v1080_v50  ;;  %v283_v50 = vrot.slane %v281_v3, 1  ;;  %v1086_v3 = vcombine.high %v1408_v32, %v1413_v33 }
  0x40   : >> { %541 = vmatpush1.bf16.msra.mxu1 %v1100_v48  ;;  %v284_v5 = vor.u32 %v283_v50, %v279_v2  ;;  %v1104_v48 = vcombine.low %v1971_v10, %v1970_v11  ;;  %v1085_v2 = vcombine.low %v1408_v32, %v1413_v33  ;;  %v1108_v50 = vcombine.low %v1967_v14, %v1966_v15 }
  0x41   : >> { %397 = vmatpush1.bf16.msra.mxu0 %v1079_v20  ;;  %542 = vmatprep.subr.bf16.mxu1 %v1103_v1  ;;  %v1083_v20 = vcombine.low %v1398_v30, %v1403_v31  ;;  %v1109_v1 = vcombine.high %v1967_v14, %v1966_v15 }
  0x42   : >> { %398 = vmatprep.subr.bf16.mxu0 %v1082_v0  ;;  %1093 = vmatprep.mubr.msk.bf16.mxu0 %vm386_vm0, %v284_v5  ;;  %v1106_v0 = vcombine.low %v1969_v12, %v1968_v13  ;;  %v1087_v5 = vcombine.low %v1418_v34, %v1423_v35  ;;  %v2000_v12 = vld [vmem:[#allocation46_spill] sm:$0xff]  ;;  %v2001_v13 = vld [vmem:[#allocation45_spill] sm:$0xff] }
  0x43   : >> { %v1157_v14 = vcombine.high %v2001_v13, %v2000_v12 }
  0x44   : >> { %543 = vmatpush1.bf16.msra.mxu1 %v1102_v52  ;;  %v1723_v52 = vld [vmem:[%s1677_s11 + $0x8] sm:$0x77] }
  0x45   : >> { %399 = vmatpush1.bf16.msra.mxu0 %v1081_v51  ;;  %544 = vmatprep.subr.bf16.mxu1 %v1105_v4  ;;  %v1088_v4 = vcombine.high %v1418_v34, %v1423_v35  ;;  %v1071_v51 = vcombine.low %v265_v54, %v265_v54  ;;  %v1118_v54 = vcombine.high %v1723_v52, %v1723_v52 }
  0x46   : >> { %400 = vmatprep.subr.bf16.mxu0 %v1084_v53  ;;  %v1090_v53 = vcombine.high %v1428_v36, %v1433_v37  ;;  %v1117_v11 = vcombine.low %v1723_v52, %v1723_v52 }
  0x47   : >> { %v739_v7 = vshrl.u32 %v1118_v54, 16 }
  0x48   : >> { %545 = vmatpush1.bf16.msra.mxu1 %v1104_v48  ;;  %v274_v48 = vshll.u32 %v1071_v51, 16  ;;  %v735_v15 = vshll.u32 %v1117_v11, 16 }
  0x49   : >> { %401 = vmatpush1.bf16.msra.mxu0 %v1083_v20  ;;  %546 = vmatprep.subr.bf16.mxu1 %v1107_v55  ;;  %v1111_v20 = vcombine.high %v1965_v16, %v1964_v17  ;;  %v1110_v55 = vcombine.low %v1965_v16, %v1964_v17 }
  0x4a   : >> { %402 = vmatprep.subr.bf16.mxu0 %v1086_v3  ;;  %v1089_v3 = vcombine.low %v1428_v36, %v1433_v37  ;;  %v276_v6 = vrot.slane %v274_v48, 1  ;;  %v1119_v48 = vcombine.low %v1448_v40, %v1453_v41  ;;  %v737_v16 = vrot.slane %v735_v15, 1 }
  0x4c   : >> { %547 = vmatpush1.bf16.msra.mxu1 %v1106_v0  ;;  %v1113_v0 = vcombine.high %v1963_v18, %v1962_v19 }
  0x4d   : >> { %403 = vmatpush1.bf16.msra.mxu0 %v1085_v2  ;;  %548 = vmatprep.subr.bf16.mxu1 %v1109_v1  ;;  %v1092_v2 = vcombine.high %v1438_v38, %v1443_v39  ;;  %v272_v1 = vshrl.u32 %v1071_v51, 16 }
  0x4e   : >> { %404 = vmatprep.subr.bf16.mxu0 %v1088_v4  ;;  %v741_v4 = vshll.u32 %v1118_v54, 16 }
  0x4f   : >> { %v277_v9 = vor.u32 %v276_v6, %v272_v1  ;;  %v1121_v6 = vcombine.low %v1458_v42, %v1463_v43  ;;  %v1124_v1 = vcombine.high %v1468_v44, %v1473_v45 }
  0x50   : >> { %549 = vmatpush1.bf16.msra.mxu1 %v1108_v50  ;;  %v1112_v50 = vcombine.low %v1963_v18, %v1962_v19  ;;  %v743_v8 = vrot.slane %v741_v4, 1  ;;  %v1142_v4 = vcombine.low %v1558_v62, %v1563_v63 }
  0x51   : >> { %405 = vmatpush1.bf16.msra.mxu0 %v1087_v5  ;;  %550 = vmatprep.subr.bf16.mxu1 %v1111_v20  ;;  %v1091_v5 = vcombine.low %v1438_v38, %v1443_v39  ;;  %v1141_v20 = vcombine.high %v1548_v60, %v1553_v61 }
  0x52   : >> { %406 = vmatprep.subr.bf16.mxu0 %v1090_v53  ;;  %v1120_v53 = vcombine.high %v1448_v40, %v1453_v41 }
  0x54   : >> { %551 = vmatpush1.bf16.msra.mxu1 %v1110_v55  ;;  %v1122_v55 = vcombine.high %v1458_v42, %v1463_v43 }
  0x55   : >> { %407 = vmatpush1.bf16.msra.mxu0 %v1089_v3  ;;  %552 = vmatprep.subr.bf16.mxu1 %v1113_v0  ;;  %v1140_v3 = vcombine.low %v1548_v60, %v1553_v61  ;;  %v744_v0 = vor.u32 %v743_v8, %v739_v7  ;;  %v1123_v7 = vcombine.low %v1468_v44, %v1473_v45 }
  0x56   : >> { %408 = vmatprep.subr.bf16.mxu0 %v1092_v2  ;;  %v1143_v2 = vcombine.high %v1558_v62, %v1563_v63  ;;  %v1144_v8 = vcombine.low %v1568_v58, %v1573_v59 }
  0x58   : >> { %553 = vmatpush1.bf16.msra.mxu1 %v1112_v50  ;;  %v1146_v50 = vcombine.low %v1578_v56, %v1583_v57 }
  0x59   : >> { %409 = vmatpush1.bf16.msra.mxu0 %v1091_v5  ;;  %849 = vmatprep.subr.bf16.mxu1 %v1141_v20  ;;  %v1145_v5 = vcombine.high %v1568_v58, %v1573_v59 }
  0x5a   : >> { %689 = vmatprep.subr.bf16.mxu0 %v1120_v53  ;;  %v1983_v53 = vld [vmem:[#allocation26_spill] sm:$0xff] }
  0x5b   : >> { %567 = vmatmul.mubr.bf16.vlgmr.msra.gmra.mrb[0].mxu1 %v1071_v51  ;;  %v1147_v51 = vcombine.high %v1578_v56, %v1583_v57  ;;  %v1128_v20 = vcombine.high %v1983_v53, %v1493_v49 }
  0x5c   : >> { %423 = vmatmul.mubr.bf16.vlgmr.msra.gmra.mrb[0].mxu0 %v277_v9  ;;  %850 = vmatpush1.bf16.msra.mxu1 %v1140_v3  ;;  %v1126_v9 = vcombine.high %v1478_v46, %v1483_v47  ;;  %v1985_v3 = vld [vmem:[#allocation37_spill] sm:$0xff] }
  0x5d   : >> { %690 = vmatpush1.bf16.msra.mxu0 %v1119_v48  ;;  %851 = vmatprep.subr.bf16.mxu1 %v1143_v2  ;;  %v1984_v48 = vld [vmem:[#allocation38_spill] sm:$0xff]  ;;  %v1127_v2 = vcombine.low %v1983_v53, %v1493_v49 }
  0x5e   : >> { %691 = vmatprep.subr.bf16.mxu0 %v1122_v55  ;;  %1139 = vmatprep.mubr.msk.bf16.mxu0 %vm386_vm0, %v1118_v54  ;;  %v1125_v54 = vcombine.low %v1478_v46, %v1483_v47  ;;  %v1149_v55 = vcombine.high %v1985_v3, %v1984_v48 }
  0x5f   : >> { %1160 = vmatprep.mubr.msk.bf16.mxu1 %vm386_vm0, %v744_v0  ;;  %v1148_v0 = vcombine.low %v1985_v3, %v1984_v48  ;;  %v1993_v3 = vld [vmem:[#allocation41_spill] sm:$0xff] }
  0x60   : >> { %852 = vmatpush1.bf16.msra.mxu1 %v1142_v4  ;;  %v1987_v4 = vld [vmem:[#allocation27_spill] sm:$0xff] }
  0x61   : >> { %692 = vmatpush1.bf16.msra.mxu0 %v1121_v6  ;;  %853 = vmatprep.subr.bf16.mxu1 %v1145_v5  ;;  %v1986_v6 = vld [vmem:[#allocation28_spill] sm:$0xff] }
  0x62   : >> { %693 = vmatprep.subr.bf16.mxu0 %v1124_v1  ;;  %v1130_v1 = vcombine.high %v1987_v4, %v1986_v6  ;;  %v1988_v5 = vld [vmem:[#allocation40_spill] sm:$0xff] }
  0x64   : >> { %854 = vmatpush1.bf16.msra.mxu1 %v1144_v8 }
  0x65   : >> { %694 = vmatpush1.bf16.msra.mxu0 %v1123_v7  ;;  %855 = vmatprep.subr.bf16.mxu1 %v1147_v51  ;;  %v1989_v7 = vld [vmem:[#allocation39_spill] sm:$0xff] }
  0x66   : >> { %695 = vmatprep.subr.bf16.mxu0 %v1126_v9  ;;  %v1151_v8 = vcombine.high %v1989_v7, %v1988_v5  ;;  %v1129_v9 = vcombine.low %v1987_v4, %v1986_v6  ;;  %v1150_v51 = vcombine.low %v1989_v7, %v1988_v5  ;;  %v1994_v4 = vld [vmem:[#allocation32_spill] sm:$0xff]  ;;  %v1995_v5 = vld [vmem:[#allocation31_spill] sm:$0xff] }
  0x67   : >> { %v1997_v6 = vld [vmem:[#allocation43_spill] sm:$0xff] }
  0x68   : >> { %856 = vmatpush1.bf16.msra.mxu1 %v1146_v50  ;;  %v1991_v50 = vld [vmem:[#allocation29_spill] sm:$0xff] }
  0x69   : >> { %696 = vmatpush1.bf16.msra.mxu0 %v1125_v54  ;;  %857 = vmatprep.subr.bf16.mxu1 %v1149_v55  ;;  %v1990_v54 = vld [vmem:[#allocation30_spill] sm:$0xff] }
  0x6a   : >> { %697 = vmatprep.subr.bf16.mxu0 %v1128_v20  ;;  %v1132_v20 = vcombine.high %v1991_v50, %v1990_v54  ;;  %v1992_v55 = vld [vmem:[#allocation42_spill] sm:$0xff] }
  0x6b   : >> { %v1153_v10 = vcombine.high %v1993_v3, %v1992_v55 }
  0x6c   : >> { %858 = vmatpush1.bf16.msra.mxu1 %v1148_v0  ;;  %v1152_v0 = vcombine.low %v1993_v3, %v1992_v55 }
  0x6d   : >> { %698 = vmatpush1.bf16.msra.mxu0 %v1127_v2  ;;  %859 = vmatprep.subr.bf16.mxu1 %v1151_v8  ;;  %v1131_v2 = vcombine.low %v1991_v50, %v1990_v54  ;;  %v1996_v8 = vld [vmem:[#allocation44_spill] sm:$0xff] }
  0x6e   : >> { %699 = vmatprep.subr.bf16.mxu0 %v1130_v1  ;;  %v1134_v1 = vcombine.high %v1995_v5, %v1994_v4  ;;  %v1155_v7 = vcombine.high %v1997_v6, %v1996_v8 }
  0x70   : >> { %860 = vmatpush1.bf16.msra.mxu1 %v1150_v51  ;;  %v1154_v51 = vcombine.low %v1997_v6, %v1996_v8  ;;  %v733_v8 = vshrl.u32 %v1117_v11, 16 }
  0x71   : >> { %700 = vmatpush1.bf16.msra.mxu0 %v1129_v9  ;;  %861 = vmatprep.subr.bf16.mxu1 %v1153_v10  ;;  %v1133_v9 = vcombine.low %v1995_v5, %v1994_v4  ;;  %v1998_v10 = vld [vmem:[#allocation34_spill] sm:$0xff]  ;;  %v2004_v4 = vld [vmem:[#allocation48_spill] sm:$0xff]  ;;  %v2005_v5 = vld [vmem:[#allocation47_spill] sm:$0xff] }
  0x72   : >> { %701 = vmatprep.subr.bf16.mxu0 %v1132_v20  ;;  %v1999_v20 = vld [vmem:[#allocation33_spill] sm:$0xff]  ;;  %v1159_v6 = vcombine.high %v2005_v5, %v2004_v4 }
  0x73   : >> { %v1136_v3 = vcombine.high %v1999_v20, %v1998_v10  ;;  %v1135_v52 = vcombine.low %v1999_v20, %v1998_v10 }
  0x74   : >> { %862 = vmatpush1.bf16.msra.mxu1 %v1152_v0  ;;  %v2002_v0 = vld [vmem:[#allocation36_spill] sm:$0xff] }
  0x75   : >> { %702 = vmatpush1.bf16.msra.mxu0 %v1131_v2  ;;  %863 = vmatprep.subr.bf16.mxu1 %v1155_v7  ;;  %v1156_v2 = vcombine.low %v2001_v13, %v2000_v12 }
  0x76   : >> { %703 = vmatprep.subr.bf16.mxu0 %v1134_v1  ;;  %v2003_v1 = vld [vmem:[#allocation35_spill] sm:$0xff] }
  0x77   : >> { %v1138_v7 = vcombine.high %v2003_v1, %v2002_v0 }
  0x78   : >> { %864 = vmatpush1.bf16.msra.mxu1 %v1154_v51  ;;  %v1158_v51 = vcombine.low %v2005_v5, %v2004_v4 }
  0x79   : >> { %704 = vmatpush1.bf16.msra.mxu0 %v1133_v9  ;;  %865 = vmatprep.subr.bf16.mxu1 %v1157_v14  ;;  %v1137_v9 = vcombine.low %v2003_v1, %v2002_v0  ;;  %v893_v1 = vlaneseq }
  0x7a   : >> { %705 = vmatprep.subr.bf16.mxu0 %v1136_v3  ;;  %v738_v3 = vor.u32 %v737_v16, %v733_v8 }
  0x7b   : >> { %v894_v19 = vshrl.u32 %v893_v1, 7 }
  0x7c   : >> { %866 = vmatpush1.bf16.msra.mxu1 %v1156_v2 }
  0x7d   : >> { %706 = vmatpush1.bf16.msra.mxu0 %v1135_v52  ;;  %867 = vmatprep.subr.bf16.mxu1 %v1159_v6  ;;  %v895_v4 = vsub.s32 0, %v894_v19 }
  0x7e   : >> { %707 = vmatprep.subr.bf16.mxu0 %v1138_v7  ;;  %v899_v7 = vsub.s32 1, %v894_v19 }
  0x80   : >> { %868 = vmatpush1.bf16.msra.mxu1 %v1158_v51 }
  0x81   : >> { %708 = vmatpush1.bf16.msra.mxu0 %v1137_v9  ;;  %v2006_v9 = vld [vmem:[#allocation49_spill] sm:$0xff] }
  0x83   : >> { %882 = vmatmul.mubr.bf16.vlgmr.msra.gmra.mrb[4].mxu1 %v738_v3 }
  0x84   : >> { %722 = vmatmul.mubr.bf16.vlgmr.msra.gmra.mrb[4].mxu0 %v1117_v11  ;;  %v896_v11 = vrot.slane %v2006_v9, %v895_v4 }
 0x12e   : >> { %v568_v10 = vpop.f32.mrb[0].mxu1 }
 0x12f   : >> { %v424_v14 = vpop.f32.mrb[0].mxu0  ;;  %v570_v15 = vpop.f32.mrb[1].mxu1 }
 0x130   : >> { %v569_v12 = vadd.f32 %v568_v10, %v424_v14  ;;  %v426_v13 = vpop.f32.mrb[1].mxu0  ;;  %v572_v17 = vpop.f32.mrb[2].mxu1  ;;  %v900_v10 = vrot.slane %v2006_v9, %v899_v7 }
 0x131   : >> { %v571_v52 = vadd.f32 %v570_v15, %v426_v13  ;;  %v428_v2 = vpop.f32.mrb[2].mxu0  ;;  %v573_v0 = vpop.f32.mrb[3].mxu1 }
 0x132   : >> { %v429_v18 = vpop.f32.mrb[3].mxu0 }
 0x156   : >> { %v883_v16 = vpop.f32.mrb[4].mxu1 }
 0x157   : >> { %v723_v6 = vpop.f32.mrb[4].mxu0  ;;  %v885_v3 = vpop.f32.mrb[5].mxu1 }
 0x158   : >> { %v730_v8 = vadd.f32 %v723_v6, %v569_v12  ;;  %v725_v51 = vpop.f32.mrb[5].mxu0  ;;  %v887_v13 = vpop.f32.mrb[6].mxu1  ;;  %v921_v12 = vunpack.c.l.s4 %v1206_v22 }
 0x159   : >> { %v731_v5 = vadd.f32 %v725_v51, %v571_v52  ;;  %v727_v14 = vpop.f32.mrb[6].mxu0  ;;  %v888_v18 = vpop.f32.mrb[7].mxu1 }
 0x15a   : >> { %v890_v15 = vadd.f32 %v883_v16, %v730_v8  ;;  %v728_v17 = vpop.f32.mrb[7].mxu0  ;;  %v922_v51 = vunpack.c.0.s8 %v921_v12 }
 0x15b   : >> { %v891_v0 = vadd.f32 %v885_v3, %v731_v5 }
 0x15c   : >> { %v903_v1 = vadd.f32 %v896_v11, %v890_v15  ;;  %v925_v8 = vsub.s32 %v922_v51, %v894_v19 }
 0x15d   : >> { %v904_v2 = vadd.f32 %v900_v10, %v891_v0 }
 0x15e   : >> { %v905_v20 = vadd.f32 3.0, %v903_v1 }
 0x15f   : >> { %v906_v21 = vadd.f32 3.0, %v904_v2 }
 0x160   : >> { %v907_v4 = vmax.f32 %v905_v20, 0.0 }
 0x161   : >> { %v908_v6 = vmax.f32 %v906_v21, 0.0 }
 0x162   : >> { %v909_v23 = vmin.f32 %v907_v4, 6.0 }
 0x163   : >> { %v910_v52 = vmin.f32 %v908_v6, 6.0 }
 0x164   : >> { %v911_v7 = vmul.f32 %v909_v23, %v903_v1 }
 0x165   : >> { %v912_v14 = vmul.f32 %v910_v52, %v904_v2 }
 0x166   : >> { %v913_v13 = vmul.f32 0.16666667, %v911_v7 }
 0x167   : >> { %v914_v16 = vmul.f32 0.16666667, %v912_v14  ;;  %260 = sbr.rel (!%p258_p4) target bundleno = 41 (0x29), region = 75 }
 0x169   : >> { %v1161_v5 = vpack.c.bf16 %v914_v16, %v913_v13 }
 0x16b   : >> { %v926_v11 = vrot.slane %v1161_v5, %v925_v8 }
 0x16d   : >> { %933 = vst.msk [vmem:[%s929_s17] sm:$0xf] %vm932_vm3, %v926_v11 }
 0x16e PF: > { %s13_s12 = sadd.s32 1, %s1200_s12  }
 0x16f   : > { %p10_p5 = scmp.ge.s32.totalorder %s13_s12, 4  }
 0x171   :  { %12 = sbr.rel (!%p10_p5) target bundleno = 1 (0x1), region = 86 }

// kernel: mobilenet_v3_seg_forward.14
= control target key start
LH: loop header
LB: loop body
LE: loop exit
PB: predicated region body
PF: predicated region fallthrough
CT: control target
= control target key end

     0   :  { %s538_s9 = smov 0   ;;  %s562_s0 = inlined_call_operand.vmem [shape: bf16[2,4,4,160], index: 0, kind: input, shape index: {}]   ;;  %s563_s1 = inlined_call_operand.vmem [shape: f32[1,4], index: 1, kind: input, shape index: {}]   ;;  %s564_s2 = inlined_call_operand.vmem [shape: bf16[2,1,1,160], index: 2, kind: output, shape index: {}]  }
   0x1 LB: > { %s480_s10 = sadd.s32 4294967295, %s519_s9   ;;  %p484_p0 = scmp.ge.s32.totalorder %s519_s9, 1  ;;  %s519_s9 = sphi %s538_s9, %s12_s9  }
   0x2   : > { %p112_p1 = scmp.lt.s32.totalorder %s519_s9, 3 }
   0x4   : > { %p113_p2 = pnand %p484_p0, %p112_p1 }
   0x5   : > { %p133_p3 = scmp.lt.s32.totalorder (!%p113_p2), %s480_s10, 1  ;;  %v521_v0 = vmov (!%p113_p2), 0.0   ;;  %vm151_vm0 = vcmask (!%p113_p2), 1043456   ;;  %v142_v8 = vld [vmem:[%s563_s1] sm:$0x1] (!%p113_p2)  ;;  %vm147_vm1 = vcmask (!%p113_p2), 31744   ;;  %v405_v14 = vlaneseq (!%p113_p2) }
   0x6   : > { %116 = sbr.rel (%p113_p2) target bundleno = 252 (0xfc), region = 28  ;;  %220 = vmatprep.mubr.f32.mxu0 (!%p113_p2), %v521_v0  ;;  %302 = vmatprep.mubr.f32.mxu1 (!%p113_p2), %v521_v0  ;;  %v522_v12 = vmov (!%p113_p2), 1966171168   ;;  %vm417_vm2 = vcmask (!%p113_p2), 1040384   ;;  %vm418_vm3 = vsmask.f32 (!%p113_p2), 256 }
   0x7   : > { %v403_v13 = vunpack.c.l.s4 (!%p113_p2), %v522_v12  ;;  %v406_v25 = vshrl.u32 (!%p113_p2), %v405_v14, 7  ;;  %vm420_vm4 = vcmask (!%p113_p2), 254977   ;;  %vm421_vm5 = vsmask.f32 (!%p113_p2), 1280  ;;  %vm419_vm6 = vmand (!%p113_p2), %vm417_vm2, %vm418_vm3 }
   0x8   : > { %vm422_vm7 = vmand (!%p113_p2), %vm420_vm4, %vm421_vm5 }
   0x9   : > { %v404_v24 = vunpack.c.0.s8 (!%p113_p2), %v403_v13  ;;  %vm423_vm8 = vmor (!%p113_p2), %vm422_vm7, %vm419_vm6 }
   0xb   : > { %v407_v31 = vsub.s32 (!%p113_p2), %v404_v24, %v406_v25 }
   0xd   : > { %s566_s10 = smov (!%p133_p3, %s480_s10), 1 }
   0xe   : > { %s502_s11 = sshll.u32 %s566_s10, 4  ;;  %s487_s17 = sshll.u32 %s566_s10, 1 }
   0xf   : > { %s137_s14 = scalar_lea.vmem %s562_s0, %s502_s11  ;;  %s141_s20 = scalar_lea.vmem %s564_s2, %s487_s17 }
  0x10   : > { %v143_v1 = vld [vmem:[%s137_s14] sm:$0xff]   ;;  %v495_v2 = vld [vmem:[%s137_s14 + $0x8] sm:$0xf] }
  0x11   : > { %v144_v3 = vunpack.c.l.bf16 %v143_v1  ;;  %v315_v4 = vunpack.c.l.bf16 %v495_v2  ;;  %v231_v5 = vunpack.c.h.bf16 %v143_v1  ;;  %v424_v34 = vld [vmem:[%s141_s20] sm:$0x3] }
  0x13   : > { %v146_v6 = vcombine.high %v144_v3, %v144_v3  ;;  %v233_v7 = vcombine.high %v231_v5, %v231_v5  ;;  %v317_v9 = vcombine.high %v315_v4, %v315_v4 }
  0x15   : > { %488 = vmatprep.subr.msk.mxu0 %vm151_vm0, %v146_v6  ;;  %492 = vmatprep.subr.msk.mxu1 %vm151_vm0, %v233_v7 }
  0x16   : > { %489 = vmatpush1.msk.msra.mxu0 %vm151_vm0, %v144_v3  ;;  %493 = vmatpush1.msk.msra.mxu1 %vm151_vm0, %v231_v5 }
  0x17   : > { %490 = vmatmul.mubr.msk.f32.vlgmr.msra.gmra.mrb[0].mxu0 %vm147_vm1, %v142_v8  ;;  %494 = vmatmul.mubr.msk.f32.vlgmr.msra.gmra.mrb[0].mxu1 %vm147_vm1, %v142_v8 }
  0x18   : > { %496 = vmatprep.subr.msk.mxu0 %vm151_vm0, %v317_v9  ;;  %386 = vmatprep.mubr.f32.mxu0 %v521_v0 }
  0x19   : > { %497 = vmatpush1.msk.msra.mxu0 %vm151_vm0, %v315_v4 }
  0x1b   : > { %498 = vmatmul.mubr.msk.f32.vlgmr.msra.gmra.mrb[2].mxu0 %vm147_vm1, %v142_v8 }
  0xea   : > { %v222_v10 = vpop.f32.mrb[0].mxu0  ;;  %v304_v11 = vpop.f32.mrb[0].mxu1 }
  0xeb   : > { %v227_v15 = vmul.f32 0.33333334, %v222_v10  ;;  %v309_v16 = vmul.f32 0.33333334, %v304_v11  ;;  %v224_v17 = vpop.f32.mrb[1].mxu0  ;;  %v306_v18 = vpop.f32.mrb[1].mxu1 }
  0xec   : > { %v228_v19 = vmul.f32 0.33333334, %v224_v17  ;;  %v310_v20 = vmul.f32 0.33333334, %v306_v18 }
  0xed   : > { %v311_v21 = vadd.f32 %v309_v16, %v227_v15 }
  0xee   : > { %v312_v22 = vadd.f32 %v310_v20, %v228_v19  ;;  %v388_v23 = vpop.f32.mrb[2].mxu0 }
  0xef   : > { %v393_v26 = vmul.f32 0.33333334, %v388_v23  ;;  %v390_v27 = vpop.f32.mrb[3].mxu0 }
  0xf0   : > { %v394_v28 = vmul.f32 0.33333334, %v390_v27 }
  0xf1   : > { %v395_v29 = vadd.f32 %v393_v26, %v311_v21 }
  0xf2   : > { %v396_v30 = vadd.f32 %v394_v28, %v312_v22 }
  0xf4   : > { %v499_v32 = vpack.c.bf16 %v396_v30, %v395_v29 }
  0xf6   : > { %v408_v33 = vrot.slane %v499_v32, %v407_v31 }
  0xf8   : > { %v415_v35 = vrot.slane %v408_v33, %v407_v31 }
  0xfa   : > { %v425_v36 = vsel %vm423_vm8, %v415_v35, %v424_v34 }
  0xfb   : > { %426 = vst [vmem:[%s141_s20] sm:$0x3] %v425_v36 }
  0xfc PF: > { %s12_s9 = sadd.s32 1, %s519_s9  }
  0xfd   : > { %p9_p4 = scmp.ge.s32.totalorder %s12_s9, 4  }
  0xff   :  { %11 = sbr.rel (!%p9_p4) target bundleno = 1 (0x1), region = 60 }

// kernel: mobilenet_v3_seg_forward.16
= control target key start
LH: loop header
LB: loop body
LE: loop exit
PB: predicated region body
PF: predicated region fallthrough
CT: control target
= control target key end

     0   :  { %v305_v0 = vmov 0   ;;  %vm131_vm0 = vcmask 261120   ;;  %s388_s1 = inlined_call_operand.vmem [shape: bf16[160,128], index: 1, kind: input, shape index: {}]   ;;  %s389_s0 = inlined_call_operand.vmem [shape: bf16[32,160], index: 0, kind: input, shape index: {}]   ;;  %s390_s2 = inlined_call_operand.vmem [shape: f32[1,128], index: 2, kind: input, shape index: {}]   ;;  %s391_s3 = inlined_call_operand.vmem [shape: bf16[32,128], index: 3, kind: input, shape index: {}]   ;;  %s392_s4 = inlined_call_operand.vmem [shape: bf16[32,128], index: 4, kind: output, shape index: {}]  }
   0x1   :  { %138 = vmatprep.subr.bf16.mxu0 %v305_v0  ;;  %268 = vmatprep.subr.bf16.mxu1 %v305_v0  ;;  %v289_v1 = vld [vmem:[%s388_s1] sm:$0xff]   ;;  %v290_v2 = vld [vmem:[%s388_s1 + $0x8] sm:$0xff]   ;;  %v291_v3 = vld [vmem:[%s388_s1 + $0x10] sm:$0xff]  }
   0x2   :  { %139 = vmatpush1.bf16.msra.mxu0 %v289_v1  ;;  %278 = vmatpush1.bf16.msra.mxu1 %v289_v1  ;;  %v292_v4 = vld [vmem:[%s388_s1 + $0x18] sm:$0xff]   ;;  %v301_v5 = vld [vmem:[%s389_s0 + $0x4] ss:$8 sps:$4 sm:$0xff]   ;;  %v295_v9 = vld [vmem:[%s388_s1 + $0x30] sm:$0xff]  }
   0x3   :  { %140 = vmatprep.subr.bf16.mxu0 %v305_v0  ;;  %269 = vmatprep.subr.bf16.mxu1 %v305_v0  ;;  %v304_v6 = vld [vmem:[%s389_s0 + $0x14] ss:$8 sps:$4 sm:$0xff]   ;;  %v293_v7 = vld [vmem:[%s388_s1 + $0x20] sm:$0xff]   ;;  %v294_v8 = vld [vmem:[%s388_s1 + $0x28] sm:$0xff]  }
   0x4   :  { %238 = vmatprep.mubr.msk.bf16.mxu0 %vm131_vm0, %v301_v5  ;;  %239 = vmatprep.mubr.msk.bf16.mxu1 %vm131_vm0, %v304_v6  ;;  %v296_v10 = vld [vmem:[%s388_s1 + $0x38] sm:$0xff]   ;;  %v297_v11 = vld [vmem:[%s388_s1 + $0x40] sm:$0xff]   ;;  %v298_v12 = vld [vmem:[%s388_s1 + $0x48] sm:$0xff]  }
   0x5   :  { %v299_v13 = vld [vmem:[%s389_s0] ss:$8 sps:$4 sm:$0xff]   ;;  %v302_v14 = vld [vmem:[%s389_s0 + $0x10] ss:$8 sps:$4 sm:$0xff]  }
   0x6   :  { %141 = vmatpush1.bf16.msra.mxu0 %v290_v2  ;;  %279 = vmatpush1.bf16.msra.mxu1 %v290_v2  ;;  %v223_v15 = vld [vmem:[%s390_s2] ss:$0 sm:$0xff]  ;;  %v266_v17 = vld [vmem:[%s391_s3 + $0x8] sm:$0xff]  }
   0x7   :  { %142 = vmatprep.subr.bf16.mxu0 %v305_v0  ;;  %270 = vmatprep.subr.bf16.mxu1 %v305_v0  ;;  %v249_v16 = vld [vmem:[%s391_s3] sm:$0xff]   ;;  %v254_v25 = vunpack.c.l.bf16 %v266_v17  ;;  %v255_v28 = vunpack.c.h.bf16 %v266_v17 }
   0x8   :  { %v250_v24 = vunpack.c.l.bf16 %v249_v16  ;;  %v251_v26 = vunpack.c.h.bf16 %v249_v16 }
   0xa   :  { %143 = vmatpush1.bf16.msra.mxu0 %v291_v3  ;;  %280 = vmatpush1.bf16.msra.mxu1 %v291_v3 }
   0xb   :  { %144 = vmatprep.subr.bf16.mxu0 %v305_v0  ;;  %271 = vmatprep.subr.bf16.mxu1 %v305_v0 }
   0xe   :  { %145 = vmatpush1.bf16.msra.mxu0 %v292_v4  ;;  %281 = vmatpush1.bf16.msra.mxu1 %v292_v4 }
   0xf   :  { %146 = vmatprep.subr.bf16.mxu0 %v305_v0  ;;  %272 = vmatprep.subr.bf16.mxu1 %v305_v0 }
  0x12   :  { %147 = vmatpush1.bf16.msra.mxu0 %v293_v7  ;;  %282 = vmatpush1.bf16.msra.mxu1 %v293_v7 }
  0x13   :  { %148 = vmatprep.subr.bf16.mxu0 %v305_v0  ;;  %273 = vmatprep.subr.bf16.mxu1 %v305_v0 }
  0x16   :  { %149 = vmatpush1.bf16.msra.mxu0 %v294_v8  ;;  %283 = vmatpush1.bf16.msra.mxu1 %v294_v8 }
  0x17   :  { %150 = vmatprep.subr.bf16.mxu0 %v305_v0  ;;  %274 = vmatprep.subr.bf16.mxu1 %v305_v0 }
  0x1a   :  { %151 = vmatpush1.bf16.msra.mxu0 %v295_v9  ;;  %284 = vmatpush1.bf16.msra.mxu1 %v295_v9 }
  0x1b   :  { %152 = vmatprep.subr.bf16.mxu0 %v305_v0  ;;  %275 = vmatprep.subr.bf16.mxu1 %v305_v0 }
  0x1e   :  { %153 = vmatpush1.bf16.msra.mxu0 %v296_v10  ;;  %285 = vmatpush1.bf16.msra.mxu1 %v296_v10 }
  0x1f   :  { %154 = vmatprep.subr.bf16.mxu0 %v305_v0  ;;  %276 = vmatprep.subr.bf16.mxu1 %v305_v0 }
  0x22   :  { %155 = vmatpush1.bf16.msra.mxu0 %v297_v11  ;;  %286 = vmatpush1.bf16.msra.mxu1 %v297_v11 }
  0x23   :  { %156 = vmatprep.subr.bf16.mxu0 %v305_v0  ;;  %277 = vmatprep.subr.bf16.mxu1 %v305_v0 }
  0x26   :  { %157 = vmatpush1.bf16.msra.mxu0 %v298_v12  ;;  %287 = vmatpush1.bf16.msra.mxu1 %v298_v12 }
  0x29   :  { %171 = vmatmul.mubr.bf16.vlgmr.msra.gmra.mrb[0].mxu0 %v299_v13  ;;  %179 = vmatmul.mubr.bf16.vlgmr.msra.gmra.mrb[0].mxu1 %v302_v14 }
  0xfc   :  { %v172_v18 = vpop.f32.mrb[0].mxu0  ;;  %v180_v19 = vpop.f32.mrb[0].mxu1 }
  0xfd   :  { %v173_v20 = vadd.f32 %v223_v15, %v172_v18  ;;  %v181_v21 = vadd.f32 %v223_v15, %v180_v19  ;;  %v174_v22 = vpop.f32.mrb[1].mxu0  ;;  %v182_v23 = vpop.f32.mrb[1].mxu1 }
  0xfe   :  { %v175_v27 = vpop.f32.mrb[2].mxu0  ;;  %v183_v29 = vpop.f32.mrb[2].mxu1 }
  0xff   :  { %v187_v30 = vmax.f32 %v173_v20, 0.0  ;;  %v189_v31 = vmax.f32 %v181_v21, 0.0  ;;  %v176_v32 = vadd.f32 %v223_v15, %v175_v27  ;;  %v184_v33 = vadd.f32 %v223_v15, %v183_v29  ;;  %v177_v34 = vpop.f32.mrb[3].mxu0  ;;  %v185_v35 = vpop.f32.mrb[3].mxu1 }
 0x101   :  { %v188_v36 = vmax.f32 %v176_v32, 0.0  ;;  %v190_v37 = vmax.f32 %v184_v33, 0.0  ;;  %v195_v38 = vmul.f32 %v250_v24, %v187_v30  ;;  %v197_v39 = vmul.f32 %v254_v25, %v189_v31 }
 0x103   :  { %v196_v40 = vmul.f32 %v251_v26, %v188_v36  ;;  %v198_v41 = vmul.f32 %v255_v28, %v190_v37 }
 0x105   :  { %v259_v42 = vpack.c.bf16 %v196_v40, %v195_v38  ;;  %v264_v43 = vpack.c.bf16 %v198_v41, %v197_v39 }
 0x107   :  { %260 = vst [vmem:[%s392_s4] sm:$0xff] %v259_v42   ;;  %267 = vst [vmem:[%s392_s4 + $0x8] sm:$0xff] %v264_v43  }

// kernel: mobilenet_v3_seg_forward.15
= control target key start
LH: loop header
LB: loop body
LE: loop exit
PB: predicated region body
PF: predicated region fallthrough
CT: control target
= control target key end

     0   :  { %v197_v0 = vmov 0   ;;  %vm109_vm0 = vcmask 261120   ;;  %s257_s1 = inlined_call_operand.vmem [shape: bf16[160,128], index: 1, kind: input, shape index: {}]   ;;  %s258_s0 = inlined_call_operand.vmem [shape: bf16[8,160], index: 0, kind: input, shape index: {}]   ;;  %s259_s2 = inlined_call_operand.vmem [shape: f32[1,128], index: 2, kind: input, shape index: {}]   ;;  %s260_s3 = inlined_call_operand.vmem [shape: bf16[8,128], index: 3, kind: output, shape index: {}]  }
   0x1   :  { %113 = vmatprep.subr.bf16.mxu0 %v197_v0  ;;  %v181_v1 = vld [vmem:[%s257_s1] sm:$0xff]   ;;  %v182_v2 = vld [vmem:[%s257_s1 + $0x8] sm:$0xff]   ;;  %v183_v3 = vld [vmem:[%s257_s1 + $0x10] sm:$0xff]  }
   0x2   :  { %114 = vmatpush1.bf16.msra.mxu0 %v181_v1  ;;  %v184_v4 = vld [vmem:[%s257_s1 + $0x18] sm:$0xff]   ;;  %v15_v5 = vld [vmem:[%s258_s0] sm:$0xff]  ;;  %v186_v8 = vld [vmem:[%s257_s1 + $0x28] sm:$0xff]  }
   0x3   :  { %115 = vmatprep.subr.bf16.mxu0 %v197_v0  ;;  %v167_v6 = vcombine.high %v15_v5, %v15_v5  ;;  %v185_v7 = vld [vmem:[%s257_s1 + $0x20] sm:$0xff]   ;;  %v187_v9 = vld [vmem:[%s257_s1 + $0x30] sm:$0xff]   ;;  %v188_v10 = vld [vmem:[%s257_s1 + $0x38] sm:$0xff]   ;;  %v166_v13 = vcombine.low %v15_v5, %v15_v5 }
   0x4   :  { %v189_v11 = vld [vmem:[%s257_s1 + $0x40] sm:$0xff]   ;;  %v190_v12 = vld [vmem:[%s257_s1 + $0x48] sm:$0xff]  }
   0x5   :  { %178 = vmatprep.mubr.msk.bf16.mxu0 %vm109_vm0, %v167_v6  ;;  %v165_v14 = vld [vmem:[%s259_s2] ss:$0 sm:$0xff] }
   0x6   :  { %116 = vmatpush1.bf16.msra.mxu0 %v182_v2 }
   0x7   :  { %117 = vmatprep.subr.bf16.mxu0 %v197_v0 }
   0xa   :  { %118 = vmatpush1.bf16.msra.mxu0 %v183_v3 }
   0xb   :  { %119 = vmatprep.subr.bf16.mxu0 %v197_v0 }
   0xe   :  { %120 = vmatpush1.bf16.msra.mxu0 %v184_v4 }
   0xf   :  { %121 = vmatprep.subr.bf16.mxu0 %v197_v0 }
  0x12   :  { %122 = vmatpush1.bf16.msra.mxu0 %v185_v7 }
  0x13   :  { %123 = vmatprep.subr.bf16.mxu0 %v197_v0 }
  0x16   :  { %124 = vmatpush1.bf16.msra.mxu0 %v186_v8 }
  0x17   :  { %125 = vmatprep.subr.bf16.mxu0 %v197_v0 }
  0x1a   :  { %126 = vmatpush1.bf16.msra.mxu0 %v187_v9 }
  0x1b   :  { %127 = vmatprep.subr.bf16.mxu0 %v197_v0 }
  0x1e   :  { %128 = vmatpush1.bf16.msra.mxu0 %v188_v10 }
  0x1f   :  { %129 = vmatprep.subr.bf16.mxu0 %v197_v0 }
  0x22   :  { %130 = vmatpush1.bf16.msra.mxu0 %v189_v11 }
  0x23   :  { %131 = vmatprep.subr.bf16.mxu0 %v197_v0 }
  0x26   :  { %132 = vmatpush1.bf16.msra.mxu0 %v190_v12 }
  0x29   :  { %146 = vmatmul.mubr.bf16.vlgmr.msra.gmra.mrb[0].mxu0 %v166_v13 }
  0xfc   :  { %v147_v15 = vpop.f32.mrb[0].mxu0 }
  0xfd   :  { %v148_v16 = vadd.f32 %v165_v14, %v147_v15  ;;  %v149_v17 = vpop.f32.mrb[1].mxu0 }
  0xfe   :  { %v150_v18 = vpop.f32.mrb[2].mxu0 }
  0xff   :  { %v179_v19 = vmul.f32 -1.442695, %v148_v16  ;;  %v151_v20 = vpop.f32.mrb[3].mxu0 }
 0x101   :  { %193 = vpow2.f32 %v179_v19 }
 0x10b   :  { %v194_v21 = vpop.eup %193 }
 0x10c   :  { %v156_v22 = vadd.f32 1.0, %v194_v21 }
 0x10e   :  { %195 = vrcp.f32 %v156_v22 }
 0x118   :  { %v196_v23 = vpop.eup %195 }
 0x119   :  { %v159_v24 = vpack.c.bf16 %v196_v23, %v196_v23 }
 0x11b   :  { %160 = vst [vmem:[%s260_s3] sm:$0xf] %v159_v24 }

// kernel: mobilenet_v3_seg_forward.17
= control target key start
LH: loop header
LB: loop body
LE: loop exit
PB: predicated region body
PF: predicated region fallthrough
CT: control target
= control target key end

     0   :  { %s1491_s9 = smov 0   ;;  %s1627_s0 = inlined_call_operand.vmem [shape: bf16[2,4,4,128], index: 0, kind: input, shape index: {}]   ;;  %s1628_s1 = inlined_call_operand.vmem [shape: f32[8,4], index: 1, kind: input, shape index: {}]   ;;  %s1629_s2 = inlined_call_operand.vmem [shape: bf16[2,8,8,128], index: 2, kind: output, shape index: {}]  }
   0x1 LB: > { %s1299_s10 = sadd.s32 4294967295, %s1472_s9   ;;  %p1303_p0 = scmp.ge.s32.totalorder %s1472_s9, 1  ;;  %s1472_s9 = sphi %s1491_s9, %s12_s9  }
   0x2   : > { %p112_p1 = scmp.lt.s32.totalorder %s1472_s9, 3 }
   0x4   : > { %p113_p2 = pnand %p1303_p0, %p112_p1 }
   0x5   : > { %p134_p3 = scmp.lt.s32.totalorder (!%p113_p2), %s1299_s10, 1  ;;  %v1474_v0 = vmov (!%p113_p2), 0.0   ;;  %vm1475_vm0 = vmmov (!%p113_p2), 0   ;;  %vm151_vm1 = vcmask (!%p113_p2), 1043456   ;;  %v1519_v5 = vld [vmem:[%s1628_s1] sm:$0xff] (!%p113_p2)  ;;  %vm147_vm2 = vcmask (!%p113_p2), 31744  }
   0x6   : > { %116 = sbr.rel (%p113_p2) target bundleno = 263 (0x107), region = 28  ;;  %1386 = vmatprep.subr.mxu0 (!%p113_p2), %v1474_v0  ;;  %1388 = vmatprep.mubr.msk.f32.mxu0 (!%p113_p2), %vm1475_vm0, %v1474_v0 }
   0x7   : > { %1391 = vmatprep.subr.mxu1 (!%p113_p2), %v1474_v0  ;;  %1393 = vmatprep.mubr.msk.f32.mxu1 (!%p113_p2), %vm1475_vm0, %v1474_v0 }
   0xd   : > { %s1631_s10 = smov (!%p134_p3, %s1299_s10), 1 }
   0xe   : > { %s1356_s11 = sshll.u32 %s1631_s10, 3  ;;  %s1357_s17 = sshll.u32 %s1631_s10, 5 }
   0xf   : > { %s1511_s14 = scalar_lea.vmem %s1627_s0, %s1356_s11  ;;  %s1614_s20 = scalar_lea.vmem %s1629_s2, %s1357_s17 }
  0x10   : > { %v145_v1 = vld [vmem:[%s1511_s14] sm:$0x3]  ;;  %v1312_v2 = vld [vmem:[%s1511_s14 + $0x2] sm:$0x3]  ;;  %v1325_v13 = vld [vmem:[%s1511_s14 + $0x4] sm:$0x3] }
  0x11   : > { %v227_v3 = vld [vmem:[%s1511_s14] sm:$0x3]  ;;  %v146_v4 = vunpack.c.l.bf16 %v145_v1  ;;  %v305_v6 = vunpack.c.l.bf16 %v1312_v2  ;;  %v1318_v9 = vld [vmem:[%s1511_s14 + $0x2] sm:$0x3]  ;;  %v618_v16 = vunpack.c.l.bf16 %v1325_v13  ;;  %v1332_v17 = vld [vmem:[%s1511_s14 + $0x4] sm:$0x3] }
  0x12   : > { %v228_v7 = vunpack.c.l.bf16 %v227_v3  ;;  %v384_v8 = vld [vmem:[%s1511_s14] sm:$0x3]  ;;  %v1322_v11 = vld [vmem:[%s1511_s14 + $0x2] sm:$0x3]  ;;  %v461_v12 = vunpack.c.l.bf16 %v1318_v9  ;;  %v1336_v19 = vld [vmem:[%s1511_s14 + $0x4] sm:$0x3]  ;;  %v774_v20 = vunpack.c.l.bf16 %v1332_v17 }
  0x13   : > { %1387 = vmatpush3.msk.msra.mxu0 %vm151_vm1, %v146_v4  ;;  %v385_v10 = vunpack.c.l.bf16 %v384_v8  ;;  %v541_v14 = vunpack.c.l.bf16 %v1322_v11  ;;  %v1329_v15 = vld [vmem:[%s1511_s14 + $0x2] sm:$0x3]  ;;  %v1339_v21 = vld [vmem:[%s1511_s14 + $0x6] sm:$0x3]  ;;  %v854_v22 = vunpack.c.l.bf16 %v1336_v19  ;;  %v1343_v23 = vld [vmem:[%s1511_s14 + $0x4] sm:$0x3] }
  0x14   : > { %1392 = vmatpush3.msk.msra.mxu1 %vm151_vm1, %v228_v7  ;;  %1389 = vmatmul.mubr.msk.f32.vlgmr.msra.gmra.mrb[0].mxu0 %vm147_vm2, %v1519_v5  ;;  %v698_v18 = vunpack.c.l.bf16 %v1329_v15  ;;  %v931_v24 = vunpack.c.l.bf16 %v1339_v21  ;;  %v1346_v25 = vld [vmem:[%s1511_s14 + $0x6] sm:$0x3]  ;;  %v1011_v26 = vunpack.c.l.bf16 %v1343_v23 }
  0x15   : > { %1396 = vmatprep.subr.mxu0 %v1474_v0  ;;  %1398 = vmatprep.mubr.msk.f32.mxu0 %vm1475_vm0, %v1474_v0  ;;  %v1350_v27 = vld [vmem:[%s1511_s14 + $0x6] sm:$0x3]  ;;  %v1087_v28 = vunpack.c.l.bf16 %v1346_v25 }
  0x16   : > { %1397 = vmatpush3.msk.msra.mxu0 %vm151_vm1, %v305_v6  ;;  %1394 = vmatmul.mubr.msk.f32.vlgmr.msra.gmra.mrb[0].mxu1 %vm147_vm2, %v1519_v5  ;;  %v1167_v29 = vunpack.c.l.bf16 %v1350_v27 }
  0x17   : > { %1401 = vmatprep.subr.mxu1 %v1474_v0  ;;  %1406 = vmatprep.subr.mxu0 %v1474_v0 }
  0x18   : > { %1402 = vmatpush3.msk.msra.mxu1 %vm151_vm1, %v385_v10  ;;  %1399 = vmatmul.mubr.msk.f32.vlgmr.msra.gmra.mrb[2].mxu0 %vm147_vm2, %v1519_v5 }
  0x19   : > { %1403 = vmatprep.mubr.msk.f32.mxu1 %vm1475_vm0, %v1474_v0  ;;  %1407 = vmatpush3.msk.msra.mxu0 %vm151_vm1, %v461_v12 }
  0x1a   : > { %1408 = vmatprep.mubr.msk.f32.mxu0 %vm1475_vm0, %v1474_v0  ;;  %1404 = vmatmul.mubr.msk.f32.vlgmr.msra.gmra.mrb[2].mxu1 %vm147_vm2, %v1519_v5 }
  0x1b   : > { %1411 = vmatprep.subr.mxu1 %v1474_v0  ;;  %1416 = vmatprep.subr.mxu0 %v1474_v0 }
  0x1c   : > { %1412 = vmatpush3.msk.msra.mxu1 %vm151_vm1, %v541_v14  ;;  %1409 = vmatmul.mubr.msk.f32.vlgmr.msra.gmra.mrb[4].mxu0 %vm147_vm2, %v1519_v5 }
  0x1d   : > { %1413 = vmatprep.mubr.msk.f32.mxu1 %vm1475_vm0, %v1474_v0  ;;  %1417 = vmatpush3.msk.msra.mxu0 %vm151_vm1, %v618_v16 }
  0x1e   : > { %1418 = vmatprep.mubr.msk.f32.mxu0 %vm1475_vm0, %v1474_v0  ;;  %1414 = vmatmul.mubr.msk.f32.vlgmr.msra.gmra.mrb[4].mxu1 %vm147_vm2, %v1519_v5 }
  0x1f   : > { %1421 = vmatprep.subr.mxu1 %v1474_v0  ;;  %1426 = vmatprep.subr.mxu0 %v1474_v0 }
  0x20   : > { %1422 = vmatpush3.msk.msra.mxu1 %vm151_vm1, %v698_v18  ;;  %1419 = vmatmul.mubr.msk.f32.vlgmr.msra.gmra.mrb[6].mxu0 %vm147_vm2, %v1519_v5 }
  0x21   : > { %1423 = vmatprep.mubr.msk.f32.mxu1 %vm1475_vm0, %v1474_v0  ;;  %1427 = vmatpush3.msk.msra.mxu0 %vm151_vm1, %v774_v20 }
  0x22   : > { %1428 = vmatprep.mubr.msk.f32.mxu0 %vm1475_vm0, %v1474_v0  ;;  %1424 = vmatmul.mubr.msk.f32.vlgmr.msra.gmra.mrb[6].mxu1 %vm147_vm2, %v1519_v5 }
  0x23   : > { %1431 = vmatprep.subr.mxu1 %v1474_v0  ;;  %1436 = vmatprep.subr.mxu0 %v1474_v0 }
  0x24   : > { %1432 = vmatpush3.msk.msra.mxu1 %vm151_vm1, %v854_v22  ;;  %1429 = vmatmul.mubr.msk.f32.vlgmr.msra.gmra.mrb[8].mxu0 %vm147_vm2, %v1519_v5 }
  0x25   : > { %1433 = vmatprep.mubr.msk.f32.mxu1 %vm1475_vm0, %v1474_v0  ;;  %1437 = vmatpush3.msk.msra.mxu0 %vm151_vm1, %v931_v24 }
  0x26   : > { %1438 = vmatprep.mubr.msk.f32.mxu0 %vm1475_vm0, %v1474_v0  ;;  %1434 = vmatmul.mubr.msk.f32.vlgmr.msra.gmra.mrb[8].mxu1 %vm147_vm2, %v1519_v5 }
  0x27   : > { %1441 = vmatprep.subr.mxu1 %v1474_v0  ;;  %1446 = vmatprep.subr.mxu0 %v1474_v0 }
  0x28   : > { %1442 = vmatpush3.msk.msra.mxu1 %vm151_vm1, %v1011_v26  ;;  %1439 = vmatmul.mubr.msk.f32.vlgmr.msra.gmra.mrb[10].mxu0 %vm147_vm2, %v1519_v5 }
  0x29   : > { %1443 = vmatprep.mubr.msk.f32.mxu1 %vm1475_vm0, %v1474_v0  ;;  %1447 = vmatpush3.msk.msra.mxu0 %vm151_vm1, %v1087_v28 }
  0x2a   : > { %1448 = vmatprep.mubr.msk.f32.mxu0 %vm1475_vm0, %v1474_v0  ;;  %1444 = vmatmul.mubr.msk.f32.vlgmr.msra.gmra.mrb[10].mxu1 %vm147_vm2, %v1519_v5 }
  0x2b   : > { %1451 = vmatprep.subr.mxu1 %v1474_v0  ;;  %1453 = vmatprep.mubr.msk.f32.mxu1 %vm1475_vm0, %v1474_v0 }
  0x2c   : > { %1452 = vmatpush3.msk.msra.mxu1 %vm151_vm1, %v1167_v29  ;;  %1449 = vmatmul.mubr.msk.f32.vlgmr.msra.gmra.mrb[12].mxu0 %vm147_vm2, %v1519_v5 }
  0x2e   : > { %1454 = vmatmul.mubr.msk.f32.vlgmr.msra.gmra.mrb[12].mxu1 %vm147_vm2, %v1519_v5 }
  0xe7   : > { %v221_v30 = vpop.f32.mrb[0].mxu0 }
  0xe8   : > { %v225_v31 = vpack.c.bf16 %v221_v30, %v221_v30  ;;  %v1390_v32 = vpop.f32.mrb[1].mxu0 }
  0xe9   : > { %v298_v33 = vpop.f32.mrb[0].mxu1 }
  0xea   : > { %226 = vst [vmem:[%s1614_s20] sm:$0xf] %v225_v31  ;;  %v302_v34 = vmul.f32 0.5714286, %v298_v33  ;;  %v1395_v35 = vpop.f32.mrb[1].mxu1 }
  0xeb   : > { %v375_v36 = vpop.f32.mrb[2].mxu0 }
  0xec   : > { %v379_v37 = vmul.f32 0.42857143, %v375_v36  ;;  %v1400_v38 = vpop.f32.mrb[3].mxu0 }
  0xed   : > { %v455_v39 = vpop.f32.mrb[2].mxu1 }
  0xee   : > { %v380_v40 = vadd.f32 %v379_v37, %v302_v34  ;;  %v459_v41 = vmul.f32 0.14285715, %v455_v39  ;;  %v1405_v42 = vpop.f32.mrb[3].mxu1 }
  0xef   : > { %v531_v43 = vpop.f32.mrb[4].mxu0 }
  0xf0   : > { %v381_v44 = vpack.c.bf16 %v380_v40, %v380_v40  ;;  %v535_v45 = vmul.f32 0.85714287, %v531_v43  ;;  %v1410_v46 = vpop.f32.mrb[5].mxu0 }
  0xf1   : > { %v611_v47 = vpop.f32.mrb[4].mxu1 }
  0xf2   : > { %1315 = vst [vmem:[%s1614_s20 + $0x4] sm:$0xf] %v381_v44  ;;  %v536_v48 = vadd.f32 %v535_v45, %v459_v41  ;;  %v615_v49 = vmul.f32 0.71428573, %v611_v47  ;;  %v1415_v50 = vpop.f32.mrb[5].mxu1 }
  0xf3   : > { %v688_v51 = vpop.f32.mrb[6].mxu0 }
  0xf4   : > { %v537_v52 = vpack.c.bf16 %v536_v48, %v536_v48  ;;  %v692_v53 = vmul.f32 0.2857143, %v688_v51  ;;  %v1420_v54 = vpop.f32.mrb[7].mxu0 }
  0xf5   : > { %v768_v55 = vpop.f32.mrb[6].mxu1 }
  0xf6   : > { %1321 = vst [vmem:[%s1614_s20 + $0x8] sm:$0xf] %v537_v52  ;;  %v693_v56 = vadd.f32 %v692_v53, %v615_v49  ;;  %v772_v57 = vmul.f32 0.2857143, %v768_v55  ;;  %v1425_v58 = vpop.f32.mrb[7].mxu1 }
  0xf7   : > { %v844_v59 = vpop.f32.mrb[8].mxu0 }
  0xf8   : > { %v694_v60 = vpack.c.bf16 %v693_v56, %v693_v56  ;;  %v848_v61 = vmul.f32 0.71428573, %v844_v59  ;;  %v1430_v62 = vpop.f32.mrb[9].mxu0 }
  0xf9   : > { %v924_v63 = vpop.f32.mrb[8].mxu1 }
  0xfa   : > { %1328 = vst [vmem:[%s1614_s20 + $0xc] sm:$0xf] %v694_v60  ;;  %v849_v0 = vadd.f32 %v848_v61, %v772_v57  ;;  %v928_v1 = vmul.f32 0.85714287, %v924_v63  ;;  %v1435_v2 = vpop.f32.mrb[9].mxu1 }
  0xfb   : > { %v1001_v3 = vpop.f32.mrb[10].mxu0 }
  0xfc   : > { %v850_v4 = vpack.c.bf16 %v849_v0, %v849_v0  ;;  %v1005_v5 = vmul.f32 0.14285715, %v1001_v3  ;;  %v1440_v6 = vpop.f32.mrb[11].mxu0 }
  0xfd   : > { %v1081_v7 = vpop.f32.mrb[10].mxu1 }
  0xfe   : > { %1335 = vst [vmem:[%s1614_s20 + $0x10] sm:$0xf] %v850_v4  ;;  %v1006_v8 = vadd.f32 %v1005_v5, %v928_v1  ;;  %v1085_v9 = vmul.f32 0.42857143, %v1081_v7  ;;  %v1445_v10 = vpop.f32.mrb[11].mxu1 }
  0xff   : > { %v1157_v11 = vpop.f32.mrb[12].mxu0 }
 0x100   : > { %v1007_v12 = vpack.c.bf16 %v1006_v8, %v1006_v8  ;;  %v1161_v13 = vmul.f32 0.5714286, %v1157_v11  ;;  %v1450_v14 = vpop.f32.mrb[13].mxu0 }
 0x101   : > { %v1237_v15 = vpop.f32.mrb[12].mxu1 }
 0x102   : > { %1342 = vst [vmem:[%s1614_s20 + $0x14] sm:$0xf] %v1007_v12  ;;  %v1162_v16 = vadd.f32 %v1161_v13, %v1085_v9  ;;  %v1241_v17 = vpack.c.bf16 %v1237_v15, %v1237_v15  ;;  %v1455_v18 = vpop.f32.mrb[13].mxu1 }
 0x104   : > { %v1163_v19 = vpack.c.bf16 %v1162_v16, %v1162_v16  ;;  %1353 = vst [vmem:[%s1614_s20 + $0x1c] sm:$0xf] %v1241_v17 }
 0x106   : > { %1349 = vst [vmem:[%s1614_s20 + $0x18] sm:$0xf] %v1163_v19 }
 0x107 PF: > { %s12_s9 = sadd.s32 1, %s1472_s9  }
 0x108   : > { %p9_p4 = scmp.ge.s32.totalorder %s12_s9, 4  }
 0x10a   :  { %11 = sbr.rel (!%p9_p4) target bundleno = 1 (0x1), region = 68 }

// kernel: mobilenet_v3_seg_forward.18
= control target key start
LH: loop header
LB: loop body
LE: loop exit
PB: predicated region body
PF: predicated region fallthrough
CT: control target
= control target key end

     0   :  { %vm133_vm0 = vcmask 392192   ;;  %s837_s3 = inlined_call_operand.vmem [shape: bf16[48,128], index: 3, kind: input, shape index: {}]   ;;  %s838_s1 = inlined_call_operand.vmem [shape: bf16[128,128], index: 1, kind: input, shape index: {}]   ;;  %s839_s2 = inlined_call_operand.vmem [shape: bf16[128,48], index: 2, kind: input, shape index: {}]   ;;  %s840_s0 = inlined_call_operand.vmem [shape: bf16[128,128], index: 0, kind: input, shape index: {}]   ;;  %s841_s4 = inlined_call_operand.vmem [shape: f32[1,128], index: 4, kind: input, shape index: {}]   ;;  %s842_s5 = inlined_call_operand.vmem [shape: f32[128,128], index: 5, kind: output, shape index: {}]  }
   0x1   :  { %v640_v0 = vld [vmem:[%s837_s3] sm:$0xff]   ;;  %v642_v2 = vld [vmem:[%s837_s3 + $0x8] sm:$0xff]   ;;  %v644_v4 = vld [vmem:[%s837_s3 + $0x10] sm:$0xff]  }
   0x2   :  { %v641_v1 = vld [vmem:[%s838_s1] sm:$0xff]   ;;  %554 = vmatprep.subr.bf16.mxu0 %v640_v0  ;;  %v643_v3 = vld [vmem:[%s838_s1 + $0x8] sm:$0xff]   ;;  %v645_v5 = vld [vmem:[%s838_s1 + $0x10] sm:$0xff]  }
   0x3   :  { %608 = vmatprep.subr.bf16.mxu1 %v641_v1  ;;  %555 = vmatpush3.bf16.msra.mxu0 %v640_v0  ;;  %v646_v6 = vld [vmem:[%s839_s2] sm:$0xff]   ;;  %v648_v7 = vld [vmem:[%s838_s1 + $0x18] sm:$0xff]   ;;  %v647_v8 = vld [vmem:[%s839_s2 + $0x8] sm:$0xff]  }
   0x4   :  { %616 = vmatpush3.bf16.msra.mxu1 %v641_v1  ;;  %556 = vmatprep.subr.bf16.mxu0 %v642_v2  ;;  %v650_v9 = vld [vmem:[%s839_s2 + $0x10] sm:$0xff]   ;;  %v649_v10 = vld [vmem:[%s838_s1 + $0x20] sm:$0xff]   ;;  %v652_v11 = vld [vmem:[%s838_s1 + $0x28] sm:$0xff]  }
   0x5   :  { %609 = vmatprep.subr.bf16.mxu1 %v643_v3  ;;  %560 = vmatprep.mubr.msk.bf16.mxu0 %vm133_vm0, %v646_v6  ;;  %v657_v12 = vld [vmem:[%s840_s0 + $0x10] sm:$0xff]   ;;  %v651_v13 = vld [vmem:[%s839_s2 + $0x18] sm:$0xff]   ;;  %v654_v14 = vld [vmem:[%s839_s2 + $0x20] sm:$0xff]  }
   0x6   :  { %596 = vmatprep.mubr.bf16.mxu1 %v657_v12  ;;  %v653_v15 = vld [vmem:[%s838_s1 + $0x30] sm:$0xff]   ;;  %v656_v16 = vld [vmem:[%s838_s1 + $0x38] sm:$0xff]   ;;  %v655_v17 = vld [vmem:[%s839_s2 + $0x28] sm:$0xff]  }
   0x7   :  { %557 = vmatpush3.bf16.msra.mxu0 %v642_v2  ;;  %v659_v18 = vld [vmem:[%s839_s2 + $0x30] sm:$0xff]   ;;  %v658_v19 = vld [vmem:[%s840_s0 + $0x18] sm:$0xff]   ;;  %v661_v20 = vld [vmem:[%s840_s0 + $0x20] sm:$0xff]  }
   0x8   :  { %617 = vmatpush3.bf16.msra.mxu1 %v643_v3  ;;  %558 = vmatprep.subr.bf16.mxu0 %v644_v4  ;;  %v660_v21 = vld [vmem:[%s839_s2 + $0x38] sm:$0xff]   ;;  %v663_v22 = vld [vmem:[%s840_s0] sm:$0xff]   ;;  %v662_v23 = vld [vmem:[%s840_s0 + $0x28] sm:$0xff]  }
   0x9   :  { %610 = vmatprep.subr.bf16.mxu1 %v645_v5  ;;  %v665_v24 = vld [vmem:[%s840_s0 + $0x30] sm:$0xff]   ;;  %v664_v25 = vld [vmem:[%s840_s0 + $0x8] sm:$0xff]   ;;  %v666_v26 = vld [vmem:[%s840_s0 + $0x38] sm:$0xff]  }
   0xa   :  { %v526_v36 = vld [vmem:[%s841_s4] ss:$0 sm:$0xff] }
   0xb   :  { %559 = vmatpush3.bf16.msra.mxu0 %v644_v4 }
   0xc   :  { %618 = vmatpush3.bf16.msra.mxu1 %v645_v5  ;;  %576 = vmatprep.subr.bf16.mxu0 %v641_v1 }
   0xd   :  { %611 = vmatprep.subr.bf16.mxu1 %v648_v7 }
   0xe   :  { %561 = vmatmul.mubr.msk.bf16.vlgmr.msra.gmra.mrb[0].mxu0 %vm133_vm0, %v647_v8 }
   0xf   :  { %577 = vmatpush3.bf16.msra.mxu0 %v641_v1  ;;  %564 = vmatprep.mubr.msk.bf16.mxu0 %vm133_vm0, %v650_v9 }
  0x10   :  { %619 = vmatpush3.bf16.msra.mxu1 %v648_v7  ;;  %578 = vmatprep.subr.bf16.mxu0 %v643_v3 }
  0x11   :  { %612 = vmatprep.subr.bf16.mxu1 %v649_v10 }
  0x13   :  { %579 = vmatpush3.bf16.msra.mxu0 %v643_v3 }
  0x14   :  { %620 = vmatpush3.bf16.msra.mxu1 %v649_v10  ;;  %580 = vmatprep.subr.bf16.mxu0 %v645_v5 }
  0x15   :  { %613 = vmatprep.subr.bf16.mxu1 %v652_v11 }
  0x16   :  { %565 = vmatmul.mubr.msk.bf16.gmra.mrb[4].mxu0 %vm133_vm0, %v651_v13 }
  0x17   :  { %581 = vmatpush3.bf16.msra.mxu0 %v645_v5  ;;  %568 = vmatprep.mubr.msk.bf16.mxu0 %vm133_vm0, %v654_v14 }
  0x18   :  { %621 = vmatpush3.bf16.msra.mxu1 %v652_v11  ;;  %582 = vmatprep.subr.bf16.mxu0 %v648_v7 }
  0x19   :  { %614 = vmatprep.subr.bf16.mxu1 %v653_v15 }
  0x1b   :  { %583 = vmatpush3.bf16.msra.mxu0 %v648_v7 }
  0x1c   :  { %622 = vmatpush3.bf16.msra.mxu1 %v653_v15  ;;  %584 = vmatprep.subr.bf16.mxu0 %v649_v10 }
  0x1d   :  { %615 = vmatprep.subr.bf16.mxu1 %v656_v16 }
  0x1e   :  { %569 = vmatmul.mubr.msk.bf16.gmra.mrb[8].mxu0 %vm133_vm0, %v655_v17 }
  0x1f   :  { %585 = vmatpush3.bf16.msra.mxu0 %v649_v10  ;;  %572 = vmatprep.mubr.msk.bf16.mxu0 %vm133_vm0, %v659_v18 }
  0x20   :  { %623 = vmatpush3.bf16.msra.mxu1 %v656_v16  ;;  %586 = vmatprep.subr.bf16.mxu0 %v652_v11 }
  0x23   :  { %597 = vmatmul.mubr.bf16.vlgmr.msra.gmra.mrb[0].mxu1 %v658_v19  ;;  %587 = vmatpush3.bf16.msra.mxu0 %v652_v11 }
  0x24   :  { %588 = vmatprep.subr.bf16.mxu0 %v653_v15  ;;  %600 = vmatprep.mubr.bf16.mxu1 %v661_v20 }
  0x26   :  { %573 = vmatmul.mubr.msk.bf16.gmra.mrb[12].mxu0 %vm133_vm0, %v660_v21 }
  0x27   :  { %589 = vmatpush3.bf16.msra.mxu0 %v653_v15  ;;  %592 = vmatprep.mubr.bf16.mxu0 %v663_v22 }
  0x28   :  { %590 = vmatprep.subr.bf16.mxu0 %v656_v16 }
  0x2b   :  { %601 = vmatmul.mubr.bf16.gmra.mrb[4].mxu1 %v662_v23  ;;  %591 = vmatpush3.bf16.msra.mxu0 %v656_v16 }
  0x2c   :  { %604 = vmatprep.mubr.bf16.mxu1 %v665_v24 }
  0x2e   :  { %593 = vmatmul.mubr.bf16.vlgmr.msra.gmra.mrb[0].mxu0 %v664_v25 }
  0x33   :  { %605 = vmatmul.mubr.bf16.gmra.mrb[8].mxu1 %v666_v26 }
  0xe9   :  { %v566_v27 = vpop.f32.mrb[4].mxu0 }
  0xea   :  { %v208_v28 = vpop.f32.mrb[5].mxu0 }
  0xeb   :  { %v567_v29 = vpop.f32.mrb[6].mxu0 }
  0xec   :  { %v211_v30 = vpop.f32.mrb[7].mxu0 }
  0xf1   :  { %v570_v31 = vpop.f32.mrb[8].mxu0 }
  0xf2   :  { %v224_v32 = vpop.f32.mrb[9].mxu0 }
  0xf3   :  { %v571_v33 = vpop.f32.mrb[10].mxu0 }
  0xf4   :  { %v227_v34 = vpop.f32.mrb[11].mxu0 }
  0xf6   :  { %v598_v35 = vpop.f32.mrb[0].mxu1 }
  0xf7   :  { %v410_v37 = vadd.f32 %v598_v35, %v566_v27  ;;  %v401_v38 = vpop.f32.mrb[1].mxu1 }
  0xf8   :  { %v402_v39 = vadd.f32 %v401_v38, %v208_v28  ;;  %v599_v40 = vpop.f32.mrb[2].mxu1 }
  0xf9   :  { %v461_v41 = vadd.f32 %v526_v36, %v410_v37  ;;  %v413_v42 = vadd.f32 %v599_v40, %v567_v29  ;;  %v404_v43 = vpop.f32.mrb[3].mxu1  ;;  %v574_v44 = vpop.f32.mrb[12].mxu0 }
  0xfa   :  { %v459_v45 = vadd.f32 %v526_v36, %v402_v39  ;;  %v405_v46 = vadd.f32 %v404_v43, %v211_v30  ;;  %v240_v47 = vpop.f32.mrb[13].mxu0 }
  0xfb   :  { %477 = vst [vmem:[%s842_s5 + $0x30] sm:$0xff] %v461_v41  ;;  %v462_v48 = vadd.f32 %v526_v36, %v413_v42  ;;  %v575_v49 = vpop.f32.mrb[14].mxu0 }
  0xfc   :  { %475 = vst [vmem:[%s842_s5 + $0x20] sm:$0xff] %v459_v45  ;;  %v460_v50 = vadd.f32 %v526_v36, %v405_v46  ;;  %v243_v51 = vpop.f32.mrb[15].mxu0 }
  0xfd   :  { %478 = vst [vmem:[%s842_s5 + $0x38] sm:$0xff] %v462_v48 }
  0xfe   :  { %476 = vst [vmem:[%s842_s5 + $0x28] sm:$0xff] %v460_v50  ;;  %v602_v52 = vpop.f32.mrb[4].mxu1 }
  0xff   :  { %v426_v53 = vadd.f32 %v602_v52, %v570_v31  ;;  %v417_v54 = vpop.f32.mrb[5].mxu1 }
 0x100   :  { %v418_v55 = vadd.f32 %v417_v54, %v224_v32  ;;  %v603_v56 = vpop.f32.mrb[6].mxu1 }
 0x101   :  { %v465_v57 = vadd.f32 %v526_v36, %v426_v53  ;;  %v429_v58 = vadd.f32 %v603_v56, %v571_v33  ;;  %v420_v59 = vpop.f32.mrb[7].mxu1  ;;  %v594_v60 = vpop.f32.mrb[0].mxu0 }
 0x102   :  { %v463_v61 = vadd.f32 %v526_v36, %v418_v55  ;;  %v421_v62 = vadd.f32 %v420_v59, %v227_v34  ;;  %v457_v63 = vadd.f32 %v594_v60, %v526_v36  ;;  %v385_v0 = vpop.f32.mrb[1].mxu0 }
 0x103   :  { %481 = vst [vmem:[%s842_s5 + $0x50] sm:$0xff] %v465_v57  ;;  %v466_v1 = vadd.f32 %v526_v36, %v429_v58  ;;  %v455_v2 = vadd.f32 %v526_v36, %v385_v0  ;;  %v595_v3 = vpop.f32.mrb[2].mxu0 }
 0x104   :  { %479 = vst [vmem:[%s842_s5 + $0x40] sm:$0xff] %v463_v61  ;;  %v464_v4 = vadd.f32 %v526_v36, %v421_v62  ;;  %473 = vst [vmem:[%s842_s5 + $0x10] sm:$0xff] %v457_v63  ;;  %v458_v5 = vadd.f32 %v595_v3, %v526_v36  ;;  %v388_v6 = vpop.f32.mrb[3].mxu0 }
 0x105   :  { %482 = vst [vmem:[%s842_s5 + $0x58] sm:$0xff] %v466_v1  ;;  %471 = vst [vmem:[%s842_s5] sm:$0xff] %v455_v2  ;;  %v456_v7 = vadd.f32 %v526_v36, %v388_v6 }
 0x106   :  { %480 = vst [vmem:[%s842_s5 + $0x48] sm:$0xff] %v464_v4  ;;  %474 = vst [vmem:[%s842_s5 + $0x18] sm:$0xff] %v458_v5  ;;  %v606_v8 = vpop.f32.mrb[8].mxu1 }
 0x107   :  { %472 = vst [vmem:[%s842_s5 + $0x8] sm:$0xff] %v456_v7  ;;  %v442_v9 = vadd.f32 %v606_v8, %v574_v44  ;;  %v433_v10 = vpop.f32.mrb[9].mxu1 }
 0x108   :  { %v434_v11 = vadd.f32 %v433_v10, %v240_v47  ;;  %v607_v12 = vpop.f32.mrb[10].mxu1 }
 0x109   :  { %v469_v13 = vadd.f32 %v526_v36, %v442_v9  ;;  %v445_v14 = vadd.f32 %v607_v12, %v575_v49  ;;  %v436_v15 = vpop.f32.mrb[11].mxu1 }
 0x10a   :  { %v467_v16 = vadd.f32 %v526_v36, %v434_v11  ;;  %v437_v17 = vadd.f32 %v436_v15, %v243_v51 }
 0x10b   :  { %485 = vst [vmem:[%s842_s5 + $0x70] sm:$0xff] %v469_v13  ;;  %v470_v18 = vadd.f32 %v526_v36, %v445_v14 }
 0x10c   :  { %483 = vst [vmem:[%s842_s5 + $0x60] sm:$0xff] %v467_v16  ;;  %v468_v19 = vadd.f32 %v526_v36, %v437_v17 }
 0x10d   :  { %486 = vst [vmem:[%s842_s5 + $0x78] sm:$0xff] %v470_v18 }
 0x10e   :  { %484 = vst [vmem:[%s842_s5 + $0x68] sm:$0xff] %v468_v19 }

// kernel: mobilenet_v3_seg_forward.19
= control target key start
LH: loop header
LB: loop body
LE: loop exit
PB: predicated region body
PF: predicated region fallthrough
CT: control target
= control target key end

     0   :  { %8 = vsyncpa [#allocation3], 0  ;;  %s876_s0 = inlined_call_operand.vmem [shape: f32[8,8,8], index: 0, kind: input, shape index: {}]   ;;  %s877_s1 = inlined_call_operand.vmem [shape: f32[64,8], index: 1, kind: input, shape index: {}]   ;;  %s878_s2 = inlined_call_operand.vmem [shape: f32[8,64], index: 2, kind: input, shape index: {}]   ;;  %s879_s3 = inlined_call_operand.hbm [shape: f32[8,64,64], index: 3, kind: output, shape index: {}]  }
   0x1   :  { %10 = vsyncpa [#allocation3 + $0x1], 0  ;;  %s722_s12 = smov 0   ;;  %s724_s13 = smov 0  }
   0x2   :  { %s726_s14 = smov 0   ;;  %s728_s15 = smov 0  }
   0x3 LB: > { %s743_s16 = sadd.s32 4294967295, %s697_s15   ;;  %s520_s17 = sadd.s32 4294967294, %s697_s15   ;;  %s697_s15 = sphi %s728_s15, %s885_s15   ;;  %s693_s14 = sphi %s726_s14, %s884_s14   ;;  %s689_s13 = sphi %s724_s13, %s883_s13   ;;  %s685_s12 = sphi %s722_s12, %s882_s12  }
   0x4   : > { %s747_s18 = sadd.s32 1, %s697_s15   ;;  %s91_s19 = sadd.s32 1, %s693_s14 }
   0x5   : > { %s88_s20 = ssub.s32 %s697_s15, %s747_s18  ;;  %p101_p0 = scmp.ne.s32.totalorder %s693_s14, %s689_s13 }
   0x6   : > { %p89_p1 = scmp.eq.s32.totalorder %s88_s20, 0  ;;  %p102_p2 = scmp.eq.s32.totalorder %s743_s16, 7 }
   0x7   : > { %p107_p3 = scmp.ne.s32.totalorder %s689_s13, %s685_s12  ;;  %p108_p4 = scmp.eq.s32.totalorder %s520_s17, 7 }
   0x8   : > { %s758_s21 = scalar_select %p89_p1, %s693_s14, %s91_s19  }
   0x9   : > { %p760_p5 = por %p102_p2, %p101_p0  ;;  %p764_p6 = por %p108_p4, %p107_p3 }
   0xa   : > { %p523_p7 = scmp.ge.s32.totalorder %s697_s15, 1  ;;  %p139_p8 = scmp.lt.s32.totalorder %s697_s15, 9 }
   0xc   : > { %p140_p9 = pnand %p523_p7, %p139_p8 }
   0xd   : > { %p162_p10 = scmp.lt.s32.totalorder (!%p140_p9), %s743_s16, 7  ;;  %v166_v0 = vld [vmem:[%s877_s1] sm:$0xff] (!%p140_p9)  ;;  %vm175_vm0 = vcmask (!%p140_p9), 64512   ;;  %v167_v2 = vld [vmem:[%s877_s1 + $0x8] sm:$0xff] (!%p140_p9)  ;;  %v168_v3 = vld [vmem:[%s877_s1 + $0x10] sm:$0xff] (!%p140_p9)  ;;  %s159_s29 = sand.u32 (!%p140_p9), 1, %s689_s13  }
   0xe   : > { %143 = sbr.rel (%p140_p9) target bundleno = 482 (0x1e2), region = 32  ;;  %568 = vmatprep.mubr.msk.f32.mxu0 (!%p140_p9), %vm175_vm0, %v166_v0  ;;  %v169_v4 = vld [vmem:[%s877_s1 + $0x18] sm:$0xff] (!%p140_p9)  ;;  %v170_v5 = vld [vmem:[%s877_s1 + $0x20] sm:$0xff] (!%p140_p9)  ;;  %v171_v6 = vld [vmem:[%s877_s1 + $0x28] sm:$0xff] (!%p140_p9)  ;;  %vm435_vm1 = vcmask (!%p140_p9), 523264   ;;  %s547_s5 = sshll.u32 (!%p140_p9), %s743_s16, 10 }
   0xf   : > { %v172_v7 = vld [vmem:[%s877_s1 + $0x30] sm:$0xff] (!%p140_p9)  ;;  %v173_v8 = vld [vmem:[%s877_s1 + $0x38] sm:$0xff] (!%p140_p9)  ;;  %v305_v9 = vld [vmem:[%s878_s2] sm:$0xff] (!%p140_p9)  ;;  %s829_s9 = scalar_lea.hbm (!%p140_p9), %s879_s3, %s547_s5  ;;  %s699_s11 = smov (!%p140_p9), [#allocation2]  }
  0x10   : > { %580 = vmatprep.subr.mxu1 (!%p140_p9), %v305_v9  ;;  %s639_s17 = sshll.u32 (!%p140_p9), %s699_s11, 4  ;;  %s640_s17 = int_to_ptr.vmem [resolvable:$false] %s639_s17 }
  0x11   : > { %581 = vmatpush3.msra.mxu1 (!%p140_p9), %v305_v9  ;;  %s641_s19 = scalar_lea.vmem (!%p140_p9), %s640_s17, 2048 }
  0x15   : > { %s163_s26 = scalar_select %p162_p10, %s743_s16, 7 }
  0x16   : > { %s835_s16 = scalar_lea.sflag [#allocation3], %s159_s29 }
  0x17   : > { %s525_s27 = sshll.u32 %s163_s26, 3 }
  0x18   : > { %s165_s30 = scalar_lea.vmem %s876_s0, %s525_s27 }
  0x19   : > { %v174_v1 = vld [vmem:[%s165_s30] sm:$0xff]  ;;  %s524_s30 = sshll.u32 %s159_s29, 6 }
  0x1a   : > { %566 = vmatprep.subr.mxu0 %v174_v1  ;;  %s161_s4 = scalar_lea.vmem [#allocation2], %s524_s30 }
  0x1b   : > { %567 = vmatpush3.msra.mxu0 %v174_v1  ;;  %s458_s6 = sshll.u32 %s161_s4, 4  ;;  %s831_s6 = int_to_ptr.vmem [resolvable:$true] %s458_s6 }
  0x1c   : > { %569 = vmatmul.mubr.msk.f32.vlgmr.msra.gmra.mrb[0].mxu0 %vm175_vm0, %v167_v2  ;;  %s635_s10 = scalar_lea.vmem %s831_s6, 1024  ;;  %p642_p0 = scmp.lt.s32.totalorder %s831_s6, %s640_s17 }
  0x1d   : > { %571 = vmatprep.mubr.msk.f32.mxu0 %vm175_vm0, %v168_v3  ;;  %p636_p11 = scmp.ne.s32.totalorder %s831_s6, %s635_s10  ;;  %p643_p1 = scmp.lt.s32.totalorder %s641_s19, %s635_s10 }
  0x1f   : > { %p637_p12 = pnand %p636_p11, %p760_p5  ;;  %p644_p2 = por %p643_p1, %p642_p0 }
  0x20   : > { %572 = vmatmul.mubr.msk.f32.gmra.mrb[2].mxu0 %vm175_vm0, %v169_v4 }
  0x21   : > { %574 = vmatprep.mubr.msk.f32.mxu0 %vm175_vm0, %v170_v5  ;;  %p638_p13 = pneg %p637_p12 }
  0x23   : > { %p645_p3 = pnand %p644_p2, %p638_p13 }
  0x24   : > { %575 = vmatmul.mubr.msk.f32.gmra.mrb[4].mxu0 %vm175_vm0, %v171_v6 }
  0x25   : > { %577 = vmatprep.mubr.msk.f32.mxu0 %vm175_vm0, %v172_v7 }
  0x28   : > { %578 = vmatmul.mubr.msk.f32.gmra.mrb[6].mxu0 %vm175_vm0, %v173_v8 }
  0xef   : > { %v570_v10 = vpop.f32.mrb[0].mxu0 }
  0xf0   : > { %v266_v11 = vpop.f32.mrb[1].mxu0 }
  0xf1   : > { %582 = vmatprep.mubr.msk.f32.mxu1 %vm175_vm0, %v266_v11 }
  0xf2   : > { %583 = vmatmul.mubr.msk.f32.vlgmr.msra.gmra.mrb[0].mxu1 %vm175_vm0, %v570_v10 }
  0xf3   : > { %v573_v12 = vpop.f32.mrb[2].mxu0 }
  0xf4   : > { %v276_v13 = vpop.f32.mrb[3].mxu0 }
  0xf5   : > { %585 = vmatprep.mubr.msk.f32.mxu1 %vm175_vm0, %v276_v13 }
  0xf6   : > { %586 = vmatmul.mubr.msk.f32.gmra.mrb[2].mxu1 %vm175_vm0, %v573_v12 }
  0xf7   : > { %v576_v14 = vpop.f32.mrb[4].mxu0 }
  0xf8   : > { %v286_v15 = vpop.f32.mrb[5].mxu0 }
  0xf9   : > { %588 = vmatprep.mubr.msk.f32.mxu1 %vm175_vm0, %v286_v15 }
  0xfa   : > { %589 = vmatmul.mubr.msk.f32.gmra.mrb[4].mxu1 %vm175_vm0, %v576_v14 }
  0xfb   : > { %v579_v16 = vpop.f32.mrb[6].mxu0 }
  0xfc   : > { %v296_v17 = vpop.f32.mrb[7].mxu0 }
  0xfd   : > { %591 = vmatprep.mubr.msk.f32.mxu1 %vm175_vm0, %v296_v17 }
  0xfe   : > { %592 = vmatmul.mubr.msk.f32.gmra.mrb[6].mxu1 %vm175_vm0, %v579_v16 }
 0x1c5   : > { %v584_v18 = vpop.f32.mrb[0].mxu1 }
 0x1c6   : > { %437 = vst.msk [vmem:[%s161_s4 + $0x8] sm:$0xff] %vm435_vm1, %v584_v18  ;;  %v396_v19 = vpop.f32.mrb[1].mxu1 }
 0x1c7   : > { %436 = vst.msk [vmem:[%s161_s4] sm:$0xff] %vm435_vm1, %v396_v19 }
 0x1c9   : > { %v587_v20 = vpop.f32.mrb[2].mxu1 }
 0x1ca   : > { %439 = vst.msk [vmem:[%s161_s4 + $0x18] sm:$0xff] %vm435_vm1, %v587_v20  ;;  %v406_v21 = vpop.f32.mrb[3].mxu1 }
 0x1cb   : > { %438 = vst.msk [vmem:[%s161_s4 + $0x10] sm:$0xff] %vm435_vm1, %v406_v21 }
 0x1cd   : > { %v590_v22 = vpop.f32.mrb[4].mxu1 }
 0x1ce   : > { %441 = vst.msk [vmem:[%s161_s4 + $0x28] sm:$0xff] %vm435_vm1, %v590_v22  ;;  %v416_v23 = vpop.f32.mrb[5].mxu1 }
 0x1cf   : > { %440 = vst.msk [vmem:[%s161_s4 + $0x20] sm:$0xff] %vm435_vm1, %v416_v23 }
 0x1d1   : > { %v593_v24 = vpop.f32.mrb[6].mxu1 }
 0x1d2   : > { %443 = vst.msk [vmem:[%s161_s4 + $0x38] sm:$0xff] %vm435_vm1, %v593_v24  ;;  %v426_v25 = vpop.f32.mrb[7].mxu1 }
 0x1d3   : > { %442 = vst.msk [vmem:[%s161_s4 + $0x30] sm:$0xff] %vm435_vm1, %v426_v25 }
 0x1d4   : > { %648 = shalt.err (!%p645_p3)
}
 0x1d5   : > { %s649_s20 = scalar_lea.hbm %s829_s9, 1024  ;;  %s653_s26 = scalar_lea.hbm %s879_s3, 8192 }
 0x1d6   : > { %p650_p4 = scmp.ne.s32.totalorder %s829_s9, %s649_s20  ;;  %p654_p9 = scmp.lt.u32.totalorder %s829_s9, %s879_s3 }
 0x1d7   : > { %p655_p10 = scmp.lt.u32.totalorder %s653_s26, %s649_s20  ;;  %p657_p12 = scmp.lt.u32.totalorder %s649_s20, %s829_s9 }
 0x1d8   : > { %p651_p7 = pnand %p650_p4, %p760_p5 }
 0x1d9   : > { %p656_p11 = por %p655_p10, %p654_p9 }
 0x1da   : > { %p652_p8 = pneg %p651_p7 }
 0x1db   : > { %p658_p13 = por %p657_p12, %p656_p11 }
 0x1dd   : > { %p659_p0 = pnand %p658_p13, %p652_p8 }
 0x1df   : > { %662 = shalt.err (!%p659_p0)
}
 0x1e0   : > { %s700_s29 = smov 128   ;;  %s701_s30 = smov 8  }
 0x1e1   : > { %594 = dma.vmem_to_hbm [thread:$0]  (%p760_p5), %s831_s6, 1024, %s829_s9, %s835_s16, %s700_s29, %s700_s29, %s701_s30  }
 0x1e2 PF: > { %p600_p1 = scmp.ge.s32.totalorder %s697_s15, 2  ;;  %s473_s4 = sand.u32 1, %s685_s12  }
 0x1e3   : > { %s474_s5 = scalar_lea.sflag [#allocation3], %s473_s4 }
 0x1e4   : > { %p597_p2 = pnand %p600_p1, %p764_p6 }
 0x1e6   : > { %680 = dma.done.wait (!%p597_p2), %s474_s5, 1024  }
 0x1e7   : > { %682 = vsyncadd (!%p597_p2), %s474_s5, 4294966272  ;;  %p13_p3 = scmp.ge.s32.totalorder %s747_s18, 10   ;;  %s882_s12 = smov %s689_s13 }
 0x1e8   : > { %s883_s13 = smov %s693_s14  ;;  %s884_s14 = smov %s758_s21 }
 0x1e9   : > { %s885_s15 = smov %s747_s18  ;;  %15 = sbr.rel (!%p13_p3) target bundleno = 3 (0x3), region = 67 }
 0x1f0   :  { %479 = vsyncpa [#allocation3], 1 }
 0x1f1   :  { %481 = vsyncpa [#allocation3 + $0x1], 1 }

</bundles_post_ra>
